<compile_context>
chip_gen: v5e
topology: v5e:2x2
jax: 0.10.0
libtpu: 0.0.40
codegen_flags: <defaults>
</compile_context>

<pallas_src>
import jax
import jax.numpy as jnp
from jax import lax
from jax.experimental import pallas as pl
from jax.experimental.pallas import tpu as pltpu

HIDDEN_DIM = 32
LAYERS_NUM = 2
EMBED_DIM = 1


# ----------------------------------------------------------------------------
# Fused Pallas kernel: full forward pass (2 layers x 2 dirs + MLP head)
# ----------------------------------------------------------------------------
def _make_fused_kernel(T, B, H, layers_num):
    """Build the fused kernel for static (T, B, H, layers_num).

    Fused gate-column layout (8H wide): [i_f i_b | f_f f_b | g_f g_b | o_f o_b]
    (g columns pre-scaled by 2 so tanh(g) = 2*sigmoid(2g) - 1).
    At step s the forward direction processes time s and the backward
    direction processes time T-1-s; all required time/block permutations are
    pre-baked into the weights by _prepare_fused_params.
    """

    def kernel(*refs):
        x_ref, h0_ref, c0_ref = refs[0:3]
        lstm_refs = refs[3:3 + 3 * layers_num]
        (w1_ref, b1_ref, w2_ref, b2_ref,
         w3_ref, b3_ref) = refs[3 + 3 * layers_num:9 + 3 * layers_num]
        out_ref, hn_ref, cn_ref = refs[9 + 3 * layers_num:12 + 3 * layers_num]

        z = None  # step-aligned fused input slab for the next consumer, (T*B, 4H)
        for l in range(layers_num):
            w_in = lstm_refs[3 * l + 0][...]     # layer0: (2, 8H); else (4H, 8H)
            w_hh = lstm_refs[3 * l + 1][...]     # (2H, 8H), block-structured
            b = lstm_refs[3 * l + 2][...]        # (1, 8H)

            # ---- hoisted, step-aligned input projection (off critical path) --
            if l == 0:
                # D_in == 1 per direction: VPU broadcast multiplies, no MXU dot.
                # x_ref col 0 = x(time s), col 1 = x(time T-1-s).
                xs = x_ref[...]
                hoisted = (xs[:, 0:1] * w_in[0:1, :]
                           + xs[:, 1:2] * w_in[1:2, :] + b)      # (T*B, 8H)
            else:
                hoisted = jnp.dot(z, w_in,
                                  preferred_element_type=jnp.float32) + b
            # TODO(synk): inter-layer LSTM dropout is train-mode only; identity here.

            # ---- fused bidirectional recurrence (fully unrolled, T static) ---
            h_cat = jnp.concatenate([h0_ref[2 * l], h0_ref[2 * l + 1]], axis=-1)
            c_cat = jnp.concatenate([c0_ref[2 * l], c0_ref[2 * l + 1]], axis=-1)

            hs = []
            for s in range(T):
                g = hoisted[s * B:(s + 1) * B, :] + jnp.dot(
                    h_cat, w_hh, preferred_element_type=jnp.float32)  # (B, 8H)
                sg = jax.nn.sigmoid(g)                 # ONE EUP pass, 8H lanes
                i_cat = sg[:, 0:2 * H]
                f_cat = sg[:, 2 * H:4 * H]
                g_cat = 2.0 * sg[:, 4 * H:6 * H] - 1.0  # == tanh(g), 2x folded in W
                o_cat = sg[:, 6 * H:8 * H]
                c_cat = f_cat * c_cat + i_cat * g_cat
                h_cat = o_cat * jnp.tanh(c_cat)        # ONE tanh on (B, 2H)
                hs.append(h_cat)                       # kept in registers

            # final states: fwd finishes at time T-1, bwd finishes at time 0,
            # both at step s = T-1 -> split the concatenated carry.
            hn_ref[2 * l] = h_cat[:, 0:H]
            hn_ref[2 * l + 1] = h_cat[:, H:2 * H]
            cn_ref[2 * l] = c_cat[:, 0:H]
            cn_ref[2 * l + 1] = c_cat[:, H:2 * H]

            # Step-aligned fused-input slab for the next layer / MLP head:
            #   Z[t] = [h_cat(step t) | h_cat(step T-1-t)]
            # The block permutation back to the "true" sequence layout is
            # absorbed into the prepared weights, so no lane shuffles here.
            z = jnp.concatenate(
                [jnp.concatenate([hs[t], hs[T - 1 - t]], axis=-1)
                 for t in range(T)],
                axis=0)                                # (T*B, 4H)

        # ---- MLP head on the (T*B, 4H) slab (w1 row-permuted / zero-padded) --
        y = jnp.dot(z, w1_ref[...], preferred_element_type=jnp.float32) + b1_ref[...]
        y = jnp.maximum(y, 0.0)
        y = jnp.dot(y, w2_ref[...], preferred_element_type=jnp.float32) + b2_ref[...]
        # TODO(synk): nn.Dropout between Linear(64,32) and ReLU is identity in eval mode.
        y = jnp.maximum(y, 0.0)
        # final (.,32)@(32,1): VPU multiply + lane reduce instead of an MXU pass
        out_ref[...] = (jnp.sum(y * w3_ref[...], axis=-1, keepdims=True)
                        + b3_ref[...])

    return kernel


# ----------------------------------------------------------------------------
# One-time weight preparation: fuse directions, fold 2x into g columns,
# absorb the step-alignment block permutations.
# ----------------------------------------------------------------------------
def _prepare_fused_params(params, H, layers_num):
    def split_gates(w):          # (..., 4H) -> i, f, g, o each (..., H)
        return w[..., 0:H], w[..., H:2 * H], w[..., 2 * H:3 * H], w[..., 3 * H:4 * H]

    def fwd_cols(w):             # place (i,f,2g,o) into the fwd gate columns
        i, f, g, o = split_gates(w)
        zz = jnp.zeros_like(i)
        return jnp.concatenate([i, zz, f, zz, 2.0 * g, zz, o, zz], axis=-1)

    def bwd_cols(w):             # place (i,f,2g,o) into the bwd gate columns
        i, f, g, o = split_gates(w)
        zz = jnp.zeros_like(i)
        return jnp.concatenate([zz, i, zz, f, zz, 2.0 * g, zz, o], axis=-1)

    flat = []
    for l in range(layers_num):
        w_ih_f, w_hh_f, b_f = params["lstm"][(l, 0)]
        w_ih_b, w_hh_b, b_b = params["lstm"][(l, 1)]
        if l == 0:
            # rows: [x(time s), x(time T-1-s)]
            w_in = jnp.concatenate([fwd_cols(w_ih_f), bwd_cols(w_ih_b)], axis=0)  # (2, 8H)
        else:
            # Z row blocks: [h_f(s), h_b(T-1-s), h_f(T-1-s), h_b(s)]
            w_in = jnp.concatenate([
                fwd_cols(w_ih_f[0:H]),         # Z block 0 -> fwd gates
                bwd_cols(w_ih_b[H:2 * H]),     # Z block 1 -> bwd gates
                bwd_cols(w_ih_b[0:H]),         # Z block 2 -> bwd gates
                fwd_cols(w_ih_f[H:2 * H]),     # Z block 3 -> fwd gates
            ], axis=0)                          # (4H, 8H)
        w_hh = jnp.concatenate([fwd_cols(w_hh_f), bwd_cols(w_hh_b)], axis=0)       # (2H, 8H)
        b_cat = fwd_cols(b_f) + bwd_cols(b_b)                                      # (1, 8H)
        flat.extend([w_in, w_hh, b_cat])

    w1, b1, w2, b2, w3, b3 = params["mlp"]
    zH = jnp.zeros((H, w1.shape[1]), w1.dtype)
    # seq(t) = [Z block 0 | Z block 3]  ->  permute/zero-pad w1 rows to consume Z.
    w1p = jnp.concatenate([w1[0:H], zH, zH, w1[H:2 * H]], axis=0)                  # (4H, 64)
    w3v = jnp.reshape(w3, (1, -1))                                                 # (1, 32)
    flat.extend([w1p, b1, w2, b2, w3v, b3])
    return flat


# ----------------------------------------------------------------------------
# Model wrapper
# ----------------------------------------------------------------------------
def lstm_model_forward(x, params, hidden=None,
                       hidden_dim=HIDDEN_DIM, layers_num=LAYERS_NUM):
    """Equivalent of LstmModel.forward (eval mode). x: (B, T, 1) float32."""
    B, T, E = x.shape
    H = hidden_dim
    if hidden is None:
        h_0 = jnp.zeros((layers_num * 2, B, H), jnp.float32)
        c_0 = jnp.zeros((layers_num * 2, B, H), jnp.float32)
    else:
        h_0, c_0 = hidden

    # time-major flattened input; col 0 = x(time s), col 1 = x(time T-1-s)
    x_tm = jnp.transpose(x, (1, 0, 2)).reshape(T * B, E)
    x_rev = jnp.transpose(x[:, ::-1, :], (1, 0, 2)).reshape(T * B, E)
    x_step = jnp.concatenate([x_tm, x_rev], axis=-1)          # (T*B, 2)

    fused = _prepare_fused_params(params, H, layers_num)

    vmem = pl.BlockSpec(memory_space=pltpu.MemorySpace.VMEM)
    n_in = 3 + len(fused)

    out_flat, h_n, c_n = pl.pallas_call(
        _make_fused_kernel(T, B, H, layers_num),
        out_shape=(jax.ShapeDtypeStruct((T * B, 1), jnp.float32),
                   jax.ShapeDtypeStruct((layers_num * 2, B, H), jnp.float32),
                   jax.ShapeDtypeStruct((layers_num * 2, B, H), jnp.float32)),
        in_specs=[vmem] * n_in,
        out_specs=(vmem, vmem, vmem),
    )(x_step, h_0, c_0, *fused)

    out = jnp.transpose(out_flat.reshape(T, B, 1), (1, 0, 2))  # (B, T, 1)
    return out, (h_n, c_n)


# ----------------------------------------------------------------------------
# Deterministic parameter init (PyTorch shapes transposed to (in, out) layout;
# LSTM biases b_ih + b_hh pre-summed; gate order i, f, g, o).
# ----------------------------------------------------------------------------
def init_params(key, hidden_dim=HIDDEN_DIM, layers_num=LAYERS_NUM, embed_dim=EMBED_DIM):
    H = hidden_dim
    params = {"lstm": {}, "mlp": None}
    for l in range(layers_num):
        d_in = embed_dim if l == 0 else 2 * H
        for d in range(2):
            key, k1, k2, k3 = jax.random.split(key, 4)
            w_ih = 0.1 * jax.random.normal(k1, (d_in, 4 * H), jnp.float32)
            w_hh = 0.1 * jax.random.normal(k2, (H, 4 * H), jnp.float32)
            b = 0.1 * jax.random.normal(k3, (1, 4 * H), jnp.float32)
            params["lstm"][(l, d)] = (w_ih, w_hh, b)
    key, k1, k2, k3, k4, k5, k6 = jax.random.split(key, 7)
    params["mlp"] = (
        0.1 * jax.random.normal(k1, (2 * H, 64), jnp.float32),
        0.1 * jax.random.normal(k2, (1, 64), jnp.float32),
        0.1 * jax.random.normal(k3, (64, 32), jnp.float32),
        0.1 * jax.random.normal(k4, (1, 32), jnp.float32),
        0.1 * jax.random.normal(k5, (32, 1), jnp.float32),
        0.1 * jax.random.normal(k6, (1, 1), jnp.float32),
    )
    return params


# ----------------------------------------------------------------------------
# Pure-JAX reference (same math, lax.scan) for a numerical sanity check.
# ----------------------------------------------------------------------------
def lstm_model_ref(x, params, hidden_dim=HIDDEN_DIM, layers_num=LAYERS_NUM):
    B, T, _ = x.shape
    H = hidden_dim
    inp = x
    h_ns, c_ns = [], []
    for l in range(layers_num):
        outs = []
        for d in range(2):
            w_ih, w_hh, b = params["lstm"][(l, d)]
            xs = inp if d == 0 else inp[:, ::-1]

            def step(carry, x_t, w_ih=w_ih, w_hh=w_hh, b=b):
                h, c = carry
                g = x_t @ w_ih + h @ w_hh + b
                i = jax.nn.sigmoid(g[:, :H])
                f = jax.nn.sigmoid(g[:, H:2 * H])
                gg = jnp.tanh(g[:, 2 * H:3 * H])
                o = jax.nn.sigmoid(g[:, 3 * H:])
                c = f * c + i * gg
                h = o * jnp.tanh(c)
                return (h, c), h

            init = (jnp.zeros((B, H), jnp.float32), jnp.zeros((B, H), jnp.float32))
            (hn, cn), hs = lax.scan(step, init, jnp.swapaxes(xs, 0, 1))
            hs = jnp.swapaxes(hs, 0, 1)
            if d == 1:
                hs = hs[:, ::-1]
            outs.append(hs)
            h_ns.append(hn)
            c_ns.append(cn)
        inp = jnp.concatenate(outs, axis=-1)
    w1, b1, w2, b2, w3, b3 = params["mlp"]
    z = jnp.maximum(inp @ w1 + b1, 0.0)
    z = jnp.maximum(z @ w2 + b2, 0.0)
    out = z @ w3 + b3
    return out, (jnp.stack(h_ns), jnp.stack(c_ns))


if __name__ == "__main__":
    key = jax.random.PRNGKey(0)
    kp, kx = jax.random.split(key)
    params = init_params(kp)

    B, T = 2, 8
    x = jax.random.normal(kx, (B, T, EMBED_DIM), jnp.float32)

    out, (h_n, c_n) = lstm_model_forward(x, params)
    out = jax.block_until_ready(out)
    h_n = jax.block_until_ready(h_n)
    c_n = jax.block_until_ready(c_n)

    ref_out, (ref_h, ref_c) = lstm_model_ref(x, params)
    assert out.shape == (B, T, 1)
    assert h_n.shape == (LAYERS_NUM * 2, B, HIDDEN_DIM)
    assert c_n.shape == (LAYERS_NUM * 2, B, HIDDEN_DIM)
    assert jnp.allclose(out, ref_out, atol=3e-5, rtol=1e-4)
    assert jnp.allclose(h_n, ref_h, atol=3e-5, rtol=1e-4)
    assert jnp.allclose(c_n, ref_c, atol=3e-5, rtol=1e-4)

    print("KERNEL_OK")
</pallas_src>

<mosaic_0001>
module attributes {stable_mosaic.version = 11 : i64} {
  func.func @kernel(%arg0: memref<16x2xf32, #tpu.memory_space<vmem>>, %arg1: memref<4x2x32xf32, #tpu.memory_space<vmem>>, %arg2: memref<4x2x32xf32, #tpu.memory_space<vmem>>, %arg3: memref<2x256xf32, #tpu.memory_space<vmem>>, %arg4: memref<64x256xf32, #tpu.memory_space<vmem>>, %arg5: memref<1x256xf32, #tpu.memory_space<vmem>>, %arg6: memref<128x256xf32, #tpu.memory_space<vmem>>, %arg7: memref<64x256xf32, #tpu.memory_space<vmem>>, %arg8: memref<1x256xf32, #tpu.memory_space<vmem>>, %arg9: memref<128x64xf32, #tpu.memory_space<vmem>>, %arg10: memref<1x64xf32, #tpu.memory_space<vmem>>, %arg11: memref<64x32xf32, #tpu.memory_space<vmem>>, %arg12: memref<1x32xf32, #tpu.memory_space<vmem>>, %arg13: memref<1x32xf32, #tpu.memory_space<vmem>>, %arg14: memref<1x1xf32, #tpu.memory_space<vmem>>, %arg15: memref<16x1xf32, #tpu.memory_space<vmem>>, %arg16: memref<4x2x32xf32, #tpu.memory_space<vmem>>, %arg17: memref<4x2x32xf32, #tpu.memory_space<vmem>>) attributes {dimension_semantics = [], scalar_prefetch = 0 : i64, scratch_operands = 0 : i64, tpu.core_type = #tpu.core_type<tc>} {
    %c0 = arith.constant 0 : index
    %c0_0 = arith.constant 0 : index
    %0 = vector.load %arg3[%c0, %c0_0] : memref<2x256xf32, #tpu.memory_space<vmem>>, vector<2x256xf32>
    %c0_1 = arith.constant 0 : index
    %c0_2 = arith.constant 0 : index
    %1 = vector.load %arg4[%c0_1, %c0_2] : memref<64x256xf32, #tpu.memory_space<vmem>>, vector<64x256xf32>
    %c0_3 = arith.constant 0 : index
    %c0_4 = arith.constant 0 : index
    %2 = vector.load %arg5[%c0_3, %c0_4] : memref<1x256xf32, #tpu.memory_space<vmem>>, vector<1x256xf32>
    %c0_5 = arith.constant 0 : index
    %c0_6 = arith.constant 0 : index
    %3 = vector.load %arg0[%c0_5, %c0_6] : memref<16x2xf32, #tpu.memory_space<vmem>>, vector<16x2xf32>
    %4 = vector.extract_strided_slice %3 {offsets = [0, 0], sizes = [16, 1], strides = [1, 1]} : vector<16x2xf32> to vector<16x1xf32>
    %5 = vector.extract_strided_slice %0 {offsets = [0, 0], sizes = [1, 256], strides = [1, 1]} : vector<2x256xf32> to vector<1x256xf32>
    %6 = vector.broadcast %4 : vector<16x1xf32> to vector<16x256xf32>
    %7 = vector.broadcast %5 : vector<1x256xf32> to vector<16x256xf32>
    %8 = arith.mulf %6, %7 : vector<16x256xf32>
    %9 = vector.extract_strided_slice %3 {offsets = [0, 1], sizes = [16, 1], strides = [1, 1]} : vector<16x2xf32> to vector<16x1xf32>
    %10 = vector.extract_strided_slice %0 {offsets = [1, 0], sizes = [1, 256], strides = [1, 1]} : vector<2x256xf32> to vector<1x256xf32>
    %11 = vector.broadcast %9 : vector<16x1xf32> to vector<16x256xf32>
    %12 = vector.broadcast %10 : vector<1x256xf32> to vector<16x256xf32>
    %13 = arith.mulf %11, %12 : vector<16x256xf32>
    %14 = arith.addf %8, %13 : vector<16x256xf32>
    %15 = vector.broadcast %2 : vector<1x256xf32> to vector<16x256xf32>
    %16 = arith.addf %14, %15 : vector<16x256xf32>
    %c0_7 = arith.constant 0 : index
    %c0_8 = arith.constant 0 : index
    %c0_9 = arith.constant 0 : index
    %17 = vector.load %arg1[%c0_7, %c0_8, %c0_9] : memref<4x2x32xf32, #tpu.memory_space<vmem>>, vector<1x2x32xf32>
    %18 = vector.shape_cast %17 : vector<1x2x32xf32> to vector<2x32xf32>
    %c1 = arith.constant 1 : index
    %c0_10 = arith.constant 0 : index
    %c0_11 = arith.constant 0 : index
    %19 = vector.load %arg1[%c1, %c0_10, %c0_11] : memref<4x2x32xf32, #tpu.memory_space<vmem>>, vector<1x2x32xf32>
    %20 = vector.shape_cast %19 : vector<1x2x32xf32> to vector<2x32xf32>
    %21 = tpu.concatenate %18, %20 in 1 : vector<2x32xf32>, vector<2x32xf32> -> vector<2x64xf32>
    %c0_12 = arith.constant 0 : index
    %c0_13 = arith.constant 0 : index
    %c0_14 = arith.constant 0 : index
    %22 = vector.load %arg2[%c0_12, %c0_13, %c0_14] : memref<4x2x32xf32, #tpu.memory_space<vmem>>, vector<1x2x32xf32>
    %23 = vector.shape_cast %22 : vector<1x2x32xf32> to vector<2x32xf32>
    %c1_15 = arith.constant 1 : index
    %c0_16 = arith.constant 0 : index
    %c0_17 = arith.constant 0 : index
    %24 = vector.load %arg2[%c1_15, %c0_16, %c0_17] : memref<4x2x32xf32, #tpu.memory_space<vmem>>, vector<1x2x32xf32>
    %25 = vector.shape_cast %24 : vector<1x2x32xf32> to vector<2x32xf32>
    %26 = tpu.concatenate %23, %25 in 1 : vector<2x32xf32>, vector<2x32xf32> -> vector<2x64xf32>
    %27 = vector.extract_strided_slice %16 {offsets = [0, 0], sizes = [2, 256], strides = [1, 1]} : vector<16x256xf32> to vector<2x256xf32>
    %cst = arith.constant dense<0.000000e+00> : vector<2x256xf32>
    %28 = tpu.matmul %21, %1, %cst {dimension_numbers = #tpu.dot_dimension_numbers<[1], [0], [0], [1], [0, 0, 1, 1], [], []>} : vector<2x64xf32>, vector<64x256xf32>, vector<2x256xf32> -> vector<2x256xf32>
    %29 = arith.addf %27, %28 : vector<2x256xf32>
    %30 = arith.negf %29 : vector<2x256xf32>
    %31 = math.exp %30 : vector<2x256xf32>
    %cst_18 = arith.constant 1.000000e+00 : f32
    %32 = vector.broadcast %cst_18 : f32 to vector<2x256xf32>
    %33 = arith.addf %32, %31 : vector<2x256xf32>
    %34 = arith.divf %32, %33 : vector<2x256xf32>
    %35 = vector.extract_strided_slice %34 {offsets = [0, 0], sizes = [2, 64], strides = [1, 1]} : vector<2x256xf32> to vector<2x64xf32>
    %36 = vector.extract_strided_slice %34 {offsets = [0, 64], sizes = [2, 64], strides = [1, 1]} : vector<2x256xf32> to vector<2x64xf32>
    %37 = vector.extract_strided_slice %34 {offsets = [0, 128], sizes = [2, 64], strides = [1, 1]} : vector<2x256xf32> to vector<2x64xf32>
    %cst_19 = arith.constant 2.000000e+00 : f32
    %38 = vector.broadcast %cst_19 : f32 to vector<2x64xf32>
    %39 = arith.mulf %38, %37 : vector<2x64xf32>
    %cst_20 = arith.constant 1.000000e+00 : f32
    %40 = vector.broadcast %cst_20 : f32 to vector<2x64xf32>
    %41 = arith.subf %39, %40 : vector<2x64xf32>
    %42 = vector.extract_strided_slice %34 {offsets = [0, 192], sizes = [2, 64], strides = [1, 1]} : vector<2x256xf32> to vector<2x64xf32>
    %43 = arith.mulf %36, %26 : vector<2x64xf32>
    %44 = arith.mulf %35, %41 : vector<2x64xf32>
    %45 = arith.addf %43, %44 : vector<2x64xf32>
    %46 = math.tanh %45 : vector<2x64xf32>
    %47 = arith.mulf %42, %46 : vector<2x64xf32>
    %48 = vector.extract_strided_slice %16 {offsets = [2, 0], sizes = [2, 256], strides = [1, 1]} : vector<16x256xf32> to vector<2x256xf32>
    %cst_21 = arith.constant dense<0.000000e+00> : vector<2x256xf32>
    %49 = tpu.matmul %47, %1, %cst_21 {dimension_numbers = #tpu.dot_dimension_numbers<[1], [0], [0], [1], [0, 0, 1, 1], [], []>} : vector<2x64xf32>, vector<64x256xf32>, vector<2x256xf32> -> vector<2x256xf32>
    %50 = arith.addf %48, %49 : vector<2x256xf32>
    %51 = arith.negf %50 : vector<2x256xf32>
    %52 = math.exp %51 : vector<2x256xf32>
    %cst_22 = arith.constant 1.000000e+00 : f32
    %53 = vector.broadcast %cst_22 : f32 to vector<2x256xf32>
    %54 = arith.addf %53, %52 : vector<2x256xf32>
    %55 = arith.divf %53, %54 : vector<2x256xf32>
    %56 = vector.extract_strided_slice %55 {offsets = [0, 0], sizes = [2, 64], strides = [1, 1]} : vector<2x256xf32> to vector<2x64xf32>
    %57 = vector.extract_strided_slice %55 {offsets = [0, 64], sizes = [2, 64], strides = [1, 1]} : vector<2x256xf32> to vector<2x64xf32>
    %58 = vector.extract_strided_slice %55 {offsets = [0, 128], sizes = [2, 64], strides = [1, 1]} : vector<2x256xf32> to vector<2x64xf32>
    %cst_23 = arith.constant 2.000000e+00 : f32
    %59 = vector.broadcast %cst_23 : f32 to vector<2x64xf32>
    %60 = arith.mulf %59, %58 : vector<2x64xf32>
    %cst_24 = arith.constant 1.000000e+00 : f32
    %61 = vector.broadcast %cst_24 : f32 to vector<2x64xf32>
    %62 = arith.subf %60, %61 : vector<2x64xf32>
    %63 = vector.extract_strided_slice %55 {offsets = [0, 192], sizes = [2, 64], strides = [1, 1]} : vector<2x256xf32> to vector<2x64xf32>
    %64 = arith.mulf %57, %45 : vector<2x64xf32>
    %65 = arith.mulf %56, %62 : vector<2x64xf32>
    %66 = arith.addf %64, %65 : vector<2x64xf32>
    %67 = math.tanh %66 : vector<2x64xf32>
    %68 = arith.mulf %63, %67 : vector<2x64xf32>
    %69 = vector.extract_strided_slice %16 {offsets = [4, 0], sizes = [2, 256], strides = [1, 1]} : vector<16x256xf32> to vector<2x256xf32>
    %cst_25 = arith.constant dense<0.000000e+00> : vector<2x256xf32>
    %70 = tpu.matmul %68, %1, %cst_25 {dimension_numbers = #tpu.dot_dimension_numbers<[1], [0], [0], [1], [0, 0, 1, 1], [], []>} : vector<2x64xf32>, vector<64x256xf32>, vector<2x256xf32> -> vector<2x256xf32>
    %71 = arith.addf %69, %70 : vector<2x256xf32>
    %72 = arith.negf %71 : vector<2x256xf32>
    %73 = math.exp %72 : vector<2x256xf32>
    %cst_26 = arith.constant 1.000000e+00 : f32
    %74 = vector.broadcast %cst_26 : f32 to vector<2x256xf32>
    %75 = arith.addf %74, %73 : vector<2x256xf32>
    %76 = arith.divf %74, %75 : vector<2x256xf32>
    %77 = vector.extract_strided_slice %76 {offsets = [0, 0], sizes = [2, 64], strides = [1, 1]} : vector<2x256xf32> to vector<2x64xf32>
    %78 = vector.extract_strided_slice %76 {offsets = [0, 64], sizes = [2, 64], strides = [1, 1]} : vector<2x256xf32> to vector<2x64xf32>
    %79 = vector.extract_strided_slice %76 {offsets = [0, 128], sizes = [2, 64], strides = [1, 1]} : vector<2x256xf32> to vector<2x64xf32>
    %cst_27 = arith.constant 2.000000e+00 : f32
    %80 = vector.broadcast %cst_27 : f32 to vector<2x64xf32>
    %81 = arith.mulf %80, %79 : vector<2x64xf32>
    %cst_28 = arith.constant 1.000000e+00 : f32
    %82 = vector.broadcast %cst_28 : f32 to vector<2x64xf32>
    %83 = arith.subf %81, %82 : vector<2x64xf32>
    %84 = vector.extract_strided_slice %76 {offsets = [0, 192], sizes = [2, 64], strides = [1, 1]} : vector<2x256xf32> to vector<2x64xf32>
    %85 = arith.mulf %78, %66 : vector<2x64xf32>
    %86 = arith.mulf %77, %83 : vector<2x64xf32>
    %87 = arith.addf %85, %86 : vector<2x64xf32>
    %88 = math.tanh %87 : vector<2x64xf32>
    %89 = arith.mulf %84, %88 : vector<2x64xf32>
    %90 = vector.extract_strided_slice %16 {offsets = [6, 0], sizes = [2, 256], strides = [1, 1]} : vector<16x256xf32> to vector<2x256xf32>
    %cst_29 = arith.constant dense<0.000000e+00> : vector<2x256xf32>
    %91 = tpu.matmul %89, %1, %cst_29 {dimension_numbers = #tpu.dot_dimension_numbers<[1], [0], [0], [1], [0, 0, 1, 1], [], []>} : vector<2x64xf32>, vector<64x256xf32>, vector<2x256xf32> -> vector<2x256xf32>
    %92 = arith.addf %90, %91 : vector<2x256xf32>
    %93 = arith.negf %92 : vector<2x256xf32>
    %94 = math.exp %93 : vector<2x256xf32>
    %cst_30 = arith.constant 1.000000e+00 : f32
    %95 = vector.broadcast %cst_30 : f32 to vector<2x256xf32>
    %96 = arith.addf %95, %94 : vector<2x256xf32>
    %97 = arith.divf %95, %96 : vector<2x256xf32>
    %98 = vector.extract_strided_slice %97 {offsets = [0, 0], sizes = [2, 64], strides = [1, 1]} : vector<2x256xf32> to vector<2x64xf32>
    %99 = vector.extract_strided_slice %97 {offsets = [0, 64], sizes = [2, 64], strides = [1, 1]} : vector<2x256xf32> to vector<2x64xf32>
    %100 = vector.extract_strided_slice %97 {offsets = [0, 128], sizes = [2, 64], strides = [1, 1]} : vector<2x256xf32> to vector<2x64xf32>
    %cst_31 = arith.constant 2.000000e+00 : f32
    %101 = vector.broadcast %cst_31 : f32 to vector<2x64xf32>
    %102 = arith.mulf %101, %100 : vector<2x64xf32>
    %cst_32 = arith.constant 1.000000e+00 : f32
    %103 = vector.broadcast %cst_32 : f32 to vector<2x64xf32>
    %104 = arith.subf %102, %103 : vector<2x64xf32>
    %105 = vector.extract_strided_slice %97 {offsets = [0, 192], sizes = [2, 64], strides = [1, 1]} : vector<2x256xf32> to vector<2x64xf32>
    %106 = arith.mulf %99, %87 : vector<2x64xf32>
    %107 = arith.mulf %98, %104 : vector<2x64xf32>
    %108 = arith.addf %106, %107 : vector<2x64xf32>
    %109 = math.tanh %108 : vector<2x64xf32>
    %110 = arith.mulf %105, %109 : vector<2x64xf32>
    %111 = vector.extract_strided_slice %16 {offsets = [8, 0], sizes = [2, 256], strides = [1, 1]} : vector<16x256xf32> to vector<2x256xf32>
    %cst_33 = arith.constant dense<0.000000e+00> : vector<2x256xf32>
    %112 = tpu.matmul %110, %1, %cst_33 {dimension_numbers = #tpu.dot_dimension_numbers<[1], [0], [0], [1], [0, 0, 1, 1], [], []>} : vector<2x64xf32>, vector<64x256xf32>, vector<2x256xf32> -> vector<2x256xf32>
    %113 = arith.addf %111, %112 : vector<2x256xf32>
    %114 = arith.negf %113 : vector<2x256xf32>
    %115 = math.exp %114 : vector<2x256xf32>
    %cst_34 = arith.constant 1.000000e+00 : f32
    %116 = vector.broadcast %cst_34 : f32 to vector<2x256xf32>
    %117 = arith.addf %116, %115 : vector<2x256xf32>
    %118 = arith.divf %116, %117 : vector<2x256xf32>
    %119 = vector.extract_strided_slice %118 {offsets = [0, 0], sizes = [2, 64], strides = [1, 1]} : vector<2x256xf32> to vector<2x64xf32>
    %120 = vector.extract_strided_slice %118 {offsets = [0, 64], sizes = [2, 64], strides = [1, 1]} : vector<2x256xf32> to vector<2x64xf32>
    %121 = vector.extract_strided_slice %118 {offsets = [0, 128], sizes = [2, 64], strides = [1, 1]} : vector<2x256xf32> to vector<2x64xf32>
    %cst_35 = arith.constant 2.000000e+00 : f32
    %122 = vector.broadcast %cst_35 : f32 to vector<2x64xf32>
    %123 = arith.mulf %122, %121 : vector<2x64xf32>
    %cst_36 = arith.constant 1.000000e+00 : f32
    %124 = vector.broadcast %cst_36 : f32 to vector<2x64xf32>
    %125 = arith.subf %123, %124 : vector<2x64xf32>
    %126 = vector.extract_strided_slice %118 {offsets = [0, 192], sizes = [2, 64], strides = [1, 1]} : vector<2x256xf32> to vector<2x64xf32>
    %127 = arith.mulf %120, %108 : vector<2x64xf32>
    %128 = arith.mulf %119, %125 : vector<2x64xf32>
    %129 = arith.addf %127, %128 : vector<2x64xf32>
    %130 = math.tanh %129 : vector<2x64xf32>
    %131 = arith.mulf %126, %130 : vector<2x64xf32>
    %132 = vector.extract_strided_slice %16 {offsets = [10, 0], sizes = [2, 256], strides = [1, 1]} : vector<16x256xf32> to vector<2x256xf32>
    %cst_37 = arith.constant dense<0.000000e+00> : vector<2x256xf32>
    %133 = tpu.matmul %131, %1, %cst_37 {dimension_numbers = #tpu.dot_dimension_numbers<[1], [0], [0], [1], [0, 0, 1, 1], [], []>} : vector<2x64xf32>, vector<64x256xf32>, vector<2x256xf32> -> vector<2x256xf32>
    %134 = arith.addf %132, %133 : vector<2x256xf32>
    %135 = arith.negf %134 : vector<2x256xf32>
    %136 = math.exp %135 : vector<2x256xf32>
    %cst_38 = arith.constant 1.000000e+00 : f32
    %137 = vector.broadcast %cst_38 : f32 to vector<2x256xf32>
    %138 = arith.addf %137, %136 : vector<2x256xf32>
    %139 = arith.divf %137, %138 : vector<2x256xf32>
    %140 = vector.extract_strided_slice %139 {offsets = [0, 0], sizes = [2, 64], strides = [1, 1]} : vector<2x256xf32> to vector<2x64xf32>
    %141 = vector.extract_strided_slice %139 {offsets = [0, 64], sizes = [2, 64], strides = [1, 1]} : vector<2x256xf32> to vector<2x64xf32>
    %142 = vector.extract_strided_slice %139 {offsets = [0, 128], sizes = [2, 64], strides = [1, 1]} : vector<2x256xf32> to vector<2x64xf32>
    %cst_39 = arith.constant 2.000000e+00 : f32
    %143 = vector.broadcast %cst_39 : f32 to vector<2x64xf32>
    %144 = arith.mulf %143, %142 : vector<2x64xf32>
    %cst_40 = arith.constant 1.000000e+00 : f32
    %145 = vector.broadcast %cst_40 : f32 to vector<2x64xf32>
    %146 = arith.subf %144, %145 : vector<2x64xf32>
    %147 = vector.extract_strided_slice %139 {offsets = [0, 192], sizes = [2, 64], strides = [1, 1]} : vector<2x256xf32> to vector<2x64xf32>
    %148 = arith.mulf %141, %129 : vector<2x64xf32>
    %149 = arith.mulf %140, %146 : vector<2x64xf32>
    %150 = arith.addf %148, %149 : vector<2x64xf32>
    %151 = math.tanh %150 : vector<2x64xf32>
    %152 = arith.mulf %147, %151 : vector<2x64xf32>
    %153 = vector.extract_strided_slice %16 {offsets = [12, 0], sizes = [2, 256], strides = [1, 1]} : vector<16x256xf32> to vector<2x256xf32>
    %cst_41 = arith.constant dense<0.000000e+00> : vector<2x256xf32>
    %154 = tpu.matmul %152, %1, %cst_41 {dimension_numbers = #tpu.dot_dimension_numbers<[1], [0], [0], [1], [0, 0, 1, 1], [], []>} : vector<2x64xf32>, vector<64x256xf32>, vector<2x256xf32> -> vector<2x256xf32>
    %155 = arith.addf %153, %154 : vector<2x256xf32>
    %156 = arith.negf %155 : vector<2x256xf32>
    %157 = math.exp %156 : vector<2x256xf32>
    %cst_42 = arith.constant 1.000000e+00 : f32
    %158 = vector.broadcast %cst_42 : f32 to vector<2x256xf32>
    %159 = arith.addf %158, %157 : vector<2x256xf32>
    %160 = arith.divf %158, %159 : vector<2x256xf32>
    %161 = vector.extract_strided_slice %160 {offsets = [0, 0], sizes = [2, 64], strides = [1, 1]} : vector<2x256xf32> to vector<2x64xf32>
    %162 = vector.extract_strided_slice %160 {offsets = [0, 64], sizes = [2, 64], strides = [1, 1]} : vector<2x256xf32> to vector<2x64xf32>
    %163 = vector.extract_strided_slice %160 {offsets = [0, 128], sizes = [2, 64], strides = [1, 1]} : vector<2x256xf32> to vector<2x64xf32>
    %cst_43 = arith.constant 2.000000e+00 : f32
    %164 = vector.broadcast %cst_43 : f32 to vector<2x64xf32>
    %165 = arith.mulf %164, %163 : vector<2x64xf32>
    %cst_44 = arith.constant 1.000000e+00 : f32
    %166 = vector.broadcast %cst_44 : f32 to vector<2x64xf32>
    %167 = arith.subf %165, %166 : vector<2x64xf32>
    %168 = vector.extract_strided_slice %160 {offsets = [0, 192], sizes = [2, 64], strides = [1, 1]} : vector<2x256xf32> to vector<2x64xf32>
    %169 = arith.mulf %162, %150 : vector<2x64xf32>
    %170 = arith.mulf %161, %167 : vector<2x64xf32>
    %171 = arith.addf %169, %170 : vector<2x64xf32>
    %172 = math.tanh %171 : vector<2x64xf32>
    %173 = arith.mulf %168, %172 : vector<2x64xf32>
    %174 = vector.extract_strided_slice %16 {offsets = [14, 0], sizes = [2, 256], strides = [1, 1]} : vector<16x256xf32> to vector<2x256xf32>
    %cst_45 = arith.constant dense<0.000000e+00> : vector<2x256xf32>
    %175 = tpu.matmul %173, %1, %cst_45 {dimension_numbers = #tpu.dot_dimension_numbers<[1], [0], [0], [1], [0, 0, 1, 1], [], []>} : vector<2x64xf32>, vector<64x256xf32>, vector<2x256xf32> -> vector<2x256xf32>
    %176 = arith.addf %174, %175 : vector<2x256xf32>
    %177 = arith.negf %176 : vector<2x256xf32>
    %178 = math.exp %177 : vector<2x256xf32>
    %cst_46 = arith.constant 1.000000e+00 : f32
    %179 = vector.broadcast %cst_46 : f32 to vector<2x256xf32>
    %180 = arith.addf %179, %178 : vector<2x256xf32>
    %181 = arith.divf %179, %180 : vector<2x256xf32>
    %182 = vector.extract_strided_slice %181 {offsets = [0, 0], sizes = [2, 64], strides = [1, 1]} : vector<2x256xf32> to vector<2x64xf32>
    %183 = vector.extract_strided_slice %181 {offsets = [0, 64], sizes = [2, 64], strides = [1, 1]} : vector<2x256xf32> to vector<2x64xf32>
    %184 = vector.extract_strided_slice %181 {offsets = [0, 128], sizes = [2, 64], strides = [1, 1]} : vector<2x256xf32> to vector<2x64xf32>
    %cst_47 = arith.constant 2.000000e+00 : f32
    %185 = vector.broadcast %cst_47 : f32 to vector<2x64xf32>
    %186 = arith.mulf %185, %184 : vector<2x64xf32>
    %cst_48 = arith.constant 1.000000e+00 : f32
    %187 = vector.broadcast %cst_48 : f32 to vector<2x64xf32>
    %188 = arith.subf %186, %187 : vector<2x64xf32>
    %189 = vector.extract_strided_slice %181 {offsets = [0, 192], sizes = [2, 64], strides = [1, 1]} : vector<2x256xf32> to vector<2x64xf32>
    %190 = arith.mulf %183, %171 : vector<2x64xf32>
    %191 = arith.mulf %182, %188 : vector<2x64xf32>
    %192 = arith.addf %190, %191 : vector<2x64xf32>
    %193 = math.tanh %192 : vector<2x64xf32>
    %194 = arith.mulf %189, %193 : vector<2x64xf32>
    %195 = vector.extract_strided_slice %194 {offsets = [0, 0], sizes = [2, 32], strides = [1, 1]} : vector<2x64xf32> to vector<2x32xf32>
    %c0_49 = arith.constant 0 : index
    %c0_50 = arith.constant 0 : index
    %c0_51 = arith.constant 0 : index
    %196 = vector.load %arg16[%c0_49, %c0_50, %c0_51] : memref<4x2x32xf32, #tpu.memory_space<vmem>>, vector<1x2x32xf32>
    %197 = vector.shape_cast %196 : vector<1x2x32xf32> to vector<2x32xf32>
    %198 = vector.shape_cast %195 : vector<2x32xf32> to vector<1x2x32xf32>
    tpu.vector_store %arg16[%c0_49, %c0_50, %c0_51], %198 {strides = array<i32>} : memref<4x2x32xf32, #tpu.memory_space<vmem>>, vector<1x2x32xf32>,
    %199 = vector.extract_strided_slice %194 {offsets = [0, 32], sizes = [2, 32], strides = [1, 1]} : vector<2x64xf32> to vector<2x32xf32>
    %c1_52 = arith.constant 1 : index
    %c0_53 = arith.constant 0 : index
    %c0_54 = arith.constant 0 : index
    %200 = vector.load %arg16[%c1_52, %c0_53, %c0_54] : memref<4x2x32xf32, #tpu.memory_space<vmem>>, vector<1x2x32xf32>
    %201 = vector.shape_cast %200 : vector<1x2x32xf32> to vector<2x32xf32>
    %202 = vector.shape_cast %199 : vector<2x32xf32> to vector<1x2x32xf32>
    tpu.vector_store %arg16[%c1_52, %c0_53, %c0_54], %202 {strides = array<i32>} : memref<4x2x32xf32, #tpu.memory_space<vmem>>, vector<1x2x32xf32>,
    %203 = vector.extract_strided_slice %192 {offsets = [0, 0], sizes = [2, 32], strides = [1, 1]} : vector<2x64xf32> to vector<2x32xf32>
    %c0_55 = arith.constant 0 : index
    %c0_56 = arith.constant 0 : index
    %c0_57 = arith.constant 0 : index
    %204 = vector.load %arg17[%c0_55, %c0_56, %c0_57] : memref<4x2x32xf32, #tpu.memory_space<vmem>>, vector<1x2x32xf32>
    %205 = vector.shape_cast %204 : vector<1x2x32xf32> to vector<2x32xf32>
    %206 = vector.shape_cast %203 : vector<2x32xf32> to vector<1x2x32xf32>
    tpu.vector_store %arg17[%c0_55, %c0_56, %c0_57], %206 {strides = array<i32>} : memref<4x2x32xf32, #tpu.memory_space<vmem>>, vector<1x2x32xf32>,
    %207 = vector.extract_strided_slice %192 {offsets = [0, 32], sizes = [2, 32], strides = [1, 1]} : vector<2x64xf32> to vector<2x32xf32>
    %c1_58 = arith.constant 1 : index
    %c0_59 = arith.constant 0 : index
    %c0_60 = arith.constant 0 : index
    %208 = vector.load %arg17[%c1_58, %c0_59, %c0_60] : memref<4x2x32xf32, #tpu.memory_space<vmem>>, vector<1x2x32xf32>
    %209 = vector.shape_cast %208 : vector<1x2x32xf32> to vector<2x32xf32>
    %210 = vector.shape_cast %207 : vector<2x32xf32> to vector<1x2x32xf32>
    tpu.vector_store %arg17[%c1_58, %c0_59, %c0_60], %210 {strides = array<i32>} : memref<4x2x32xf32, #tpu.memory_space<vmem>>, vector<1x2x32xf32>,
    %211 = tpu.concatenate %47, %194 in 1 : vector<2x64xf32>, vector<2x64xf32> -> vector<2x128xf32>
    %212 = tpu.concatenate %68, %173 in 1 : vector<2x64xf32>, vector<2x64xf32> -> vector<2x128xf32>
    %213 = tpu.concatenate %89, %152 in 1 : vector<2x64xf32>, vector<2x64xf32> -> vector<2x128xf32>
    %214 = tpu.concatenate %110, %131 in 1 : vector<2x64xf32>, vector<2x64xf32> -> vector<2x128xf32>
    %215 = tpu.concatenate %131, %110 in 1 : vector<2x64xf32>, vector<2x64xf32> -> vector<2x128xf32>
    %216 = tpu.concatenate %152, %89 in 1 : vector<2x64xf32>, vector<2x64xf32> -> vector<2x128xf32>
    %217 = tpu.concatenate %173, %68 in 1 : vector<2x64xf32>, vector<2x64xf32> -> vector<2x128xf32>
    %218 = tpu.concatenate %194, %47 in 1 : vector<2x64xf32>, vector<2x64xf32> -> vector<2x128xf32>
    %219 = tpu.concatenate %211, %212, %213, %214, %215, %216, %217, %218 in 0 : vector<2x128xf32>, vector<2x128xf32>, vector<2x128xf32>, vector<2x128xf32>, vector<2x128xf32>, vector<2x128xf32>, vector<2x128xf32>, vector<2x128xf32> -> vector<16x128xf32>
    %c0_61 = arith.constant 0 : index
    %c0_62 = arith.constant 0 : index
    %220 = vector.load %arg6[%c0_61, %c0_62] : memref<128x256xf32, #tpu.memory_space<vmem>>, vector<128x256xf32>
    %c0_63 = arith.constant 0 : index
    %c0_64 = arith.constant 0 : index
    %221 = vector.load %arg7[%c0_63, %c0_64] : memref<64x256xf32, #tpu.memory_space<vmem>>, vector<64x256xf32>
    %c0_65 = arith.constant 0 : index
    %c0_66 = arith.constant 0 : index
    %222 = vector.load %arg8[%c0_65, %c0_66] : memref<1x256xf32, #tpu.memory_space<vmem>>, vector<1x256xf32>
    %cst_67 = arith.constant dense<0.000000e+00> : vector<16x256xf32>
    %223 = tpu.matmul %219, %220, %cst_67 {dimension_numbers = #tpu.dot_dimension_numbers<[1], [0], [0], [1], [0, 0, 1, 1], [], []>} : vector<16x128xf32>, vector<128x256xf32>, vector<16x256xf32> -> vector<16x256xf32>
    %224 = vector.broadcast %222 : vector<1x256xf32> to vector<16x256xf32>
    %225 = arith.addf %223, %224 : vector<16x256xf32>
    %c2 = arith.constant 2 : index
    %c0_68 = arith.constant 0 : index
    %c0_69 = arith.constant 0 : index
    %226 = vector.load %arg1[%c2, %c0_68, %c0_69] : memref<4x2x32xf32, #tpu.memory_space<vmem>>, vector<1x2x32xf32>
    %227 = vector.shape_cast %226 : vector<1x2x32xf32> to vector<2x32xf32>
    %c3 = arith.constant 3 : index
    %c0_70 = arith.constant 0 : index
    %c0_71 = arith.constant 0 : index
    %228 = vector.load %arg1[%c3, %c0_70, %c0_71] : memref<4x2x32xf32, #tpu.memory_space<vmem>>, vector<1x2x32xf32>
    %229 = vector.shape_cast %228 : vector<1x2x32xf32> to vector<2x32xf32>
    %230 = tpu.concatenate %227, %229 in 1 : vector<2x32xf32>, vector<2x32xf32> -> vector<2x64xf32>
    %c2_72 = arith.constant 2 : index
    %c0_73 = arith.constant 0 : index
    %c0_74 = arith.constant 0 : index
    %231 = vector.load %arg2[%c2_72, %c0_73, %c0_74] : memref<4x2x32xf32, #tpu.memory_space<vmem>>, vector<1x2x32xf32>
    %232 = vector.shape_cast %231 : vector<1x2x32xf32> to vector<2x32xf32>
    %c3_75 = arith.constant 3 : index
    %c0_76 = arith.constant 0 : index
    %c0_77 = arith.constant 0 : index
    %233 = vector.load %arg2[%c3_75, %c0_76, %c0_77] : memref<4x2x32xf32, #tpu.memory_space<vmem>>, vector<1x2x32xf32>
    %234 = vector.shape_cast %233 : vector<1x2x32xf32> to vector<2x32xf32>
    %235 = tpu.concatenate %232, %234 in 1 : vector<2x32xf32>, vector<2x32xf32> -> vector<2x64xf32>
    %236 = vector.extract_strided_slice %225 {offsets = [0, 0], sizes = [2, 256], strides = [1, 1]} : vector<16x256xf32> to vector<2x256xf32>
    %cst_78 = arith.constant dense<0.000000e+00> : vector<2x256xf32>
    %237 = tpu.matmul %230, %221, %cst_78 {dimension_numbers = #tpu.dot_dimension_numbers<[1], [0], [0], [1], [0, 0, 1, 1], [], []>} : vector<2x64xf32>, vector<64x256xf32>, vector<2x256xf32> -> vector<2x256xf32>
    %238 = arith.addf %236, %237 : vector<2x256xf32>
    %239 = arith.negf %238 : vector<2x256xf32>
    %240 = math.exp %239 : vector<2x256xf32>
    %cst_79 = arith.constant 1.000000e+00 : f32
    %241 = vector.broadcast %cst_79 : f32 to vector<2x256xf32>
    %242 = arith.addf %241, %240 : vector<2x256xf32>
    %243 = arith.divf %241, %242 : vector<2x256xf32>
    %244 = vector.extract_strided_slice %243 {offsets = [0, 0], sizes = [2, 64], strides = [1, 1]} : vector<2x256xf32> to vector<2x64xf32>
    %245 = vector.extract_strided_slice %243 {offsets = [0, 64], sizes = [2, 64], strides = [1, 1]} : vector<2x256xf32> to vector<2x64xf32>
    %246 = vector.extract_strided_slice %243 {offsets = [0, 128], sizes = [2, 64], strides = [1, 1]} : vector<2x256xf32> to vector<2x64xf32>
    %cst_80 = arith.constant 2.000000e+00 : f32
    %247 = vector.broadcast %cst_80 : f32 to vector<2x64xf32>
    %248 = arith.mulf %247, %246 : vector<2x64xf32>
    %cst_81 = arith.constant 1.000000e+00 : f32
    %249 = vector.broadcast %cst_81 : f32 to vector<2x64xf32>
    %250 = arith.subf %248, %249 : vector<2x64xf32>
    %251 = vector.extract_strided_slice %243 {offsets = [0, 192], sizes = [2, 64], strides = [1, 1]} : vector<2x256xf32> to vector<2x64xf32>
    %252 = arith.mulf %245, %235 : vector<2x64xf32>
    %253 = arith.mulf %244, %250 : vector<2x64xf32>
    %254 = arith.addf %252, %253 : vector<2x64xf32>
    %255 = math.tanh %254 : vector<2x64xf32>
    %256 = arith.mulf %251, %255 : vector<2x64xf32>
    %257 = vector.extract_strided_slice %225 {offsets = [2, 0], sizes = [2, 256], strides = [1, 1]} : vector<16x256xf32> to vector<2x256xf32>
    %cst_82 = arith.constant dense<0.000000e+00> : vector<2x256xf32>
    %258 = tpu.matmul %256, %221, %cst_82 {dimension_numbers = #tpu.dot_dimension_numbers<[1], [0], [0], [1], [0, 0, 1, 1], [], []>} : vector<2x64xf32>, vector<64x256xf32>, vector<2x256xf32> -> vector<2x256xf32>
    %259 = arith.addf %257, %258 : vector<2x256xf32>
    %260 = arith.negf %259 : vector<2x256xf32>
    %261 = math.exp %260 : vector<2x256xf32>
    %cst_83 = arith.constant 1.000000e+00 : f32
    %262 = vector.broadcast %cst_83 : f32 to vector<2x256xf32>
    %263 = arith.addf %262, %261 : vector<2x256xf32>
    %264 = arith.divf %262, %263 : vector<2x256xf32>
    %265 = vector.extract_strided_slice %264 {offsets = [0, 0], sizes = [2, 64], strides = [1, 1]} : vector<2x256xf32> to vector<2x64xf32>
    %266 = vector.extract_strided_slice %264 {offsets = [0, 64], sizes = [2, 64], strides = [1, 1]} : vector<2x256xf32> to vector<2x64xf32>
    %267 = vector.extract_strided_slice %264 {offsets = [0, 128], sizes = [2, 64], strides = [1, 1]} : vector<2x256xf32> to vector<2x64xf32>
    %cst_84 = arith.constant 2.000000e+00 : f32
    %268 = vector.broadcast %cst_84 : f32 to vector<2x64xf32>
    %269 = arith.mulf %268, %267 : vector<2x64xf32>
    %cst_85 = arith.constant 1.000000e+00 : f32
    %270 = vector.broadcast %cst_85 : f32 to vector<2x64xf32>
    %271 = arith.subf %269, %270 : vector<2x64xf32>
    %272 = vector.extract_strided_slice %264 {offsets = [0, 192], sizes = [2, 64], strides = [1, 1]} : vector<2x256xf32> to vector<2x64xf32>
    %273 = arith.mulf %266, %254 : vector<2x64xf32>
    %274 = arith.mulf %265, %271 : vector<2x64xf32>
    %275 = arith.addf %273, %274 : vector<2x64xf32>
    %276 = math.tanh %275 : vector<2x64xf32>
    %277 = arith.mulf %272, %276 : vector<2x64xf32>
    %278 = vector.extract_strided_slice %225 {offsets = [4, 0], sizes = [2, 256], strides = [1, 1]} : vector<16x256xf32> to vector<2x256xf32>
    %cst_86 = arith.constant dense<0.000000e+00> : vector<2x256xf32>
    %279 = tpu.matmul %277, %221, %cst_86 {dimension_numbers = #tpu.dot_dimension_numbers<[1], [0], [0], [1], [0, 0, 1, 1], [], []>} : vector<2x64xf32>, vector<64x256xf32>, vector<2x256xf32> -> vector<2x256xf32>
    %280 = arith.addf %278, %279 : vector<2x256xf32>
    %281 = arith.negf %280 : vector<2x256xf32>
    %282 = math.exp %281 : vector<2x256xf32>
    %cst_87 = arith.constant 1.000000e+00 : f32
    %283 = vector.broadcast %cst_87 : f32 to vector<2x256xf32>
    %284 = arith.addf %283, %282 : vector<2x256xf32>
    %285 = arith.divf %283, %284 : vector<2x256xf32>
    %286 = vector.extract_strided_slice %285 {offsets = [0, 0], sizes = [2, 64], strides = [1, 1]} : vector<2x256xf32> to vector<2x64xf32>
    %287 = vector.extract_strided_slice %285 {offsets = [0, 64], sizes = [2, 64], strides = [1, 1]} : vector<2x256xf32> to vector<2x64xf32>
    %288 = vector.extract_strided_slice %285 {offsets = [0, 128], sizes = [2, 64], strides = [1, 1]} : vector<2x256xf32> to vector<2x64xf32>
    %cst_88 = arith.constant 2.000000e+00 : f32
    %289 = vector.broadcast %cst_88 : f32 to vector<2x64xf32>
    %290 = arith.mulf %289, %288 : vector<2x64xf32>
    %cst_89 = arith.constant 1.000000e+00 : f32
    %291 = vector.broadcast %cst_89 : f32 to vector<2x64xf32>
    %292 = arith.subf %290, %291 : vector<2x64xf32>
    %293 = vector.extract_strided_slice %285 {offsets = [0, 192], sizes = [2, 64], strides = [1, 1]} : vector<2x256xf32> to vector<2x64xf32>
    %294 = arith.mulf %287, %275 : vector<2x64xf32>
    %295 = arith.mulf %286, %292 : vector<2x64xf32>
    %296 = arith.addf %294, %295 : vector<2x64xf32>
    %297 = math.tanh %296 : vector<2x64xf32>
    %298 = arith.mulf %293, %297 : vector<2x64xf32>
    %299 = vector.extract_strided_slice %225 {offsets = [6, 0], sizes = [2, 256], strides = [1, 1]} : vector<16x256xf32> to vector<2x256xf32>
    %cst_90 = arith.constant dense<0.000000e+00> : vector<2x256xf32>
    %300 = tpu.matmul %298, %221, %cst_90 {dimension_numbers = #tpu.dot_dimension_numbers<[1], [0], [0], [1], [0, 0, 1, 1], [], []>} : vector<2x64xf32>, vector<64x256xf32>, vector<2x256xf32> -> vector<2x256xf32>
    %301 = arith.addf %299, %300 : vector<2x256xf32>
    %302 = arith.negf %301 : vector<2x256xf32>
    %303 = math.exp %302 : vector<2x256xf32>
    %cst_91 = arith.constant 1.000000e+00 : f32
    %304 = vector.broadcast %cst_91 : f32 to vector<2x256xf32>
    %305 = arith.addf %304, %303 : vector<2x256xf32>
    %306 = arith.divf %304, %305 : vector<2x256xf32>
    %307 = vector.extract_strided_slice %306 {offsets = [0, 0], sizes = [2, 64], strides = [1, 1]} : vector<2x256xf32> to vector<2x64xf32>
    %308 = vector.extract_strided_slice %306 {offsets = [0, 64], sizes = [2, 64], strides = [1, 1]} : vector<2x256xf32> to vector<2x64xf32>
    %309 = vector.extract_strided_slice %306 {offsets = [0, 128], sizes = [2, 64], strides = [1, 1]} : vector<2x256xf32> to vector<2x64xf32>
    %cst_92 = arith.constant 2.000000e+00 : f32
    %310 = vector.broadcast %cst_92 : f32 to vector<2x64xf32>
    %311 = arith.mulf %310, %309 : vector<2x64xf32>
    %cst_93 = arith.constant 1.000000e+00 : f32
    %312 = vector.broadcast %cst_93 : f32 to vector<2x64xf32>
    %313 = arith.subf %311, %312 : vector<2x64xf32>
    %314 = vector.extract_strided_slice %306 {offsets = [0, 192], sizes = [2, 64], strides = [1, 1]} : vector<2x256xf32> to vector<2x64xf32>
    %315 = arith.mulf %308, %296 : vector<2x64xf32>
    %316 = arith.mulf %307, %313 : vector<2x64xf32>
    %317 = arith.addf %315, %316 : vector<2x64xf32>
    %318 = math.tanh %317 : vector<2x64xf32>
    %319 = arith.mulf %314, %318 : vector<2x64xf32>
    %320 = vector.extract_strided_slice %225 {offsets = [8, 0], sizes = [2, 256], strides = [1, 1]} : vector<16x256xf32> to vector<2x256xf32>
    %cst_94 = arith.constant dense<0.000000e+00> : vector<2x256xf32>
    %321 = tpu.matmul %319, %221, %cst_94 {dimension_numbers = #tpu.dot_dimension_numbers<[1], [0], [0], [1], [0, 0, 1, 1], [], []>} : vector<2x64xf32>, vector<64x256xf32>, vector<2x256xf32> -> vector<2x256xf32>
    %322 = arith.addf %320, %321 : vector<2x256xf32>
    %323 = arith.negf %322 : vector<2x256xf32>
    %324 = math.exp %323 : vector<2x256xf32>
    %cst_95 = arith.constant 1.000000e+00 : f32
    %325 = vector.broadcast %cst_95 : f32 to vector<2x256xf32>
    %326 = arith.addf %325, %324 : vector<2x256xf32>
    %327 = arith.divf %325, %326 : vector<2x256xf32>
    %328 = vector.extract_strided_slice %327 {offsets = [0, 0], sizes = [2, 64], strides = [1, 1]} : vector<2x256xf32> to vector<2x64xf32>
    %329 = vector.extract_strided_slice %327 {offsets = [0, 64], sizes = [2, 64], strides = [1, 1]} : vector<2x256xf32> to vector<2x64xf32>
    %330 = vector.extract_strided_slice %327 {offsets = [0, 128], sizes = [2, 64], strides = [1, 1]} : vector<2x256xf32> to vector<2x64xf32>
    %cst_96 = arith.constant 2.000000e+00 : f32
    %331 = vector.broadcast %cst_96 : f32 to vector<2x64xf32>
    %332 = arith.mulf %331, %330 : vector<2x64xf32>
    %cst_97 = arith.constant 1.000000e+00 : f32
    %333 = vector.broadcast %cst_97 : f32 to vector<2x64xf32>
    %334 = arith.subf %332, %333 : vector<2x64xf32>
    %335 = vector.extract_strided_slice %327 {offsets = [0, 192], sizes = [2, 64], strides = [1, 1]} : vector<2x256xf32> to vector<2x64xf32>
    %336 = arith.mulf %329, %317 : vector<2x64xf32>
    %337 = arith.mulf %328, %334 : vector<2x64xf32>
    %338 = arith.addf %336, %337 : vector<2x64xf32>
    %339 = math.tanh %338 : vector<2x64xf32>
    %340 = arith.mulf %335, %339 : vector<2x64xf32>
    %341 = vector.extract_strided_slice %225 {offsets = [10, 0], sizes = [2, 256], strides = [1, 1]} : vector<16x256xf32> to vector<2x256xf32>
    %cst_98 = arith.constant dense<0.000000e+00> : vector<2x256xf32>
    %342 = tpu.matmul %340, %221, %cst_98 {dimension_numbers = #tpu.dot_dimension_numbers<[1], [0], [0], [1], [0, 0, 1, 1], [], []>} : vector<2x64xf32>, vector<64x256xf32>, vector<2x256xf32> -> vector<2x256xf32>
    %343 = arith.addf %341, %342 : vector<2x256xf32>
    %344 = arith.negf %343 : vector<2x256xf32>
    %345 = math.exp %344 : vector<2x256xf32>
    %cst_99 = arith.constant 1.000000e+00 : f32
    %346 = vector.broadcast %cst_99 : f32 to vector<2x256xf32>
    %347 = arith.addf %346, %345 : vector<2x256xf32>
    %348 = arith.divf %346, %347 : vector<2x256xf32>
    %349 = vector.extract_strided_slice %348 {offsets = [0, 0], sizes = [2, 64], strides = [1, 1]} : vector<2x256xf32> to vector<2x64xf32>
    %350 = vector.extract_strided_slice %348 {offsets = [0, 64], sizes = [2, 64], strides = [1, 1]} : vector<2x256xf32> to vector<2x64xf32>
    %351 = vector.extract_strided_slice %348 {offsets = [0, 128], sizes = [2, 64], strides = [1, 1]} : vector<2x256xf32> to vector<2x64xf32>
    %cst_100 = arith.constant 2.000000e+00 : f32
    %352 = vector.broadcast %cst_100 : f32 to vector<2x64xf32>
    %353 = arith.mulf %352, %351 : vector<2x64xf32>
    %cst_101 = arith.constant 1.000000e+00 : f32
    %354 = vector.broadcast %cst_101 : f32 to vector<2x64xf32>
    %355 = arith.subf %353, %354 : vector<2x64xf32>
    %356 = vector.extract_strided_slice %348 {offsets = [0, 192], sizes = [2, 64], strides = [1, 1]} : vector<2x256xf32> to vector<2x64xf32>
    %357 = arith.mulf %350, %338 : vector<2x64xf32>
    %358 = arith.mulf %349, %355 : vector<2x64xf32>
    %359 = arith.addf %357, %358 : vector<2x64xf32>
    %360 = math.tanh %359 : vector<2x64xf32>
    %361 = arith.mulf %356, %360 : vector<2x64xf32>
    %362 = vector.extract_strided_slice %225 {offsets = [12, 0], sizes = [2, 256], strides = [1, 1]} : vector<16x256xf32> to vector<2x256xf32>
    %cst_102 = arith.constant dense<0.000000e+00> : vector<2x256xf32>
    %363 = tpu.matmul %361, %221, %cst_102 {dimension_numbers = #tpu.dot_dimension_numbers<[1], [0], [0], [1], [0, 0, 1, 1], [], []>} : vector<2x64xf32>, vector<64x256xf32>, vector<2x256xf32> -> vector<2x256xf32>
    %364 = arith.addf %362, %363 : vector<2x256xf32>
    %365 = arith.negf %364 : vector<2x256xf32>
    %366 = math.exp %365 : vector<2x256xf32>
    %cst_103 = arith.constant 1.000000e+00 : f32
    %367 = vector.broadcast %cst_103 : f32 to vector<2x256xf32>
    %368 = arith.addf %367, %366 : vector<2x256xf32>
    %369 = arith.divf %367, %368 : vector<2x256xf32>
    %370 = vector.extract_strided_slice %369 {offsets = [0, 0], sizes = [2, 64], strides = [1, 1]} : vector<2x256xf32> to vector<2x64xf32>
    %371 = vector.extract_strided_slice %369 {offsets = [0, 64], sizes = [2, 64], strides = [1, 1]} : vector<2x256xf32> to vector<2x64xf32>
    %372 = vector.extract_strided_slice %369 {offsets = [0, 128], sizes = [2, 64], strides = [1, 1]} : vector<2x256xf32> to vector<2x64xf32>
    %cst_104 = arith.constant 2.000000e+00 : f32
    %373 = vector.broadcast %cst_104 : f32 to vector<2x64xf32>
    %374 = arith.mulf %373, %372 : vector<2x64xf32>
    %cst_105 = arith.constant 1.000000e+00 : f32
    %375 = vector.broadcast %cst_105 : f32 to vector<2x64xf32>
    %376 = arith.subf %374, %375 : vector<2x64xf32>
    %377 = vector.extract_strided_slice %369 {offsets = [0, 192], sizes = [2, 64], strides = [1, 1]} : vector<2x256xf32> to vector<2x64xf32>
    %378 = arith.mulf %371, %359 : vector<2x64xf32>
    %379 = arith.mulf %370, %376 : vector<2x64xf32>
    %380 = arith.addf %378, %379 : vector<2x64xf32>
    %381 = math.tanh %380 : vector<2x64xf32>
    %382 = arith.mulf %377, %381 : vector<2x64xf32>
    %383 = vector.extract_strided_slice %225 {offsets = [14, 0], sizes = [2, 256], strides = [1, 1]} : vector<16x256xf32> to vector<2x256xf32>
    %cst_106 = arith.constant dense<0.000000e+00> : vector<2x256xf32>
    %384 = tpu.matmul %382, %221, %cst_106 {dimension_numbers = #tpu.dot_dimension_numbers<[1], [0], [0], [1], [0, 0, 1, 1], [], []>} : vector<2x64xf32>, vector<64x256xf32>, vector<2x256xf32> -> vector<2x256xf32>
    %385 = arith.addf %383, %384 : vector<2x256xf32>
    %386 = arith.negf %385 : vector<2x256xf32>
    %387 = math.exp %386 : vector<2x256xf32>
    %cst_107 = arith.constant 1.000000e+00 : f32
    %388 = vector.broadcast %cst_107 : f32 to vector<2x256xf32>
    %389 = arith.addf %388, %387 : vector<2x256xf32>
    %390 = arith.divf %388, %389 : vector<2x256xf32>
    %391 = vector.extract_strided_slice %390 {offsets = [0, 0], sizes = [2, 64], strides = [1, 1]} : vector<2x256xf32> to vector<2x64xf32>
    %392 = vector.extract_strided_slice %390 {offsets = [0, 64], sizes = [2, 64], strides = [1, 1]} : vector<2x256xf32> to vector<2x64xf32>
    %393 = vector.extract_strided_slice %390 {offsets = [0, 128], sizes = [2, 64], strides = [1, 1]} : vector<2x256xf32> to vector<2x64xf32>
    %cst_108 = arith.constant 2.000000e+00 : f32
    %394 = vector.broadcast %cst_108 : f32 to vector<2x64xf32>
    %395 = arith.mulf %394, %393 : vector<2x64xf32>
    %cst_109 = arith.constant 1.000000e+00 : f32
    %396 = vector.broadcast %cst_109 : f32 to vector<2x64xf32>
    %397 = arith.subf %395, %396 : vector<2x64xf32>
    %398 = vector.extract_strided_slice %390 {offsets = [0, 192], sizes = [2, 64], strides = [1, 1]} : vector<2x256xf32> to vector<2x64xf32>
    %399 = arith.mulf %392, %380 : vector<2x64xf32>
    %400 = arith.mulf %391, %397 : vector<2x64xf32>
    %401 = arith.addf %399, %400 : vector<2x64xf32>
    %402 = math.tanh %401 : vector<2x64xf32>
    %403 = arith.mulf %398, %402 : vector<2x64xf32>
    %404 = vector.extract_strided_slice %403 {offsets = [0, 0], sizes = [2, 32], strides = [1, 1]} : vector<2x64xf32> to vector<2x32xf32>
    %c2_110 = arith.constant 2 : index
    %c0_111 = arith.constant 0 : index
    %c0_112 = arith.constant 0 : index
    %405 = vector.load %arg16[%c2_110, %c0_111, %c0_112] : memref<4x2x32xf32, #tpu.memory_space<vmem>>, vector<1x2x32xf32>
    %406 = vector.shape_cast %405 : vector<1x2x32xf32> to vector<2x32xf32>
    %407 = vector.shape_cast %404 : vector<2x32xf32> to vector<1x2x32xf32>
    tpu.vector_store %arg16[%c2_110, %c0_111, %c0_112], %407 {strides = array<i32>} : memref<4x2x32xf32, #tpu.memory_space<vmem>>, vector<1x2x32xf32>,
    %408 = vector.extract_strided_slice %403 {offsets = [0, 32], sizes = [2, 32], strides = [1, 1]} : vector<2x64xf32> to vector<2x32xf32>
    %c3_113 = arith.constant 3 : index
    %c0_114 = arith.constant 0 : index
    %c0_115 = arith.constant 0 : index
    %409 = vector.load %arg16[%c3_113, %c0_114, %c0_115] : memref<4x2x32xf32, #tpu.memory_space<vmem>>, vector<1x2x32xf32>
    %410 = vector.shape_cast %409 : vector<1x2x32xf32> to vector<2x32xf32>
    %411 = vector.shape_cast %408 : vector<2x32xf32> to vector<1x2x32xf32>
    tpu.vector_store %arg16[%c3_113, %c0_114, %c0_115], %411 {strides = array<i32>} : memref<4x2x32xf32, #tpu.memory_space<vmem>>, vector<1x2x32xf32>,
    %412 = vector.extract_strided_slice %401 {offsets = [0, 0], sizes = [2, 32], strides = [1, 1]} : vector<2x64xf32> to vector<2x32xf32>
    %c2_116 = arith.constant 2 : index
    %c0_117 = arith.constant 0 : index
    %c0_118 = arith.constant 0 : index
    %413 = vector.load %arg17[%c2_116, %c0_117, %c0_118] : memref<4x2x32xf32, #tpu.memory_space<vmem>>, vector<1x2x32xf32>
    %414 = vector.shape_cast %413 : vector<1x2x32xf32> to vector<2x32xf32>
    %415 = vector.shape_cast %412 : vector<2x32xf32> to vector<1x2x32xf32>
    tpu.vector_store %arg17[%c2_116, %c0_117, %c0_118], %415 {strides = array<i32>} : memref<4x2x32xf32, #tpu.memory_space<vmem>>, vector<1x2x32xf32>,
    %416 = vector.extract_strided_slice %401 {offsets = [0, 32], sizes = [2, 32], strides = [1, 1]} : vector<2x64xf32> to vector<2x32xf32>
    %c3_119 = arith.constant 3 : index
    %c0_120 = arith.constant 0 : index
    %c0_121 = arith.constant 0 : index
    %417 = vector.load %arg17[%c3_119, %c0_120, %c0_121] : memref<4x2x32xf32, #tpu.memory_space<vmem>>, vector<1x2x32xf32>
    %418 = vector.shape_cast %417 : vector<1x2x32xf32> to vector<2x32xf32>
    %419 = vector.shape_cast %416 : vector<2x32xf32> to vector<1x2x32xf32>
    tpu.vector_store %arg17[%c3_119, %c0_120, %c0_121], %419 {strides = array<i32>} : memref<4x2x32xf32, #tpu.memory_space<vmem>>, vector<1x2x32xf32>,
    %420 = tpu.concatenate %256, %403 in 1 : vector<2x64xf32>, vector<2x64xf32> -> vector<2x128xf32>
    %421 = tpu.concatenate %277, %382 in 1 : vector<2x64xf32>, vector<2x64xf32> -> vector<2x128xf32>
    %422 = tpu.concatenate %298, %361 in 1 : vector<2x64xf32>, vector<2x64xf32> -> vector<2x128xf32>
    %423 = tpu.concatenate %319, %340 in 1 : vector<2x64xf32>, vector<2x64xf32> -> vector<2x128xf32>
    %424 = tpu.concatenate %340, %319 in 1 : vector<2x64xf32>, vector<2x64xf32> -> vector<2x128xf32>
    %425 = tpu.concatenate %361, %298 in 1 : vector<2x64xf32>, vector<2x64xf32> -> vector<2x128xf32>
    %426 = tpu.concatenate %382, %277 in 1 : vector<2x64xf32>, vector<2x64xf32> -> vector<2x128xf32>
    %427 = tpu.concatenate %403, %256 in 1 : vector<2x64xf32>, vector<2x64xf32> -> vector<2x128xf32>
    %428 = tpu.concatenate %420, %421, %422, %423, %424, %425, %426, %427 in 0 : vector<2x128xf32>, vector<2x128xf32>, vector<2x128xf32>, vector<2x128xf32>, vector<2x128xf32>, vector<2x128xf32>, vector<2x128xf32>, vector<2x128xf32> -> vector<16x128xf32>
    %c0_122 = arith.constant 0 : index
    %c0_123 = arith.constant 0 : index
    %429 = vector.load %arg9[%c0_122, %c0_123] : memref<128x64xf32, #tpu.memory_space<vmem>>, vector<128x64xf32>
    %cst_124 = arith.constant dense<0.000000e+00> : vector<16x64xf32>
    %430 = tpu.matmul %428, %429, %cst_124 {dimension_numbers = #tpu.dot_dimension_numbers<[1], [0], [0], [1], [0, 0, 1, 1], [], []>} : vector<16x128xf32>, vector<128x64xf32>, vector<16x64xf32> -> vector<16x64xf32>
    %c0_125 = arith.constant 0 : index
    %c0_126 = arith.constant 0 : index
    %431 = vector.load %arg10[%c0_125, %c0_126] : memref<1x64xf32, #tpu.memory_space<vmem>>, vector<1x64xf32>
    %432 = vector.broadcast %431 : vector<1x64xf32> to vector<16x64xf32>
    %433 = arith.addf %430, %432 : vector<16x64xf32>
    %cst_127 = arith.constant 0.000000e+00 : f32
    %434 = vector.broadcast %cst_127 : f32 to vector<16x64xf32>
    %435 = arith.maximumf %433, %434 : vector<16x64xf32>
    %c0_128 = arith.constant 0 : index
    %c0_129 = arith.constant 0 : index
    %436 = vector.load %arg11[%c0_128, %c0_129] : memref<64x32xf32, #tpu.memory_space<vmem>>, vector<64x32xf32>
    %cst_130 = arith.constant dense<0.000000e+00> : vector<16x32xf32>
    %437 = tpu.matmul %435, %436, %cst_130 {dimension_numbers = #tpu.dot_dimension_numbers<[1], [0], [0], [1], [0, 0, 1, 1], [], []>} : vector<16x64xf32>, vector<64x32xf32>, vector<16x32xf32> -> vector<16x32xf32>
    %c0_131 = arith.constant 0 : index
    %c0_132 = arith.constant 0 : index
    %438 = vector.load %arg12[%c0_131, %c0_132] : memref<1x32xf32, #tpu.memory_space<vmem>>, vector<1x32xf32>
    %439 = vector.broadcast %438 : vector<1x32xf32> to vector<16x32xf32>
    %440 = arith.addf %437, %439 : vector<16x32xf32>
    %cst_133 = arith.constant 0.000000e+00 : f32
    %441 = vector.broadcast %cst_133 : f32 to vector<16x32xf32>
    %442 = arith.maximumf %440, %441 : vector<16x32xf32>
    %c0_134 = arith.constant 0 : index
    %c0_135 = arith.constant 0 : index
    %443 = vector.load %arg13[%c0_134, %c0_135] : memref<1x32xf32, #tpu.memory_space<vmem>>, vector<1x32xf32>
    %444 = vector.broadcast %443 : vector<1x32xf32> to vector<16x32xf32>
    %445 = arith.mulf %442, %444 : vector<16x32xf32>
    %cst_136 = arith.constant dense<0.000000e+00> : vector<16xf32>
    %446 = vector.multi_reduction <add>, %445, %cst_136 [1] : vector<16x32xf32> to vector<16xf32>
    %447 = vector.shape_cast %446 : vector<16xf32> to vector<16x1xf32>
    %c0_137 = arith.constant 0 : index
    %c0_138 = arith.constant 0 : index
    %448 = vector.load %arg14[%c0_137, %c0_138] : memref<1x1xf32, #tpu.memory_space<vmem>>, vector<1x1xf32>
    %449 = vector.broadcast %448 : vector<1x1xf32> to vector<16x1xf32>
    %450 = arith.addf %447, %449 : vector<16x1xf32>
    %c0_139 = arith.constant 0 : index
    %c0_140 = arith.constant 0 : index
    %451 = vector.load %arg15[%c0_139, %c0_140] : memref<16x1xf32, #tpu.memory_space<vmem>>, vector<16x1xf32>
    tpu.vector_store %arg15[%c0_139, %c0_140], %450 {strides = array<i32>} : memref<16x1xf32, #tpu.memory_space<vmem>>, vector<16x1xf32>,
    return
  }
}

</mosaic_0001>

<bundles_post_ra>
// kernel: tpu_custom_call.1
= control target key start
LH: loop header
LB: loop body
LE: loop exit
PB: predicated region body
PF: predicated region fallthrough
CT: control target
= control target key end

     0   :  { %s3642_s0 = inlined_call_operand.vmem [shape: f32[16,2], index: 0, kind: input, shape index: {}]   ;;  %s3643_s1 = inlined_call_operand.vmem [shape: f32[4,2,32], index: 1, kind: input, shape index: {}]   ;;  %s3644_s2 = inlined_call_operand.vmem [shape: f32[4,2,32], index: 2, kind: input, shape index: {}]   ;;  %s3645_s3 = inlined_call_operand.vmem [shape: f32[2,256], index: 3, kind: input, shape index: {}]   ;;  %s3646_s4 = inlined_call_operand.vmem [shape: f32[64,256], index: 4, kind: input, shape index: {}]   ;;  %s3647_s5 = inlined_call_operand.vmem [shape: f32[1,256], index: 5, kind: input, shape index: {}]   ;;  %s3648_s6 = inlined_call_operand.hbm [shape: f32[128,256], index: 6, kind: input, shape index: {}]   ;;  %s3649_s7 = inlined_call_operand.hbm [shape: f32[64,256], index: 7, kind: input, shape index: {}]   ;;  %s3650_s8 = inlined_call_operand.vmem [shape: f32[1,256], index: 8, kind: input, shape index: {}]   ;;  %s3651_s9 = inlined_call_operand.vmem [shape: f32[128,64], index: 9, kind: input, shape index: {}]   ;;  %s3652_s10 = inlined_call_operand.vmem [shape: f32[1,64], index: 10, kind: input, shape index: {}]   ;;  %s3653_s11 = inlined_call_operand.vmem [shape: f32[64,32], index: 11, kind: input, shape index: {}]   ;;  %s3654_s12 = inlined_call_operand.vmem [shape: f32[1,32], index: 12, kind: input, shape index: {}]   ;;  %s3655_s13 = inlined_call_operand.vmem [shape: f32[1,32], index: 13, kind: input, shape index: {}]   ;;  %s3656_s14 = inlined_call_operand.<no memory space> [shape: f32[1,1], index: 14, kind: input, shape index: {}]   ;;  %s3657_s15 = inlined_call_operand.vmem [shape: f32[16,1], index: 15, kind: output, shape index: {0}]   ;;  %s3658_s16 = inlined_call_operand.hbm [shape: f32[4,2,32], index: 16, kind: output, shape index: {1}]   ;;  %s3659_s17 = inlined_call_operand.hbm [shape: f32[4,2,32], index: 17, kind: output, shape index: {2}]  }
   0x1   :  { %3662 = sst [smem:[#allocation15_spill]] %s3642_s0  ;;  %v23_v0 = vstv %s3656_s14 }
   0x2   :  { %3663 = sst [smem:[#allocation16_spill]] %s3643_s1  ;;  %24 = vst [vmem:[#allocation2] sm:$0x1] %v23_v0 }
   0x3   :  { %25 = vsyncpa [#allocation4], 0 }
   0x4   :  { %26 = vsyncpa [#allocation7], 0 }
   0x5   :  { %27 = vsyncpa [#allocation5], 0 }
   0x6   :  { %28 = vsyncpa [#allocation10], 0  ;;  %s45_s28 = sshll.u32 %s3648_s6, 4  ;;  %s2649_s29 = smov [#allocation3]   ;;  %s46_s28 = int_to_ptr.hbm [resolvable:$true] %s45_s28 }
   0x7   :  { %s47_s0 = sshll.u32 %s2649_s29, 4  ;;  %s58_s19 = sshll.u32 %s3649_s7, 4  ;;  %s48_s0 = int_to_ptr.vmem [resolvable:$true] %s47_s0  ;;  %s59_s19 = int_to_ptr.hbm [resolvable:$true] %s58_s19 }
   0x8   :  { %s2650_s1 = smov 256   ;;  %s2651_s20 = smov 16  }
   0x9   :  { %53 = dma.hbm_to_vmem [thread:$0]  %s46_s28, 4096, %s48_s0, [#allocation4], %s2650_s1, %s2650_s1, %s2651_s20  }
   0xa   :  { %s2652_s14 = smov [#allocation6]  }
   0xb   :  { %s60_s21 = sshll.u32 %s2652_s14, 4  ;;  %s61_s21 = int_to_ptr.vmem [resolvable:$true] %s60_s21 }
   0xc   :  { %66 = dma.hbm_to_vmem [thread:$0]  %s59_s19, 2048, %s61_s21, [#allocation7], %s2650_s1, %s2650_s1, %s2651_s20  }
   0xd   :  { %2641 = dma.done.wait [#allocation4], 4096  }
   0xe   :  { %2642 = vsyncadd [#allocation4], 4294963200 }
   0xf   :  { %2643 = dma.done.wait [#allocation7], 2048  }
  0x10   :  { %2644 = vsyncadd [#allocation7], 4294965248  ;;  %v2653_v1 = vmov 1   ;;  %s3664_s23 = sld [smem:[#allocation16_spill]]  ;;  %s2654_s26 = smov 32   ;;  %v2770_v4 = vld [vmem:[%s3646_s4 + $0x70] sm:$0xff] }
  0x11   :  { %2358 = vset.pattern.permute.xlu1 %v2653_v1  ;;  %s3665_s25 = sld [smem:[#allocation15_spill]]  ;;  %v2775_v5 = vld [vmem:[%s3646_s4 + $0x78] sm:$0xff]  ;;  %v2780_v6 = vld [vmem:[%s3646_s4 + $0x60] sm:$0xff]  ;;  %190 = vmatpush.msra.mxu2 %v2770_v4  ;;  %v2787_v7 = vld [vmem:[%s3646_s4 + $0x68] sm:$0xff]  ;;  %v2655_v21 = vmov 0   ;;  %vm168_vm0 = vcmask 261120  }
  0x12   :  { %210 = vmatpush.msra.mxu1 %v2775_v5  ;;  %v2792_v8 = vld [vmem:[%s3646_s4 + $0x50] sm:$0xff]  ;;  %v2797_v9 = vld [vmem:[%s3646_s4 + $0x58] sm:$0xff]  ;;  %310 = vmatpush.msra.mxu3 %v2775_v5  ;;  %v2251_v10 = vld [vmem:[%s3644_s2 + $0x2] sm:$0x3]  ;;  %vm178_vm1 = vcmask 523264   ;;  %s2656_s1 = smov 64  }
  0x13   :  { %608 = vmatpush.msra.mxu0 %v2770_v4  ;;  %191 = vmatpush.msra.mxu2 %v2780_v6  ;;  %v2809_v11 = vld [vmem:[%s3646_s4 + $0x40] sm:$0xff]  ;;  %v2814_v12 = vld [vmem:[%s3646_s4 + $0x48] sm:$0xff]  ;;  %v2823_v13 = vld [vmem:[%s3646_s4 + $0x30] sm:$0xff]  ;;  %s2657_s6 = smov [#allocation8]   ;;  %s2229_s28 = sshll.u32 %s3659_s17, 4  ;;  %s2230_s28 = int_to_ptr.hbm [resolvable:$true] %s2229_s28 }
  0x14   :  { %211 = vmatpush.msra.mxu1 %v2787_v7  ;;  %311 = vmatpush.msra.mxu3 %v2787_v7  ;;  %v2828_v14 = vld [vmem:[%s3646_s4 + $0x38] sm:$0xff]  ;;  %v2838_v15 = vld [vmem:[%s3646_s4 + $0x20] sm:$0xff]  ;;  %v2843_v16 = vld [vmem:[%s3646_s4 + $0x28] sm:$0xff] }
  0x15   :  { %609 = vmatpush.msra.mxu0 %v2780_v6  ;;  %192 = vmatpush.msra.mxu2 %v2792_v8  ;;  %v2851_v17 = vld [vmem:[%s3646_s4 + $0x10] sm:$0xff]  ;;  %v2856_v18 = vld [vmem:[%s3646_s4 + $0x18] sm:$0xff]  ;;  %v2872_v19 = vld [vmem:[%s3646_s4] sm:$0xff] }
  0x16   :  { %v2250_v2 = vld [vmem:[%s3664_s23 + $0x2] sm:$0x3]  ;;  %212 = vmatpush.msra.mxu1 %v2797_v9  ;;  %312 = vmatpush.msra.mxu3 %v2797_v9  ;;  %v2877_v20 = vld [vmem:[%s3646_s4 + $0x8] sm:$0xff]  ;;  %v161_v22 = vld [vmem:[%s3664_s23] sm:$0x3] }
  0x17   :  { %v107_v3 = vld [vmem:[%s3665_s25] sm:$0xff]  ;;  %165 = vrot.lane.b32.xlu0 %v2250_v2, %s2654_s26  ;;  %610 = vmatpush.msra.mxu0 %v2792_v8 }
  0x18   :  { %131 = vperm.xlu1 %2358, %v107_v3   ;;  %193 = vmatpush.msra.mxu2 %v2809_v11  ;;  %v170_v26 = vld [vmem:[%s3644_s2] sm:$0x3] }
  0x19   :  { %213 = vmatpush.msra.mxu1 %v2814_v12  ;;  %313 = vmatpush.msra.mxu3 %v2814_v12  ;;  %v89_v29 = vld [vmem:[%s3645_s3] sm:$0xf]  ;;  %s2214_s3 = sshll.u32 %s2657_s6, 4  ;;  %s2215_s3 = int_to_ptr.vmem [resolvable:$true] %s2214_s3 }
  0x1a   :  { %194 = vmatpush.msra.mxu2 %v2823_v13  ;;  %611 = vmatpush.msra.mxu0 %v2809_v11  ;;  %v139_v30 = vperm.slane %v89_v29, 3  ;;  %v121_v31 = vperm.slane %v89_v29, 2  ;;  %v138_v35 = vperm.slane %v89_v29, 1  ;;  %v120_v37 = vperm.slane %v89_v29, 0  ;;  %v2955_v39 = vld [vmem:[%s3647_s5] sm:$0x3] }
  0x1b   :  { %214 = vmatpush.msra.mxu1 %v2828_v14  ;;  %314 = vmatpush.msra.mxu3 %v2828_v14  ;;  %v154_v43 = vperm.slane %v2955_v39, 1  ;;  %v153_v49 = vperm.slane %v2955_v39, 0 }
  0x1c   :  { %195 = vmatpush.msra.mxu2 %v2838_v15  ;;  %612 = vmatpush.msra.mxu0 %v2823_v13  ;;  %v2946_v32 = vperm.slane %v139_v30, 1  ;;  %v2948_v33 = vperm.slane %v121_v31, 0  ;;  %v2957_v40 = vperm.slane %v138_v35, 1  ;;  %v2959_v41 = vperm.slane %v120_v37, 0 }
  0x1d   :  { %215 = vmatpush.msra.mxu1 %v2843_v16  ;;  %315 = vmatpush.msra.mxu3 %v2843_v16 }
  0x1e   :  { %196 = vmatpush.msra.mxu2 %v2851_v17  ;;  %613 = vmatpush.msra.mxu0 %v2838_v15 }
  0x1f   :  { %216 = vmatpush.msra.mxu1 %v2856_v18  ;;  %316 = vmatpush.msra.mxu3 %v2856_v18 }
  0x20   :  { %174 = vrot.lane.b32.xlu1 %v2251_v10, %s2654_s26  ;;  %614 = vmatpush.msra.mxu0 %v2851_v17 }
  0x21   :  { %197 = vmatpush.msra.mxu2 %v2872_v19  ;;  %217 = vmatpush.msra.mxu1 %v2877_v20 }
  0x22   :  { %317 = vmatpush.msra.mxu3 %v2877_v20  ;;  %2357 = vset.pattern.permute.xlu0 %v2655_v21 }
  0x23   :  { %290 = vmatpush.msrb.mxu2 %v2770_v4  ;;  %111 = vperm.xlu0 %2357, %v107_v3  }
  0x24   :  { %396 = vmatpush.msrb.mxu3 %v2770_v4  ;;  %416 = vmatpush.msrb.mxu1 %v2775_v5 }
  0x25   :  { %291 = vmatpush.msrb.mxu2 %v2780_v6  ;;  %615 = vmatpush.msra.mxu0 %v2872_v19 }
  0x26   :  { %397 = vmatpush.msrb.mxu3 %v2780_v6  ;;  %417 = vmatpush.msrb.mxu1 %v2787_v7 }
  0x27   :  { %292 = vmatpush.msrb.mxu2 %v2792_v8  ;;  %2359 = vset.pattern.permute.xlu2 %v2655_v21 }
  0x28   :  { %398 = vmatpush.msrb.mxu3 %v2792_v8  ;;  %418 = vmatpush.msrb.mxu1 %v2797_v9 }
  0x29   :  { %293 = vmatpush.msrb.mxu2 %v2809_v11  ;;  %813 = vmatpush.msrb.mxu0 %v2770_v4 }
  0x2a   :  { %399 = vmatpush.msrb.mxu3 %v2809_v11  ;;  %419 = vmatpush.msrb.mxu1 %v2814_v12 }
  0x2b   :  { %294 = vmatpush.msrb.mxu2 %v2823_v13  ;;  %2360 = vset.pattern.permute.xlu0 %v2653_v1 }
  0x2c   :  { %400 = vmatpush.msrb.mxu3 %v2823_v13  ;;  %420 = vmatpush.msrb.mxu1 %v2828_v14 }
  0x2d   :  { %295 = vmatpush.msrb.mxu2 %v2838_v15  ;;  %814 = vmatpush.msrb.mxu0 %v2780_v6 }
  0x2e   :  { %401 = vmatpush.msrb.mxu3 %v2838_v15  ;;  %421 = vmatpush.msrb.mxu1 %v2843_v16 }
  0x2f   :  { %296 = vmatpush.msrb.mxu2 %v2851_v17  ;;  %815 = vmatpush.msrb.mxu0 %v2792_v8 }
  0x30   :  { %402 = vmatpush.msrb.mxu3 %v2851_v17  ;;  %422 = vmatpush.msrb.mxu1 %v2856_v18 }
  0x31   :  { %297 = vmatpush.msrb.mxu2 %v2872_v19  ;;  %816 = vmatpush.msrb.mxu0 %v2809_v11 }
  0x32   :  { %403 = vmatpush.msrb.mxu3 %v2872_v19  ;;  %423 = vmatpush.msrb.mxu1 %v2877_v20 }
  0x33   :  { %817 = vmatpush.msrb.mxu0 %v2823_v13 }
  0x35   :  { %818 = vmatpush.msrb.mxu0 %v2838_v15 }
  0x37   :  { %819 = vmatpush.msrb.mxu0 %v2851_v17 }
  0x39   :  { %820 = vmatpush.msrb.mxu0 %v2872_v19 }
  0x89   :  { %v166_v23 = vpop.permute.xlu0 %165 }
  0x8a   :  { %v132_v24 = vpop.permute.xlu1 %131  ;;  %v169_v25 = vsel %vm168_vm0, %v161_v22, %v166_v23 }
  0x8b   :  { %2252 = vmatmul.msk.f32.vlgmr.msra.gmra.mxu2 %vm178_vm1, %v169_v25  ;;  %2253 = vmatmul.msk.f32.vlgmr.msra.gmra.mxu1 %vm178_vm1, %v169_v25  ;;  %v145_v36 = vmul.f32 %v2946_v32, %v132_v24  ;;  %v144_v44 = vmul.f32 %v2957_v40, %v132_v24 }
  0x8c   :  { %502 = vmatpush.msra.mxu2 %v2770_v4  ;;  %628 = vmatpush.msra.mxu1 %v2775_v5 }
  0x8e   :  { %503 = vmatpush.msra.mxu2 %v2780_v6  ;;  %629 = vmatpush.msra.mxu1 %v2787_v7 }
  0x90   :  { %504 = vmatpush.msra.mxu2 %v2792_v8  ;;  %630 = vmatpush.msra.mxu1 %v2797_v9 }
  0x92   :  { %v175_v27 = vpop.permute.xlu1 %174  ;;  %505 = vmatpush.msra.mxu2 %v2809_v11  ;;  %631 = vmatpush.msra.mxu1 %v2814_v12 }
  0x93   :  { %v177_v28 = vsel %vm168_vm0, %v170_v26, %v175_v27 }
  0x94   :  { %265 = vrot.lane.b32.xlu2 %v177_v28, %s2656_s1  ;;  %506 = vmatpush.msra.mxu2 %v2823_v13 }
  0x95   :  { %632 = vmatpush.msra.mxu1 %v2828_v14  ;;  %v112_v34 = vpop.permute.xlu0 %111 }
  0x96   :  { %507 = vmatpush.msra.mxu2 %v2838_v15  ;;  %v127_v38 = vmul.f32 %v2948_v33, %v112_v34  ;;  %v126_v45 = vmul.f32 %v2959_v41, %v112_v34 }
  0x97   :  { %633 = vmatpush.msra.mxu1 %v2843_v16 }
  0x98   :  { %508 = vmatpush.msra.mxu2 %v2851_v17  ;;  %v149_v42 = vadd.f32 %v145_v36, %v127_v38  ;;  %v148_v48 = vadd.f32 %v144_v44, %v126_v45 }
  0x99   :  { %634 = vmatpush.msra.mxu1 %v2856_v18 }
  0x9a   :  { %509 = vmatpush.msra.mxu2 %v2872_v19  ;;  %v2966_v46 = vadd.f32 %v154_v43, %v149_v42  ;;  %v2972_v52 = vadd.f32 %v153_v49, %v148_v48 }
  0x9b   :  { %635 = vmatpush.msra.mxu1 %v2877_v20 }
  0xee   :  { %v266_v37 = vpop.permute.xlu2 %265 }
 0x108   :  { %v219_v47 = vpop.f32.mrf.mxu1 }
 0x109   :  { %v223_v50 = vadd.f32 %v219_v47, %v2966_v46 }
 0x10b   :  { %v2255_v51 = vmul.f32 -1.442695, %v223_v50 }
 0x10d   :  { %2385 = vpow2.f32 %v2255_v51 }
 0x10e   :  { %v199_v53 = vpop.f32.mrf.mxu2 }
 0x10f   :  { %v222_v54 = vadd.f32 %v199_v53, %v2972_v52 }
 0x111   :  { %v2254_v55 = vmul.f32 -1.442695, %v222_v54 }
 0x113   :  { %v2386_v56 = vpop.eup %2385  ;;  %2387 = vpow2.f32 %v2254_v55 }
 0x114   :  { %v231_v57 = vadd.f32 1.0, %v2386_v56 }
 0x116   :  { %2389 = vrcp.f32 %v231_v57  ;;  %v258_v63 = vand.u32 2147483648, %v231_v57  ;;  %v256_v1 = vand.u32 2147483647, %v231_v57  ;;  %vm252_vm3 = vweird.f32 %v231_v57 }
 0x118   :  { %v259_v21 = vor.u32 1.1754944e-38, %v258_v63  ;;  %vm257_vm5 = vcmp.eq.f32.partialorder %v256_v1, 8.507059e+37 }
 0x119   :  { %v2388_v58 = vpop.eup %2387 }
 0x11a   :  { %v230_v59 = vadd.f32 1.0, %v2388_v58 }
 0x11c   :  { %v2390_v60 = vpop.eup %2389  ;;  %2391 = vrcp.f32 %v230_v59  ;;  %v243_v24 = vand.u32 2147483648, %v230_v59  ;;  %v241_v27 = vand.u32 2147483647, %v230_v59  ;;  %vm237_vm7 = vweird.f32 %v230_v59 }
 0x11d   :  { %v248_v61 = vmul.f32 %v2390_v60, %v231_v57  ;;  %vm253_vm2 = vweird.f32 %v2390_v60 }
 0x11e   :  { %vm254_vm4 = vmor %vm252_vm3, %vm253_vm2  ;;  %v244_v30 = vor.u32 1.1754944e-38, %v243_v24  ;;  %vm242_vm9 = vcmp.eq.f32.partialorder %v241_v27, 8.507059e+37 }
 0x11f   :  { %v249_v62 = vsub.f32 1.0, %v248_v61 }
 0x121   :  { %v250_v0 = vmul.f32 %v2390_v60, %v249_v62 }
 0x122   :  { %v2392_v2 = vpop.eup %2391 }
 0x123   :  { %v233_v3 = vmul.f32 %v2392_v2, %v230_v59  ;;  %v251_v10 = vadd.f32 %v2390_v60, %v250_v0  ;;  %vm238_vm6 = vweird.f32 %v2392_v2 }
 0x124   :  { %vm239_vm8 = vmor %vm237_vm7, %vm238_vm6 }
 0x125   :  { %v234_v22 = vsub.f32 1.0, %v233_v3  ;;  %v255_v23 = vsel %vm254_vm4, %v2390_v60, %v251_v10 }
 0x126   :  { %v260_v25 = vsel %vm257_vm5, %v259_v21, %v255_v23 }
 0x127   :  { %v235_v26 = vmul.f32 %v2392_v2, %v234_v22  ;;  %v262_v28 = vmul.f32 2.0, %v260_v25 }
 0x129   :  { %v236_v29 = vadd.f32 %v2392_v2, %v235_v26  ;;  %v2256_v34 = vadd.f32 -1.0, %v262_v28 }
 0x12b   :  { %v240_v31 = vsel %vm239_vm8, %v2392_v2, %v236_v29 }
 0x12c   :  { %v245_v35 = vsel %vm242_vm9, %v244_v30, %v240_v31 }
 0x12d   :  { %v269_v36 = vmul.f32 %v2256_v34, %v245_v35  ;;  %v268_v38 = vmul.f32 %v266_v37, %v245_v35 }
 0x12f   :  { %271 = vrot.lane.b32.xlu2 %v269_v36, %s2656_s1 }
 0x189   :  { %v272_v42 = vpop.permute.xlu2 %271 }
 0x18a   :  { %v2976_v44 = vadd.f32 %v272_v42, %v268_v38 }
 0x18c   :  { %2393 = vtanh.f32 %v2976_v44  ;;  %v371_v30 = vrot.slane %v2976_v44, 6 }
 0x192   :  { %v2394_v45 = vpop.eup %2393 }
 0x193   :  { %v2979_v47 = vmul.f32 %v2394_v45, %v260_v25 }
 0x195   :  { %278 = vrot.lane.b32.xlu1 %v2979_v47, %s2656_s1 }
 0x207   :  { %v2983_v48 = vpop.permute.xlu1 %278 }
 0x208   :  { %2257 = vmatmul.msk.f32.vlgmr.msrb.gmra.mxu2 %vm178_vm1, %v2983_v48  ;;  %2258 = vmatmul.msk.f32.vlgmr.msra.gmra.mxu3 %vm178_vm1, %v2983_v48 }
 0x209   :  { %522 = vmatpush.msra.mxu3 %v2775_v5  ;;  %707 = vmatpush.msrb.mxu2 %v2770_v4 }
 0x20b   :  { %523 = vmatpush.msra.mxu3 %v2787_v7  ;;  %708 = vmatpush.msrb.mxu2 %v2780_v6 }
 0x20d   :  { %524 = vmatpush.msra.mxu3 %v2797_v9  ;;  %709 = vmatpush.msrb.mxu2 %v2792_v8 }
 0x20f   :  { %525 = vmatpush.msra.mxu3 %v2814_v12  ;;  %710 = vmatpush.msrb.mxu2 %v2809_v11 }
 0x211   :  { %526 = vmatpush.msra.mxu3 %v2828_v14  ;;  %711 = vmatpush.msrb.mxu2 %v2823_v13 }
 0x213   :  { %527 = vmatpush.msra.mxu3 %v2843_v16  ;;  %712 = vmatpush.msrb.mxu2 %v2838_v15 }
 0x215   :  { %528 = vmatpush.msra.mxu3 %v2856_v18  ;;  %713 = vmatpush.msrb.mxu2 %v2851_v17 }
 0x217   :  { %529 = vmatpush.msra.mxu3 %v2877_v20  ;;  %714 = vmatpush.msrb.mxu2 %v2872_v19 }
 0x28b   :  { %v299_v50 = vpop.f32.mrf.mxu2  ;;  %v319_v51 = vpop.f32.mrf.mxu3 }
 0x28c   :  { %v324_v53 = vrot.slane %v299_v50, 6  ;;  %v325_v54 = vrot.slane %v319_v51, 6 }
 0x28e   :  { %v328_v55 = vadd.f32 %v324_v53, %v2972_v52  ;;  %v329_v56 = vadd.f32 %v325_v54, %v2966_v46 }
 0x290   :  { %v2259_v57 = vmul.f32 -1.442695, %v328_v55  ;;  %v2260_v58 = vmul.f32 -1.442695, %v329_v56 }
 0x292   :  { %2395 = vpow2.f32 %v2259_v57 }
 0x293   :  { %2397 = vpow2.f32 %v2260_v58 }
 0x298   :  { %v2396_v59 = vpop.eup %2395 }
 0x299   :  { %v2398_v60 = vpop.eup %2397  ;;  %v336_v61 = vadd.f32 1.0, %v2396_v59 }
 0x29a   :  { %v337_v62 = vadd.f32 1.0, %v2398_v60 }
 0x29b   :  { %2399 = vrcp.f32 %v336_v61  ;;  %v349_v10 = vand.u32 2147483648, %v336_v61  ;;  %v347_v23 = vand.u32 2147483647, %v336_v61  ;;  %vm343_vm12 = vweird.f32 %v336_v61 }
 0x29c   :  { %2401 = vrcp.f32 %v337_v62  ;;  %v364_v24 = vand.u32 2147483648, %v337_v62  ;;  %v362_v26 = vand.u32 2147483647, %v337_v62  ;;  %vm358_vm14 = vweird.f32 %v337_v62 }
 0x29d   :  { %v350_v28 = vor.u32 1.1754944e-38, %v349_v10  ;;  %vm348_vm15 = vcmp.eq.f32.partialorder %v347_v23, 8.507059e+37 }
 0x29e   :  { %v365_v34 = vor.u32 1.1754944e-38, %v364_v24  ;;  %vm363_vm3 = vcmp.eq.f32.partialorder %v362_v26, 8.507059e+37 }
 0x2a1   :  { %v2400_v63 = vpop.eup %2399 }
 0x2a2   :  { %v2402_v0 = vpop.eup %2401  ;;  %v339_v1 = vmul.f32 %v2400_v63, %v336_v61  ;;  %vm344_vm10 = vweird.f32 %v2400_v63 }
 0x2a3   :  { %v354_v2 = vmul.f32 %v2402_v0, %v337_v62  ;;  %vm359_vm11 = vweird.f32 %v2402_v0  ;;  %vm345_vm13 = vmor %vm343_vm12, %vm344_vm10 }
 0x2a4   :  { %v340_v3 = vsub.f32 1.0, %v339_v1  ;;  %vm360_vm2 = vmor %vm358_vm14, %vm359_vm11 }
 0x2a5   :  { %v355_v21 = vsub.f32 1.0, %v354_v2 }
 0x2a6   :  { %v341_v22 = vmul.f32 %v2400_v63, %v340_v3 }
 0x2a7   :  { %v356_v25 = vmul.f32 %v2402_v0, %v355_v21 }
 0x2a8   :  { %v342_v27 = vadd.f32 %v2400_v63, %v341_v22 }
 0x2a9   :  { %v357_v29 = vadd.f32 %v2402_v0, %v356_v25 }
 0x2aa   :  { %v346_v31 = vsel %vm345_vm13, %v2400_v63, %v342_v27 }
 0x2ab   :  { %v351_v35 = vsel %vm348_vm15, %v350_v28, %v346_v31  ;;  %v361_v36 = vsel %vm360_vm2, %v2402_v0, %v357_v29 }
 0x2ac   :  { %v366_v37 = vsel %vm363_vm3, %v365_v34, %v361_v36  ;;  %v373_v38 = vmul.f32 %v371_v30, %v351_v35 }
 0x2ad   :  { %v368_v42 = vmul.f32 2.0, %v366_v37 }
 0x2af   :  { %v2261_v45 = vadd.f32 -1.0, %v368_v42 }
 0x2b1   :  { %v374_v50 = vmul.f32 %v2261_v45, %v351_v35 }
 0x2b3   :  { %376 = vrot.lane.b32.xlu2 %v374_v50, %s2656_s1 }
 0x30d   :  { %v377_v51 = vpop.permute.xlu2 %376 }
 0x30e   :  { %v3009_v53 = vadd.f32 %v377_v51, %v373_v38 }
 0x310   :  { %2403 = vtanh.f32 %v3009_v53  ;;  %v477_v51 = vrot.slane %v3009_v53, 6 }
 0x316   :  { %v2404_v44 = vpop.eup %2403 }
 0x317   :  { %v3012_v54 = vmul.f32 %v2404_v44, %v366_v37 }
 0x319   :  { %v383_v55 = vrot.slane %v3012_v54, 2 }
 0x31b   :  { %384 = vrot.lane.b32.xlu0 %v383_v55, %s2656_s1 }
 0x38d   :  { %v385_v56 = vpop.permute.xlu0 %384 }
 0x38e   :  { %2262 = vmatmul.msk.f32.vlgmr.msrb.gmra.mxu3 %vm178_vm1, %v385_v56  ;;  %2263 = vmatmul.msk.f32.vlgmr.msrb.gmra.mxu1 %vm178_vm1, %v385_v56 }
 0x38f   :  { %727 = vmatpush.msrb.mxu3 %v2775_v5  ;;  %833 = vmatpush.msrb.mxu1 %v2775_v5 }
 0x391   :  { %728 = vmatpush.msrb.mxu3 %v2787_v7  ;;  %834 = vmatpush.msrb.mxu1 %v2787_v7 }
 0x393   :  { %729 = vmatpush.msrb.mxu3 %v2797_v9  ;;  %835 = vmatpush.msrb.mxu1 %v2797_v9 }
 0x395   :  { %730 = vmatpush.msrb.mxu3 %v2814_v12  ;;  %836 = vmatpush.msrb.mxu1 %v2814_v12 }
 0x397   :  { %731 = vmatpush.msrb.mxu3 %v2828_v14  ;;  %837 = vmatpush.msrb.mxu1 %v2828_v14 }
 0x399   :  { %732 = vmatpush.msrb.mxu3 %v2843_v16  ;;  %838 = vmatpush.msrb.mxu1 %v2843_v16 }
 0x39b   :  { %733 = vmatpush.msrb.mxu3 %v2856_v18  ;;  %839 = vmatpush.msrb.mxu1 %v2856_v18 }
 0x39d   :  { %734 = vmatpush.msrb.mxu3 %v2877_v20  ;;  %840 = vmatpush.msrb.mxu1 %v2877_v20 }
 0x40b   :  { %v425_v57 = vpop.f32.mrf.mxu1 }
 0x40c   :  { %v431_v58 = vrot.slane %v425_v57, 4 }
 0x40e   :  { %v435_v59 = vadd.f32 %v431_v58, %v2966_v46 }
 0x410   :  { %v2265_v60 = vmul.f32 -1.442695, %v435_v59 }
 0x411   :  { %v405_v61 = vpop.f32.mrf.mxu3 }
 0x412   :  { %2405 = vpow2.f32 %v2265_v60  ;;  %v430_v62 = vrot.slane %v405_v61, 4 }
 0x414   :  { %v434_v63 = vadd.f32 %v430_v62, %v2972_v52 }
 0x416   :  { %v2264_v0 = vmul.f32 -1.442695, %v434_v63 }
 0x418   :  { %v2406_v1 = vpop.eup %2405  ;;  %2407 = vpow2.f32 %v2264_v0 }
 0x419   :  { %v443_v2 = vadd.f32 1.0, %v2406_v1 }
 0x41b   :  { %2409 = vrcp.f32 %v443_v2  ;;  %v470_v24 = vand.u32 2147483648, %v443_v2  ;;  %v468_v26 = vand.u32 2147483647, %v443_v2  ;;  %vm464_vm5 = vweird.f32 %v443_v2 }
 0x41d   :  { %v471_v30 = vor.u32 1.1754944e-38, %v470_v24  ;;  %vm469_vm7 = vcmp.eq.f32.partialorder %v468_v26, 8.507059e+37 }
 0x41e   :  { %v2408_v3 = vpop.eup %2407 }
 0x41f   :  { %v442_v10 = vadd.f32 1.0, %v2408_v3 }
 0x421   :  { %v2410_v21 = vpop.eup %2409  ;;  %2411 = vrcp.f32 %v442_v10  ;;  %v455_v35 = vand.u32 2147483648, %v442_v10  ;;  %v453_v38 = vand.u32 2147483647, %v442_v10  ;;  %vm449_vm9 = vweird.f32 %v442_v10 }
 0x422   :  { %v460_v22 = vmul.f32 %v2410_v21, %v443_v2  ;;  %vm465_vm4 = vweird.f32 %v2410_v21 }
 0x423   :  { %vm466_vm6 = vmor %vm464_vm5, %vm465_vm4  ;;  %v456_v50 = vor.u32 1.1754944e-38, %v455_v35  ;;  %vm454_vm11 = vcmp.eq.f32.partialorder %v453_v38, 8.507059e+37 }
 0x424   :  { %v461_v23 = vsub.f32 1.0, %v460_v22 }
 0x426   :  { %v462_v25 = vmul.f32 %v2410_v21, %v461_v23 }
 0x427   :  { %v2412_v27 = vpop.eup %2411 }
 0x428   :  { %v445_v28 = vmul.f32 %v2412_v27, %v442_v10  ;;  %v463_v29 = vadd.f32 %v2410_v21, %v462_v25  ;;  %vm450_vm8 = vweird.f32 %v2412_v27 }
 0x429   :  { %vm451_vm10 = vmor %vm449_vm9, %vm450_vm8 }
 0x42a   :  { %v446_v31 = vsub.f32 1.0, %v445_v28  ;;  %v467_v34 = vsel %vm466_vm6, %v2410_v21, %v463_v29 }
 0x42b   :  { %v472_v36 = vsel %vm469_vm7, %v471_v30, %v467_v34 }
 0x42c   :  { %v447_v37 = vmul.f32 %v2412_v27, %v446_v31  ;;  %v474_v42 = vmul.f32 2.0, %v472_v36 }
 0x42e   :  { %v448_v45 = vadd.f32 %v2412_v27, %v447_v37  ;;  %v2266_v55 = vadd.f32 -1.0, %v474_v42 }
 0x430   :  { %v452_v44 = vsel %vm451_vm10, %v2412_v27, %v448_v45 }
 0x431   :  { %v457_v56 = vsel %vm454_vm11, %v456_v50, %v452_v44 }
 0x432   :  { %v480_v57 = vmul.f32 %v2266_v55, %v457_v56  ;;  %v479_v58 = vmul.f32 %v477_v51, %v457_v56  ;;  %v108_v51 = vld [vmem:[%s3665_s25 + $0x8] sm:$0xff]  ;;  %s2658_s25 = smov 2  }
 0x434   :  { %482 = vrot.lane.b32.xlu1 %v480_v57, %s2656_s1 }
 0x4a6   :  { %v483_v59 = vpop.permute.xlu1 %482 }
 0x4a7   :  { %v3038_v60 = vadd.f32 %v483_v59, %v479_v58 }
 0x4a9   :  { %2413 = vtanh.f32 %v3038_v60  ;;  %v583_v25 = vrot.slane %v3038_v60, 6 }
 0x4af   :  { %v2414_v61 = vpop.eup %2413 }
 0x4b0   :  { %v3041_v62 = vmul.f32 %v2414_v61, %v472_v36 }
 0x4b2   :  { %v489_v63 = vrot.slane %v3041_v62, 4 }
 0x4b4   :  { %490 = vrot.lane.b32.xlu2 %v489_v63, %s2656_s1 }
 0x4bc   :  { %116 = vperm.xlu2 %2359, %v108_v51  }
 0x50e   :  { %v491_v53 = vpop.permute.xlu2 %490 }
 0x50f   :  { %2267 = vmatmul.msk.f32.vlgmr.msra.gmra.mxu2 %vm178_vm1, %v491_v53  ;;  %2268 = vmatmul.msk.f32.vlgmr.msra.gmra.mxu3 %vm178_vm1, %v491_v53 }
 0x510   :  { %919 = vmatpush.msra.mxu2 %v2770_v4  ;;  %939 = vmatpush.msra.mxu3 %v2775_v5 }
 0x512   :  { %920 = vmatpush.msra.mxu2 %v2780_v6  ;;  %940 = vmatpush.msra.mxu3 %v2787_v7 }
 0x514   :  { %921 = vmatpush.msra.mxu2 %v2792_v8  ;;  %941 = vmatpush.msra.mxu3 %v2797_v9 }
 0x516   :  { %922 = vmatpush.msra.mxu2 %v2809_v11  ;;  %942 = vmatpush.msra.mxu3 %v2814_v12  ;;  %v117_v56 = vpop.permute.xlu2 %116 }
 0x517   :  { %v128_v59 = vmul.f32 %v2959_v41, %v117_v56  ;;  %v129_v60 = vmul.f32 %v2948_v33, %v117_v56 }
 0x518   :  { %923 = vmatpush.msra.mxu2 %v2823_v13  ;;  %943 = vmatpush.msra.mxu3 %v2828_v14 }
 0x51a   :  { %924 = vmatpush.msra.mxu2 %v2838_v15  ;;  %944 = vmatpush.msra.mxu3 %v2843_v16 }
 0x51c   :  { %925 = vmatpush.msra.mxu2 %v2851_v17  ;;  %945 = vmatpush.msra.mxu3 %v2856_v18 }
 0x51e   :  { %926 = vmatpush.msra.mxu2 %v2872_v19  ;;  %946 = vmatpush.msra.mxu3 %v2877_v20 }
 0x592   :  { %v511_v4 = vpop.f32.mrf.mxu2  ;;  %v531_v5 = vpop.f32.mrf.mxu3 }
 0x593   :  { %v536_v6 = vrot.slane %v511_v4, 2  ;;  %v537_v7 = vrot.slane %v531_v5, 2 }
 0x595   :  { %v540_v8 = vadd.f32 %v536_v6, %v2972_v52  ;;  %v541_v9 = vadd.f32 %v537_v7, %v2966_v46 }
 0x597   :  { %v2269_v11 = vmul.f32 -1.442695, %v540_v8  ;;  %v2270_v12 = vmul.f32 -1.442695, %v541_v9 }
 0x599   :  { %2415 = vpow2.f32 %v2269_v11 }
 0x59a   :  { %2417 = vpow2.f32 %v2270_v12 }
 0x59f   :  { %v2416_v13 = vpop.eup %2415 }
 0x5a0   :  { %v2418_v14 = vpop.eup %2417  ;;  %v548_v15 = vadd.f32 1.0, %v2416_v13 }
 0x5a1   :  { %v549_v16 = vadd.f32 1.0, %v2418_v14 }
 0x5a2   :  { %2419 = vrcp.f32 %v548_v15  ;;  %v561_v1 = vand.u32 2147483648, %v548_v15  ;;  %v559_v46 = vand.u32 2147483647, %v548_v15  ;;  %vm555_vm14 = vweird.f32 %v548_v15 }
 0x5a3   :  { %2421 = vrcp.f32 %v549_v16  ;;  %v576_v3 = vand.u32 2147483648, %v549_v16  ;;  %v574_v21 = vand.u32 2147483647, %v549_v16  ;;  %vm570_vm2 = vweird.f32 %v549_v16 }
 0x5a4   :  { %v562_v23 = vor.u32 1.1754944e-38, %v561_v1  ;;  %vm560_vm3 = vcmp.eq.f32.partialorder %v559_v46, 8.507059e+37 }
 0x5a5   :  { %v577_v27 = vor.u32 1.1754944e-38, %v576_v3  ;;  %vm575_vm5 = vcmp.eq.f32.partialorder %v574_v21, 8.507059e+37 }
 0x5a8   :  { %v2420_v17 = vpop.eup %2419 }
 0x5a9   :  { %v2422_v18 = vpop.eup %2421  ;;  %v551_v19 = vmul.f32 %v2420_v17, %v548_v15  ;;  %vm556_vm12 = vweird.f32 %v2420_v17 }
 0x5aa   :  { %v566_v20 = vmul.f32 %v2422_v18, %v549_v16  ;;  %vm571_vm13 = vweird.f32 %v2422_v18  ;;  %vm557_vm15 = vmor %vm555_vm14, %vm556_vm12 }
 0x5ab   :  { %v552_v0 = vsub.f32 1.0, %v551_v19  ;;  %vm572_vm4 = vmor %vm570_vm2, %vm571_vm13 }
 0x5ac   :  { %v567_v2 = vsub.f32 1.0, %v566_v20 }
 0x5ad   :  { %v553_v52 = vmul.f32 %v2420_v17, %v552_v0 }
 0x5ae   :  { %v568_v10 = vmul.f32 %v2422_v18, %v567_v2 }
 0x5af   :  { %v554_v22 = vadd.f32 %v2420_v17, %v553_v52 }
 0x5b0   :  { %v569_v24 = vadd.f32 %v2422_v18, %v568_v10 }
 0x5b1   :  { %v558_v26 = vsel %vm557_vm15, %v2420_v17, %v554_v22 }
 0x5b2   :  { %v563_v28 = vsel %vm560_vm3, %v562_v23, %v558_v26  ;;  %v573_v29 = vsel %vm572_vm4, %v2422_v18, %v569_v24 }
 0x5b3   :  { %v578_v30 = vsel %vm575_vm5, %v577_v27, %v573_v29  ;;  %v585_v31 = vmul.f32 %v583_v25, %v563_v28 }
 0x5b4   :  { %v580_v34 = vmul.f32 2.0, %v578_v30 }
 0x5b6   :  { %v2271_v35 = vadd.f32 -1.0, %v580_v34 }
 0x5b8   :  { %v586_v36 = vmul.f32 %v2271_v35, %v563_v28 }
 0x5ba   :  { %588 = vrot.lane.b32.xlu0 %v586_v36, %s2656_s1 }
 0x5c2   :  { %135 = vperm.xlu0 %2360, %v108_v51  }
 0x62c   :  { %v589_v37 = vpop.permute.xlu0 %588 }
 0x62d   :  { %v3067_v38 = vadd.f32 %v589_v37, %v585_v31 }
 0x62f   :  { %2423 = vtanh.f32 %v3067_v38  ;;  %v683_v52 = vrot.slane %v3067_v38, 6 }
 0x634   :  { %v136_v55 = vpop.permute.xlu0 %135 }
 0x635   :  { %v2424_v42 = vpop.eup %2423  ;;  %v146_v57 = vmul.f32 %v2957_v40, %v136_v55  ;;  %v147_v58 = vmul.f32 %v2946_v32, %v136_v55 }
 0x636   :  { %v3070_v45 = vmul.f32 %v2424_v42, %v578_v30 }
 0x637   :  { %v150_v61 = vadd.f32 %v146_v57, %v128_v59  ;;  %v151_v63 = vadd.f32 %v147_v58, %v129_v60 }
 0x638   :  { %v595_v50 = vrot.slane %v3070_v45, 6 }
 0x639   :  { %v3087_v53 = vadd.f32 %v153_v49, %v150_v61  ;;  %v3091_v4 = vadd.f32 %v154_v43, %v151_v63 }
 0x63a   :  { %596 = vrot.lane.b32.xlu1 %v595_v50, %s2656_s1 }
 0x6ac   :  { %v597_v44 = vpop.permute.xlu1 %596 }
 0x6ad   :  { %2272 = vmatmul.msk.f32.vlgmr.msra.gmra.mxu0 %vm178_vm1, %v597_v44  ;;  %2273 = vmatmul.msk.f32.vlgmr.msra.gmra.mxu1 %vm178_vm1, %v597_v44 }
 0x72a   :  { %v617_v5 = vpop.f32.mrf.mxu0  ;;  %v637_v6 = vpop.f32.mrf.mxu1 }
 0x72b   :  { %v640_v40 = vadd.f32 %v617_v5, %v3087_v53  ;;  %v641_v32 = vadd.f32 %v637_v6, %v3091_v4 }
 0x72d   :  { %v2274_v7 = vmul.f32 -1.442695, %v640_v40  ;;  %v2275_v41 = vmul.f32 -1.442695, %v641_v32 }
 0x72f   :  { %2425 = vpow2.f32 %v2274_v7 }
 0x730   :  { %2427 = vpow2.f32 %v2275_v41 }
 0x735   :  { %v2426_v33 = vpop.eup %2425 }
 0x736   :  { %v2428_v8 = vpop.eup %2427  ;;  %v648_v9 = vadd.f32 1.0, %v2426_v33 }
 0x737   :  { %v649_v11 = vadd.f32 1.0, %v2428_v8 }
 0x738   :  { %2429 = vrcp.f32 %v648_v9  ;;  %v661_v15 = vand.u32 2147483648, %v648_v9  ;;  %v659_v17 = vand.u32 2147483647, %v648_v9  ;;  %vm655_vm8 = vweird.f32 %v648_v9 }
 0x739   :  { %2431 = vrcp.f32 %v649_v11  ;;  %v676_v18 = vand.u32 2147483648, %v649_v11  ;;  %v674_v20 = vand.u32 2147483647, %v649_v11  ;;  %vm670_vm10 = vweird.f32 %v649_v11 }
 0x73a   :  { %v662_v1 = vor.u32 1.1754944e-38, %v661_v15  ;;  %vm660_vm11 = vcmp.eq.f32.partialorder %v659_v17, 8.507059e+37 }
 0x73b   :  { %v677_v3 = vor.u32 1.1754944e-38, %v676_v18  ;;  %vm675_vm13 = vcmp.eq.f32.partialorder %v674_v20, 8.507059e+37 }
 0x73e   :  { %v2430_v49 = vpop.eup %2429 }
 0x73f   :  { %v2432_v39 = vpop.eup %2431  ;;  %v651_v43 = vmul.f32 %v2430_v49, %v648_v9  ;;  %vm656_vm6 = vweird.f32 %v2430_v49 }
 0x740   :  { %v666_v12 = vmul.f32 %v2432_v39, %v649_v11  ;;  %vm671_vm7 = vweird.f32 %v2432_v39  ;;  %vm657_vm9 = vmor %vm655_vm8, %vm656_vm6 }
 0x741   :  { %v652_v13 = vsub.f32 1.0, %v651_v43  ;;  %vm672_vm12 = vmor %vm670_vm10, %vm671_vm7 }
 0x742   :  { %v667_v14 = vsub.f32 1.0, %v666_v12 }
 0x743   :  { %v653_v16 = vmul.f32 %v2430_v49, %v652_v13 }
 0x744   :  { %v668_v19 = vmul.f32 %v2432_v39, %v667_v14 }
 0x745   :  { %v654_v0 = vadd.f32 %v2430_v49, %v653_v16 }
 0x746   :  { %v669_v2 = vadd.f32 %v2432_v39, %v668_v19 }
 0x747   :  { %v658_v46 = vsel %vm657_vm9, %v2430_v49, %v654_v0 }
 0x748   :  { %v663_v10 = vsel %vm660_vm11, %v662_v1, %v658_v46  ;;  %v673_v21 = vsel %vm672_vm12, %v2432_v39, %v669_v2 }
 0x749   :  { %v678_v22 = vsel %vm675_vm13, %v677_v3, %v673_v21  ;;  %v685_v23 = vmul.f32 %v683_v52, %v663_v10 }
 0x74a   :  { %v680_v24 = vmul.f32 2.0, %v678_v22 }
 0x74c   :  { %v2276_v25 = vadd.f32 -1.0, %v680_v24 }
 0x74e   :  { %v686_v26 = vmul.f32 %v2276_v25, %v663_v10 }
 0x750   :  { %688 = vrot.lane.b32.xlu1 %v686_v26, %s2656_s1 }
 0x7c2   :  { %v689_v27 = vpop.permute.xlu1 %688 }
 0x7c3   :  { %v691_v28 = vadd.f32 %v689_v27, %v685_v23 }
 0x7c5   :  { %2433 = vtanh.f32 %v691_v28  ;;  %v788_v39 = vrot.slane %v691_v28, 6 }
 0x7cb   :  { %v2434_v29 = vpop.eup %2433 }
 0x7cc   :  { %v3097_v30 = vmul.f32 %v2434_v29, %v678_v22 }
 0x7ce   :  { %695 = vrot.lane.b32.xlu2 %v3097_v30, %s2656_s1 }
 0x828   :  { %v3101_v31 = vpop.permute.xlu2 %695 }
 0x829   :  { %2277 = vmatmul.msk.f32.vlgmr.msrb.gmra.mxu2 %vm178_vm1, %v3101_v31  ;;  %2278 = vmatmul.msk.f32.vlgmr.msrb.gmra.mxu3 %vm178_vm1, %v3101_v31 }
 0x8ac   :  { %v716_v34 = vpop.f32.mrf.mxu2  ;;  %v736_v35 = vpop.f32.mrf.mxu3 }
 0x8ad   :  { %v741_v36 = vrot.slane %v716_v34, 6  ;;  %v742_v37 = vrot.slane %v736_v35, 6 }
 0x8af   :  { %v745_v38 = vadd.f32 %v741_v36, %v3087_v53  ;;  %v746_v42 = vadd.f32 %v742_v37, %v3091_v4 }
 0x8b1   :  { %v2279_v51 = vmul.f32 -1.442695, %v745_v38  ;;  %v2280_v44 = vmul.f32 -1.442695, %v746_v42 }
 0x8b3   :  { %2435 = vpow2.f32 %v2279_v51 }
 0x8b4   :  { %2437 = vpow2.f32 %v2280_v44 }
 0x8b9   :  { %v2436_v55 = vpop.eup %2435 }
 0x8ba   :  { %v2438_v56 = vpop.eup %2437  ;;  %v753_v57 = vadd.f32 1.0, %v2436_v55 }
 0x8bb   :  { %v754_v58 = vadd.f32 1.0, %v2438_v56 }
 0x8bc   :  { %2439 = vrcp.f32 %v753_v57  ;;  %v766_v6 = vand.u32 2147483648, %v753_v57  ;;  %v764_v7 = vand.u32 2147483647, %v753_v57  ;;  %vm760_vm2 = vweird.f32 %v753_v57 }
 0x8bd   :  { %2441 = vrcp.f32 %v754_v58  ;;  %v781_v41 = vand.u32 2147483648, %v754_v58  ;;  %v779_v8 = vand.u32 2147483647, %v754_v58  ;;  %vm775_vm4 = vweird.f32 %v754_v58 }
 0x8be   :  { %v767_v11 = vor.u32 1.1754944e-38, %v766_v6  ;;  %vm765_vm5 = vcmp.eq.f32.partialorder %v764_v7, 8.507059e+37 }
 0x8bf   :  { %v782_v12 = vor.u32 1.1754944e-38, %v781_v41  ;;  %vm780_vm7 = vcmp.eq.f32.partialorder %v779_v8, 8.507059e+37 }
 0x8c2   :  { %v2440_v59 = vpop.eup %2439 }
 0x8c3   :  { %v2442_v60 = vpop.eup %2441  ;;  %v756_v61 = vmul.f32 %v2440_v59, %v753_v57  ;;  %vm761_vm14 = vweird.f32 %v2440_v59 }
 0x8c4   :  { %v771_v63 = vmul.f32 %v2442_v60, %v754_v58  ;;  %vm776_vm15 = vweird.f32 %v2442_v60  ;;  %vm762_vm3 = vmor %vm760_vm2, %vm761_vm14 }
 0x8c5   :  { %v757_v5 = vsub.f32 1.0, %v756_v61  ;;  %vm777_vm6 = vmor %vm775_vm4, %vm776_vm15 }
 0x8c6   :  { %v772_v40 = vsub.f32 1.0, %v771_v63 }
 0x8c7   :  { %v758_v32 = vmul.f32 %v2440_v59, %v757_v5 }
 0x8c8   :  { %v773_v33 = vmul.f32 %v2442_v60, %v772_v40 }
 0x8c9   :  { %v759_v9 = vadd.f32 %v2440_v59, %v758_v32 }
 0x8ca   :  { %v774_v49 = vadd.f32 %v2442_v60, %v773_v33 }
 0x8cb   :  { %v763_v43 = vsel %vm762_vm3, %v2440_v59, %v759_v9 }
 0x8cc   :  { %v768_v13 = vsel %vm765_vm5, %v767_v11, %v763_v43  ;;  %v778_v14 = vsel %vm777_vm6, %v2442_v60, %v774_v49 }
 0x8cd   :  { %v783_v15 = vsel %vm780_vm7, %v782_v12, %v778_v14  ;;  %v790_v16 = vmul.f32 %v788_v39, %v768_v13  ;;  %v2361_v14 = vpack.i.bf16 %v3041_v62, %v3012_v54 }
 0x8ce   :  { %v785_v17 = vmul.f32 2.0, %v783_v15 }
 0x8d0   :  { %v2281_v18 = vadd.f32 -1.0, %v785_v17 }
 0x8d2   :  { %v791_v19 = vmul.f32 %v2281_v18, %v768_v13 }
 0x8d4   :  { %793 = vrot.lane.b32.xlu1 %v791_v19, %s2656_s1 }
 0x946   :  { %v794_v20 = vpop.permute.xlu1 %793 }
 0x947   :  { %v796_v0 = vadd.f32 %v794_v20, %v790_v16  ;;  %v2293_v16 = vld [vmem:[%s3664_s23 + $0x6] sm:$0x3] }
 0x949   :  { %2443 = vtanh.f32 %v796_v0  ;;  %v894_v5 = vrot.slane %v796_v0, 6 }
 0x94f   :  { %v2444_v1 = vpop.eup %2443 }
 0x950   :  { %v3110_v2 = vmul.f32 %v2444_v1, %v783_v15 }
 0x952   :  { %v800_v52 = vrot.slane %v3110_v2, 2 }
 0x954   :  { %801 = vrot.lane.b32.xlu2 %v800_v52, %s2656_s1 }
 0x9ae   :  { %v802_v46 = vpop.permute.xlu2 %801 }
 0x9af   :  { %2282 = vmatmul.msk.f32.vlgmr.msrb.gmra.mxu0 %vm178_vm1, %v802_v46  ;;  %2283 = vmatmul.msk.f32.vlgmr.msrb.gmra.mxu1 %vm178_vm1, %v802_v46 }
 0xa2c   :  { %v822_v3 = vpop.f32.mrf.mxu0  ;;  %v842_v10 = vpop.f32.mrf.mxu1 }
 0xa2d   :  { %v847_v21 = vrot.slane %v822_v3, 4  ;;  %v848_v22 = vrot.slane %v842_v10, 4 }
 0xa2f   :  { %v851_v23 = vadd.f32 %v847_v21, %v3087_v53  ;;  %v852_v24 = vadd.f32 %v848_v22, %v3091_v4 }
 0xa31   :  { %v2284_v25 = vmul.f32 -1.442695, %v851_v23  ;;  %v2285_v26 = vmul.f32 -1.442695, %v852_v24  ;;  %v2295_v23 = vld [vmem:[%s3644_s2 + $0x6] sm:$0x3] }
 0xa32   :  { %v1111_v24 = vld [vmem:[#allocation3 + $0xf0] sm:$0xff] }
 0xa33   :  { %2445 = vpow2.f32 %v2284_v25  ;;  %1135 = vmatpush.msra.mxu0 %v1111_v24  ;;  %v1110_v25 = vld [vmem:[#allocation3 + $0xe8] sm:$0xff]  ;;  %v1092_v24 = vld [vmem:[#allocation3 + $0x58] sm:$0xff] }
 0xa34   :  { %2447 = vpow2.f32 %v2285_v26  ;;  %v1107_v26 = vld [vmem:[#allocation3 + $0xd0] sm:$0xff] }
 0xa39   :  { %v2446_v27 = vpop.eup %2445 }
 0xa3a   :  { %v2448_v28 = vpop.eup %2447  ;;  %v859_v29 = vadd.f32 1.0, %v2446_v27  ;;  %v1108_v27 = vld [vmem:[#allocation3 + $0xd8] sm:$0xff] }
 0xa3b   :  { %v860_v34 = vadd.f32 1.0, %v2448_v28  ;;  %v1105_v28 = vld [vmem:[#allocation3 + $0xc0] sm:$0xff] }
 0xa3c   :  { %2449 = vrcp.f32 %v859_v29  ;;  %v872_v51 = vand.u32 2147483648, %v859_v29  ;;  %v870_v56 = vand.u32 2147483647, %v859_v29  ;;  %vm866_vm10 = vweird.f32 %v859_v29 }
 0xa3d   :  { %2451 = vrcp.f32 %v860_v34  ;;  %v887_v57 = vand.u32 2147483648, %v860_v34  ;;  %v885_v59 = vand.u32 2147483647, %v860_v34  ;;  %vm881_vm12 = vweird.f32 %v860_v34 }
 0xa3e   :  { %v873_v61 = vor.u32 1.1754944e-38, %v872_v51  ;;  %vm871_vm13 = vcmp.eq.f32.partialorder %v870_v56, 8.507059e+37  ;;  %v1104_v51 = vld [vmem:[#allocation3 + $0xb8] sm:$0xff] }
 0xa3f   :  { %v888_v40 = vor.u32 1.1754944e-38, %v887_v57  ;;  %vm886_vm15 = vcmp.eq.f32.partialorder %v885_v59, 8.507059e+37  ;;  %v1102_v57 = vld [vmem:[#allocation3 + $0xa8] sm:$0xff] }
 0xa42   :  { %v2450_v35 = vpop.eup %2449 }
 0xa43   :  { %v2452_v36 = vpop.eup %2451  ;;  %v862_v37 = vmul.f32 %v2450_v35, %v859_v29  ;;  %vm867_vm8 = vweird.f32 %v2450_v35  ;;  %v1106_v29 = vld [vmem:[#allocation3 + $0xc8] sm:$0xff] }
 0xa44   :  { %v877_v38 = vmul.f32 %v2452_v36, %v860_v34  ;;  %vm882_vm9 = vweird.f32 %v2452_v36  ;;  %vm868_vm11 = vmor %vm866_vm10, %vm867_vm8  ;;  %v3144_v34 = vld [vmem:[#allocation6 + $0x70] sm:$0xff]  ;;  %vm1072_vm10 = vcmask 1041408  }
 0xa45   :  { %v863_v42 = vsub.f32 1.0, %v862_v37  ;;  %vm883_vm14 = vmor %vm881_vm12, %vm882_vm9  ;;  %v1103_v37 = vld [vmem:[#allocation3 + $0xb0] sm:$0xff]  ;;  %1210 = vmatpush.msrb.mxu2 %v3144_v34  ;;  %vm1076_vm12 = vcmask 1045504  }
 0xa46   :  { %v878_v44 = vsub.f32 1.0, %v877_v38 }
 0xa47   :  { %v864_v55 = vmul.f32 %v2450_v35, %v863_v42 }
 0xa48   :  { %v879_v58 = vmul.f32 %v2452_v36, %v878_v44 }
 0xa49   :  { %v865_v60 = vadd.f32 %v2450_v35, %v864_v55  ;;  %v1101_v55 = vld [vmem:[#allocation3 + $0xa0] sm:$0xff] }
 0xa4a   :  { %v880_v63 = vadd.f32 %v2452_v36, %v879_v58 }
 0xa4b   :  { %v869_v6 = vsel %vm868_vm11, %v2450_v35, %v865_v60  ;;  %v3146_v35 = vld [vmem:[#allocation6 + $0x78] sm:$0xff]  ;;  %v1099_v60 = vld [vmem:[#allocation3 + $0x90] sm:$0xff]  ;;  %vm1074_vm11 = vcmask 1043456  }
 0xa4c   :  { %v874_v32 = vsel %vm871_vm13, %v873_v61, %v869_v6  ;;  %v884_v7 = vsel %vm883_vm14, %v2452_v36, %v880_v63  ;;  %1230 = vmatpush.msrb.mxu3 %v3146_v35  ;;  %v1100_v6 = vld [vmem:[#allocation3 + $0x98] sm:$0xff] }
 0xa4d   :  { %v889_v41 = vsel %vm886_vm15, %v888_v40, %v884_v7  ;;  %v896_v33 = vmul.f32 %v894_v5, %v874_v32 }
 0xa4e   :  { %v891_v8 = vmul.f32 2.0, %v889_v41 }
 0xa50   :  { %v2286_v9 = vadd.f32 -1.0, %v891_v8 }
 0xa52   :  { %v897_v11 = vmul.f32 %v2286_v9, %v874_v32 }
 0xa54   :  { %899 = vrot.lane.b32.xlu0 %v897_v11, %s2656_s1 }
 0xa5c   :  { %1186 = vrot.lane.b32.xlu0 %v2293_v16, %s2654_s26 }
 0xa64   :  { %1195 = vrot.lane.b32.xlu0 %v2295_v23, %s2654_s26  ;;  %v1091_v23 = vld [vmem:[#allocation3 + $0x50] sm:$0xff] }
 0xac6   :  { %v900_v49 = vpop.permute.xlu0 %899 }
 0xac7   :  { %v3119_v39 = vadd.f32 %v900_v49, %v896_v33 }
 0xac9   :  { %2453 = vtanh.f32 %v3119_v39  ;;  %v1000_v8 = vrot.slane %v3119_v39, 6  ;;  %v1097_v39 = vld [vmem:[#allocation3 + $0x80] sm:$0xff] }
 0xacf   :  { %v2454_v43 = vpop.eup %2453 }
 0xad0   :  { %v3122_v12 = vmul.f32 %v2454_v43, %v889_v41 }
 0xad2   :  { %v906_v13 = vrot.slane %v3122_v12, 4 }
 0xad4   :  { %907 = vrot.lane.b32.xlu1 %v906_v13, %s2656_s1 }
 0xadc   :  { %2362 = vrot.lane.b32.xlu1 %v2361_v14, %s2656_s1 }
 0xb46   :  { %v908_v15 = vpop.permute.xlu1 %907 }
 0xb47   :  { %2287 = vmatmul.msk.f32.vlgmr.msra.gmra.mxu2 %vm178_vm1, %v908_v15  ;;  %2288 = vmatmul.msk.f32.vlgmr.msra.gmra.mxu3 %vm178_vm1, %v908_v15 }
 0xbca   :  { %v928_v17 = vpop.f32.mrf.mxu2  ;;  %v948_v18 = vpop.f32.mrf.mxu3 }
 0xbcb   :  { %v953_v19 = vrot.slane %v928_v17, 2  ;;  %v954_v20 = vrot.slane %v948_v18, 2  ;;  %v1098_v18 = vld [vmem:[#allocation3 + $0x88] sm:$0xff] }
 0xbcd   :  { %v957_v0 = vadd.f32 %v953_v19, %v3087_v53  ;;  %v958_v1 = vadd.f32 %v954_v20, %v3091_v4  ;;  %v1112_v53 = vld [vmem:[#allocation3 + $0xf8] sm:$0xff]  ;;  %v1109_v4 = vld [vmem:[#allocation3 + $0xe0] sm:$0xff]  ;;  %v3165_v20 = vld [vmem:[#allocation6 + $0x68] sm:$0xff] }
 0xbce   :  { %1158 = vmatpush.msra.mxu1 %v1112_v53  ;;  %1136 = vmatpush.msra.mxu0 %v1109_v4  ;;  %v3163_v19 = vld [vmem:[#allocation6 + $0x60] sm:$0xff]  ;;  %v3181_v53 = vld [vmem:[#allocation6 + $0x30] sm:$0xff]  ;;  %v3183_v4 = vld [vmem:[#allocation6 + $0x38] sm:$0xff] }
 0xbcf   :  { %v2289_v52 = vmul.f32 -1.442695, %v957_v0  ;;  %v2290_v46 = vmul.f32 -1.442695, %v958_v1  ;;  %1211 = vmatpush.msrb.mxu2 %v3163_v19  ;;  %1231 = vmatpush.msrb.mxu3 %v3165_v20  ;;  %v1095_v0 = vld [vmem:[#allocation3 + $0x70] sm:$0xff]  ;;  %v1096_v1 = vld [vmem:[#allocation3 + $0x78] sm:$0xff] }
 0xbd0   :  { %1159 = vmatpush.msra.mxu1 %v1110_v25  ;;  %1137 = vmatpush.msra.mxu0 %v1107_v26  ;;  %v1089_v25 = vld [vmem:[#allocation3 + $0x40] sm:$0xff]  ;;  %v1090_v26 = vld [vmem:[#allocation3 + $0x48] sm:$0xff] }
 0xbd1   :  { %2455 = vpow2.f32 %v2289_v52  ;;  %v3169_v52 = vld [vmem:[#allocation6 + $0x50] sm:$0xff] }
 0xbd2   :  { %2457 = vpow2.f32 %v2290_v46  ;;  %1160 = vmatpush.msra.mxu1 %v1108_v27  ;;  %1138 = vmatpush.msra.mxu0 %v1105_v28  ;;  %v3171_v46 = vld [vmem:[#allocation6 + $0x58] sm:$0xff]  ;;  %v3187_v27 = vld [vmem:[#allocation6 + $0x20] sm:$0xff]  ;;  %v3189_v28 = vld [vmem:[#allocation6 + $0x28] sm:$0xff] }
 0xbd3   :  { %1212 = vmatpush.msrb.mxu2 %v3169_v52  ;;  %1232 = vmatpush.msrb.mxu3 %v3171_v46 }
 0xbd4   :  { %1161 = vmatpush.msra.mxu1 %v1106_v29  ;;  %1139 = vmatpush.msra.mxu0 %v1103_v37  ;;  %v1087_v29 = vld [vmem:[#allocation3 + $0x30] sm:$0xff] }
 0xbd5   :  { %v3193_v37 = vld [vmem:[#allocation6 + $0x10] sm:$0xff] }
 0xbd6   :  { %1162 = vmatpush.msra.mxu1 %v1104_v51  ;;  %1140 = vmatpush.msra.mxu0 %v1101_v55  ;;  %v2292_v51 = vld [vmem:[%s3664_s23 + $0x4] sm:$0x3] }
 0xbd7   :  { %v2456_v3 = vpop.eup %2455 }
 0xbd8   :  { %v2458_v10 = vpop.eup %2457  ;;  %v965_v21 = vadd.f32 1.0, %v2456_v3  ;;  %1163 = vmatpush.msra.mxu1 %v1102_v57  ;;  %1141 = vmatpush.msra.mxu0 %v1099_v60  ;;  %v1093_v3 = vld [vmem:[#allocation3 + $0x60] sm:$0xff]  ;;  %v1084_v60 = vld [vmem:[#allocation3 + $0x18] sm:$0xff] }
 0xbd9   :  { %v3137_v22 = vadd.f32 1.0, %v2458_v10  ;;  %v1094_v10 = vld [vmem:[#allocation3 + $0x68] sm:$0xff]  ;;  %v3203_v57 = vld [vmem:[#allocation6] sm:$0xff] }
 0xbda   :  { %2459 = vrcp.f32 %v965_v21  ;;  %v978_v58 = vand.u32 2147483648, %v965_v21  ;;  %v976_v63 = vand.u32 2147483647, %v965_v21  ;;  %vm972_vm4 = vweird.f32 %v965_v21  ;;  %1164 = vmatpush.msra.mxu1 %v1100_v6  ;;  %1142 = vmatpush.msra.mxu0 %v1097_v39 }
 0xbdb   :  { %2461 = vrcp.f32 %v3137_v22  ;;  %v993_v5 = vand.u32 2147483648, %v3137_v22  ;;  %v991_v32 = vand.u32 2147483647, %v3137_v22  ;;  %vm987_vm6 = vweird.f32 %v3137_v22 }
 0xbdc   :  { %v979_v41 = vor.u32 1.1754944e-38, %v978_v58  ;;  %vm977_vm7 = vcmp.eq.f32.partialorder %v976_v63, 8.507059e+37  ;;  %1165 = vmatpush.msra.mxu1 %v1098_v18  ;;  %1143 = vmatpush.msra.mxu0 %v1095_v0  ;;  %v3205_v58 = vld [vmem:[#allocation6 + $0x8] sm:$0xff] }
 0xbdd   :  { %v994_v11 = vor.u32 1.1754944e-38, %v993_v5  ;;  %vm992_vm9 = vcmp.eq.f32.partialorder %v991_v32, 8.507059e+37  ;;  %v1082_v63 = vld [vmem:[#allocation3 + $0x8] sm:$0xff]  ;;  %v2294_v5 = vld [vmem:[%s3644_s2 + $0x4] sm:$0x3] }
 0xbde   :  { %1166 = vmatpush.msra.mxu1 %v1096_v1  ;;  %1144 = vmatpush.msra.mxu0 %v1093_v3 }
 0xbe0   :  { %v2460_v36 = vpop.eup %2459  ;;  %1167 = vmatpush.msra.mxu1 %v1094_v10  ;;  %1145 = vmatpush.msra.mxu0 %v1091_v23 }
 0xbe1   :  { %v2462_v38 = vpop.eup %2461  ;;  %v968_v42 = vmul.f32 %v2460_v36, %v965_v21  ;;  %vm973_vm2 = vweird.f32 %v2460_v36  ;;  %v3175_v21 = vld [vmem:[#allocation6 + $0x40] sm:$0xff] }
 0xbe2   :  { %v983_v44 = vmul.f32 %v2462_v38, %v3137_v22  ;;  %vm988_vm3 = vweird.f32 %v2462_v38  ;;  %vm974_vm5 = vmor %vm972_vm4, %vm973_vm2  ;;  %v3177_v22 = vld [vmem:[#allocation6 + $0x48] sm:$0xff]  ;;  %1213 = vmatpush.msrb.mxu2 %v3175_v21  ;;  %1168 = vmatpush.msra.mxu1 %v1092_v24 }
 0xbe3   :  { %v969_v56 = vsub.f32 1.0, %v968_v42  ;;  %vm989_vm8 = vmor %vm987_vm6, %vm988_vm3  ;;  %1233 = vmatpush.msrb.mxu3 %v3177_v22  ;;  %1146 = vmatpush.msra.mxu0 %v1089_v25  ;;  %v3195_v42 = vld [vmem:[#allocation6 + $0x18] sm:$0xff] }
 0xbe4   :  { %v984_v59 = vsub.f32 1.0, %v983_v44  ;;  %1214 = vmatpush.msrb.mxu2 %v3181_v53  ;;  %1169 = vmatpush.msra.mxu1 %v1090_v26  ;;  %v1085_v44 = vld [vmem:[#allocation3 + $0x20] sm:$0xff] }
 0xbe5   :  { %v970_v61 = vmul.f32 %v2460_v36, %v969_v56  ;;  %1234 = vmatpush.msrb.mxu3 %v3183_v4  ;;  %1147 = vmatpush.msra.mxu0 %v1087_v29  ;;  %v1086_v56 = vld [vmem:[#allocation3 + $0x28] sm:$0xff] }
 0xbe6   :  { %v985_v40 = vmul.f32 %v2462_v38, %v984_v59  ;;  %1215 = vmatpush.msrb.mxu2 %v3187_v27  ;;  %v1083_v59 = vld [vmem:[#allocation3 + $0x10] sm:$0xff] }
 0xbe7   :  { %v971_v7 = vadd.f32 %v2460_v36, %v970_v61  ;;  %1235 = vmatpush.msrb.mxu3 %v3189_v28  ;;  %1148 = vmatpush.msra.mxu0 %v1085_v44  ;;  %v1081_v61 = vld [vmem:[#allocation3] sm:$0xff] }
 0xbe8   :  { %v986_v33 = vadd.f32 %v2462_v38, %v985_v40  ;;  %1216 = vmatpush.msrb.mxu2 %v3193_v37 }
 0xbe9   :  { %v975_v9 = vsel %vm974_vm5, %v2460_v36, %v971_v7  ;;  %v1088_v36 = vld [vmem:[#allocation3 + $0x38] sm:$0xff]  ;;  %1236 = vmatpush.msrb.mxu3 %v3195_v42  ;;  %1149 = vmatpush.msra.mxu0 %v1083_v59 }
 0xbea   :  { %v980_v49 = vsel %vm977_vm7, %v979_v41, %v975_v9  ;;  %v990_v43 = vsel %vm989_vm8, %v2462_v38, %v986_v33  ;;  %v1187_v38 = vpop.permute.xlu0 %1186  ;;  %1170 = vmatpush.msra.mxu1 %v1088_v36  ;;  %1217 = vmatpush.msrb.mxu2 %v3203_v57  ;;  %v2363_v41 = vpop.permute.xlu1 %2362  ;;  %vm1015_vm7 = vcmask 261126  }
 0xbeb   :  { %v3155_v13 = vsel %vm992_vm9, %v994_v11, %v990_v43  ;;  %v3157_v14 = vmul.f32 %v1000_v8, %v980_v49  ;;  %v1189_v55 = vsel %vm168_vm0, %v2292_v51, %v1187_v38  ;;  %1237 = vmatpush.msrb.mxu3 %v3205_v58  ;;  %1150 = vmatpush.msra.mxu0 %v1081_v61  ;;  %v2364_v8 = vunpack.i.l.bf16 %v2363_v41 }
 0xbec   :  { %v997_v15 = vmul.f32 2.0, %v3155_v13  ;;  %1171 = vmatpush.msra.mxu1 %v1086_v56  ;;  %2296 = vmatmul.msk.f32.vlgmr.msrb.gmra.mxu2 %vm178_vm1, %v1189_v55  ;;  %v2365_v11 = vunpack.i.h.bf16 %v2363_v41 }
 0xbed   :  { %2297 = vmatmul.msk.f32.vlgmr.msrb.gmra.mxu3 %vm178_vm1, %v1189_v55  ;;  %1310 = vmatpush.msra.mxu2 %v3144_v34 }
 0xbee   :  { %v2291_v16 = vadd.f32 -1.0, %v997_v15  ;;  %1172 = vmatpush.msra.mxu1 %v1084_v60  ;;  %1330 = vmatpush.msra.mxu3 %v3146_v35 }
 0xbef   :  { %1311 = vmatpush.msra.mxu2 %v3163_v19  ;;  %1416 = vmatpush.msrb.mxu0 %v3144_v34 }
 0xbf0   :  { %v1003_v17 = vmul.f32 %v2291_v16, %v980_v49  ;;  %1173 = vmatpush.msra.mxu1 %v1082_v63  ;;  %1331 = vmatpush.msra.mxu3 %v3165_v20  ;;  %v1039_v49 = vrot.slane %v3122_v12, 2 }
 0xbf1   :  { %1312 = vmatpush.msra.mxu2 %v3169_v52  ;;  %1417 = vmatpush.msrb.mxu0 %v3163_v19 }
 0xbf2   :  { %1005 = vrot.lane.b32.xlu2 %v1003_v17, %s2656_s1  ;;  %1436 = vmatpush.msrb.mxu1 %v3146_v35  ;;  %v1196_v32 = vpop.permute.xlu0 %1195  ;;  %v1041_v16 = vsel %vm178_vm1, %v2364_v8, %v1039_v49 }
 0xbf3   :  { %1332 = vmatpush.msra.mxu3 %v3171_v46  ;;  %1313 = vmatpush.msra.mxu2 %v3175_v21  ;;  %v1198_v7 = vsel %vm168_vm0, %v2294_v5, %v1196_v32 }
 0xbf4   :  { %1437 = vmatpush.msrb.mxu1 %v3165_v20  ;;  %1418 = vmatpush.msrb.mxu0 %v3169_v52 }
 0xbf5   :  { %1333 = vmatpush.msra.mxu3 %v3177_v22  ;;  %1314 = vmatpush.msra.mxu2 %v3181_v53 }
 0xbf6   :  { %1438 = vmatpush.msrb.mxu1 %v3171_v46  ;;  %1419 = vmatpush.msrb.mxu0 %v3175_v21 }
 0xbf7   :  { %1334 = vmatpush.msra.mxu3 %v3183_v4  ;;  %1315 = vmatpush.msra.mxu2 %v3187_v27 }
 0xbf8   :  { %1439 = vmatpush.msrb.mxu1 %v3177_v22  ;;  %1420 = vmatpush.msrb.mxu0 %v3181_v53 }
 0xbf9   :  { %1335 = vmatpush.msra.mxu3 %v3189_v28  ;;  %1316 = vmatpush.msra.mxu2 %v3193_v37 }
 0xbfa   :  { %1048 = vrot.lane.b32.xlu2 %v3070_v45, %s2656_s1  ;;  %1440 = vmatpush.msrb.mxu1 %v3183_v4 }
 0xbfb   :  { %1336 = vmatpush.msra.mxu3 %v3195_v42  ;;  %1421 = vmatpush.msrb.mxu0 %v3187_v27 }
 0xbfc   :  { %1441 = vmatpush.msrb.mxu1 %v3189_v28  ;;  %1317 = vmatpush.msra.mxu2 %v3203_v57 }
 0xbfd   :  { %1337 = vmatpush.msra.mxu3 %v3205_v58  ;;  %1422 = vmatpush.msrb.mxu0 %v3193_v37 }
 0xbfe   :  { %1442 = vmatpush.msrb.mxu1 %v3195_v42  ;;  %1522 = vmatpush.msrb.mxu2 %v3144_v34 }
 0xbff   :  { %1542 = vmatpush.msrb.mxu3 %v3146_v35  ;;  %1423 = vmatpush.msrb.mxu0 %v3203_v57 }
 0xc00   :  { %1443 = vmatpush.msrb.mxu1 %v3205_v58  ;;  %1285 = vrot.lane.b32.xlu1 %v1198_v7, %s2656_s1 }
 0xc01   :  { %1523 = vmatpush.msrb.mxu2 %v3163_v19  ;;  %1543 = vmatpush.msrb.mxu3 %v3165_v20 }
 0xc03   :  { %1524 = vmatpush.msrb.mxu2 %v3169_v52  ;;  %1544 = vmatpush.msrb.mxu3 %v3171_v46 }
 0xc05   :  { %1525 = vmatpush.msrb.mxu2 %v3175_v21  ;;  %1545 = vmatpush.msrb.mxu3 %v3177_v22 }
 0xc07   :  { %1526 = vmatpush.msrb.mxu2 %v3181_v53  ;;  %1546 = vmatpush.msrb.mxu3 %v3183_v4 }
 0xc09   :  { %1527 = vmatpush.msrb.mxu2 %v3187_v27  ;;  %1547 = vmatpush.msrb.mxu3 %v3189_v28 }
 0xc0b   :  { %1528 = vmatpush.msrb.mxu2 %v3193_v37  ;;  %1548 = vmatpush.msrb.mxu3 %v3195_v42 }
 0xc0d   :  { %1529 = vmatpush.msrb.mxu2 %v3203_v57  ;;  %1549 = vmatpush.msrb.mxu3 %v3205_v58 }
 0xc4c   :  { %v1006_v6 = vpop.permute.xlu2 %1005 }
 0xc4d   :  { %v3245_v40 = vadd.f32 %v1006_v6, %v3157_v14  ;;  %v1045_v14 = vrot.slane %v3110_v2, 6 }
 0xc4f   :  { %2463 = vtanh.f32 %v3245_v40  ;;  %v1047_v39 = vsel %vm178_vm1, %v2365_v11, %v1045_v14 }
 0xc54   :  { %v1049_v15 = vpop.permute.xlu2 %1048 }
 0xc55   :  { %v2464_v33 = vpop.eup %2463 }
 0xc56   :  { %v3262_v9 = vmul.f32 %v2464_v33, %v3155_v13  ;;  %v1051_v13 = vrot.slane %v3097_v30, 2 }
 0xc58   :  { %v1033_v43 = vrot.slane %v3262_v9, 6  ;;  %v1053_v0 = vsel %vm178_vm1, %v1049_v15, %v1051_v13 }
 0xc5a   :  { %v1035_v17 = vsel %vm178_vm1, %v2983_v48, %v1033_v43  ;;  %v3302_v48 = vld [vmem:[%s3650_s8] sm:$0x3] }
 0xc5b   :  { %v1073_v18 = vsel %vm1072_vm10, %v1035_v17, %v1041_v16  ;;  %v1131_v3 = vperm.slane %v3302_v48, 0  ;;  %v1132_v10 = vperm.slane %v3302_v48, 1 }
 0xc5c   :  { %v1075_v1 = vsel %vm1074_vm11, %v1073_v18, %v1047_v39 }
 0xc5d   :  { %v1077_v30 = vsel %vm1076_vm12, %v1075_v1, %v1053_v0 }
 0xc5e   :  { %1151 = vmatmul.f32.vlgmr.msra.gmra.mxu0 %v1077_v30  ;;  %1174 = vmatmul.f32.vlgmr.msra.gmra.mxu1 %v1077_v30 }
 0xc5f   :  { %1628 = vmatpush.msra.mxu0 %v3144_v34  ;;  %1648 = vmatpush.msra.mxu1 %v3146_v35 }
 0xc61   :  { %1629 = vmatpush.msra.mxu0 %v3163_v19  ;;  %1649 = vmatpush.msra.mxu1 %v3165_v20 }
 0xc63   :  { %1630 = vmatpush.msra.mxu0 %v3169_v52  ;;  %1650 = vmatpush.msra.mxu1 %v3171_v46 }
 0xc65   :  { %1631 = vmatpush.msra.mxu0 %v3175_v21  ;;  %1651 = vmatpush.msra.mxu1 %v3177_v22 }
 0xc67   :  { %1632 = vmatpush.msra.mxu0 %v3181_v53  ;;  %1652 = vmatpush.msra.mxu1 %v3183_v4 }
 0xc69   :  { %1633 = vmatpush.msra.mxu0 %v3187_v27  ;;  %1653 = vmatpush.msra.mxu1 %v3189_v28 }
 0xc6b   :  { %1634 = vmatpush.msra.mxu0 %v3193_v37  ;;  %1654 = vmatpush.msra.mxu1 %v3195_v42 }
 0xc6d   :  { %1635 = vmatpush.msra.mxu0 %v3203_v57  ;;  %1655 = vmatpush.msra.mxu1 %v3205_v58 }
 0xc6f   :  { %v1219_v23 = vpop.f32.mrf.mxu2 }
 0xc70   :  { %v1239_v24 = vpop.f32.mrf.mxu3 }
 0xcdb   :  { %v1152_v25 = vpop.f32.mrf.mxu0  ;;  %v1175_v26 = vpop.f32.mrf.mxu1 }
 0xcdc   :  { %v3308_v29 = vadd.f32 %v1152_v25, %v1131_v3  ;;  %v3312_v36 = vadd.f32 %v1175_v26, %v1132_v10  ;;  %v2366_v25 = vpack.i.bf16 %v3122_v12, %v3110_v2  ;;  %v1286_v26 = vpop.permute.xlu1 %1285 }
 0xcde   :  { %v1242_v38 = vadd.f32 %v1219_v23, %v3308_v29  ;;  %v1243_v51 = vadd.f32 %v1239_v24, %v3312_v36 }
 0xce0   :  { %v2298_v44 = vmul.f32 -1.442695, %v1242_v38  ;;  %v2299_v55 = vmul.f32 -1.442695, %v1243_v51 }
 0xce2   :  { %2465 = vpow2.f32 %v2298_v44 }
 0xce3   :  { %2467 = vpow2.f32 %v2299_v55 }
 0xce8   :  { %v2466_v56 = vpop.eup %2465 }
 0xce9   :  { %v2468_v59 = vpop.eup %2467  ;;  %v1250_v60 = vadd.f32 1.0, %v2466_v56 }
 0xcea   :  { %v1251_v61 = vadd.f32 1.0, %v2468_v59 }
 0xceb   :  { %2469 = vrcp.f32 %v1250_v60  ;;  %v1263_v15 = vand.u32 2147483648, %v1250_v60  ;;  %vm1257_vm3 = vweird.f32 %v1250_v60  ;;  %v1261_v16 = vand.u32 2147483647, %v1250_v60 }
 0xcec   :  { %2471 = vrcp.f32 %v1251_v61  ;;  %v1278_v8 = vand.u32 2147483648, %v1251_v61  ;;  %v1276_v49 = vand.u32 2147483647, %v1251_v61  ;;  %vm1272_vm15 = vweird.f32 %v1251_v61 }
 0xced   :  { %v1264_v1 = vor.u32 1.1754944e-38, %v1263_v15  ;;  %vm1262_vm6 = vcmp.eq.f32.partialorder %v1261_v16, 8.507059e+37 }
 0xcee   :  { %v1279_v13 = vor.u32 1.1754944e-38, %v1278_v8  ;;  %vm1277_vm4 = vcmp.eq.f32.partialorder %v1276_v49, 8.507059e+37 }
 0xcf1   :  { %v2470_v63 = vpop.eup %2469 }
 0xcf2   :  { %v2472_v5 = vpop.eup %2471  ;;  %v1253_v6 = vmul.f32 %v2470_v63, %v1250_v60  ;;  %vm1258_vm14 = vweird.f32 %v2470_v63  ;;  %v1060_v60 = vrot.slane %v3041_v62, 2  ;;  %v1056_v62 = vsel %vm178_vm1, %v3101_v31, %v595_v50 }
 0xcf3   :  { %v1268_v32 = vmul.f32 %v2472_v5, %v1251_v61  ;;  %vm1273_vm13 = vweird.f32 %v2472_v5  ;;  %vm1259_vm5 = vmor %vm1257_vm3, %vm1258_vm14 }
 0xcf4   :  { %v1254_v7 = vsub.f32 1.0, %v1253_v6  ;;  %vm1274_vm2 = vmor %vm1272_vm15, %vm1273_vm13 }
 0xcf5   :  { %v1269_v41 = vsub.f32 1.0, %v1268_v32 }
 0xcf6   :  { %v1255_v33 = vmul.f32 %v2470_v63, %v1254_v7 }
 0xcf7   :  { %v1270_v11 = vmul.f32 %v2472_v5, %v1269_v41 }
 0xcf8   :  { %v1256_v43 = vadd.f32 %v2470_v63, %v1255_v33 }
 0xcf9   :  { %v1271_v14 = vadd.f32 %v2472_v5, %v1270_v11 }
 0xcfa   :  { %v1260_v18 = vsel %vm1259_vm5, %v2470_v63, %v1256_v43 }
 0xcfb   :  { %v1275_v17 = vsel %vm1274_vm2, %v2472_v5, %v1271_v14  ;;  %v1265_v23 = vsel %vm1262_vm6, %v1264_v1, %v1260_v18  ;;  %v1066_v5 = vrot.slane %v3012_v54, 6  ;;  %v1069_v54 = vrot.slane %v2979_v47, 2 }
 0xcfc   :  { %v1280_v39 = vsel %vm1277_vm4, %v1279_v13, %v1275_v17  ;;  %v1288_v38 = vmul.f32 %v1286_v26, %v1265_v23 }
 0xcfd   :  { %v1282_v0 = vmul.f32 2.0, %v1280_v39 }
 0xcff   :  { %v2300_v30 = vadd.f32 -1.0, %v1282_v0 }
 0xd01   :  { %v1289_v24 = vmul.f32 %v2300_v30, %v1265_v23 }
 0xd03   :  { %1291 = vrot.lane.b32.xlu2 %v1289_v24, %s2656_s1 }
 0xd0b   :  { %2367 = vrot.lane.b32.xlu2 %v2366_v25, %s2656_s1 }
 0xd5d   :  { %v1292_v51 = vpop.permute.xlu2 %1291 }
 0xd5e   :  { %v3320_v44 = vadd.f32 %v1292_v51, %v1288_v38 }
 0xd60   :  { %2473 = vtanh.f32 %v3320_v44 }
 0xd65   :  { %v2368_v59 = vpop.permute.xlu2 %2367 }
 0xd66   :  { %v2474_v55 = vpop.eup %2473  ;;  %v2369_v2 = vunpack.i.l.bf16 %v2368_v59  ;;  %v2370_v61 = vunpack.i.h.bf16 %v2368_v59 }
 0xd67   :  { %v3323_v56 = vmul.f32 %v2474_v55, %v1280_v39 }
 0xd68   :  { %v1062_v63 = vsel %vm178_vm1, %v2369_v2, %v1060_v60  ;;  %v1068_v6 = vsel %vm178_vm1, %v2370_v61, %v1066_v5  ;;  %v1391_v61 = vrot.slane %v3320_v44, 6 }
 0xd69   :  { %1298 = vrot.lane.b32.xlu0 %v3323_v56, %s2656_s1  ;;  %v1078_v32 = vsel %vm1072_vm10, %v1056_v62, %v1062_v63 }
 0xd6a   :  { %v1079_v50 = vsel %vm1074_vm11, %v1078_v32, %v1068_v6 }
 0xd71   :  { %1012 = vrot.lane.b32.xlu0 %v3262_v9, %s2656_s1 }
 0xddb   :  { %v3329_v12 = vpop.permute.xlu0 %1298 }
 0xddc   :  { %2301 = vmatmul.msk.f32.vlgmr.msra.gmra.mxu2 %vm178_vm1, %v3329_v12  ;;  %2302 = vmatmul.msk.f32.vlgmr.msra.gmra.mxu3 %vm178_vm1, %v3329_v12 }
 0xddd   :  { %1727 = vmatpush.msra.mxu2 %v3144_v34  ;;  %1747 = vmatpush.msra.mxu3 %v3146_v35 }
 0xddf   :  { %1728 = vmatpush.msra.mxu2 %v3163_v19  ;;  %1748 = vmatpush.msra.mxu3 %v3165_v20 }
 0xde1   :  { %1729 = vmatpush.msra.mxu2 %v3169_v52  ;;  %1749 = vmatpush.msra.mxu3 %v3171_v46 }
 0xde3   :  { %v1013_v7 = vpop.permute.xlu0 %1012  ;;  %1730 = vmatpush.msra.mxu2 %v3175_v21  ;;  %1750 = vmatpush.msra.mxu3 %v3177_v22 }
 0xde4   :  { %1016 = vst.msk [vmem:[#allocation8 - $0x6] sm:$0xc0] %vm1015_vm7, %v1013_v7  ;;  %v1071_v45 = vsel %vm178_vm1, %v1013_v7, %v1069_v54 }
 0xde5   :  { %v1080_v31 = vsel %vm1076_vm12, %v1079_v50, %v1071_v45  ;;  %1731 = vmatpush.msra.mxu2 %v3181_v53  ;;  %1751 = vmatpush.msra.mxu3 %v3183_v4 }
 0xde6   :  { %1154 = vmatmul.f32.gmra.mxu0 %v1080_v31  ;;  %1177 = vmatmul.f32.gmra.mxu1 %v1080_v31 }
 0xde7   :  { %1732 = vmatpush.msra.mxu2 %v3187_v27  ;;  %1752 = vmatpush.msra.mxu3 %v3189_v28 }
 0xde9   :  { %1733 = vmatpush.msra.mxu2 %v3193_v37  ;;  %1753 = vmatpush.msra.mxu3 %v3195_v42 }
 0xdeb   :  { %1734 = vmatpush.msra.mxu2 %v3203_v57  ;;  %1754 = vmatpush.msra.mxu3 %v3205_v58 }
 0xe5f   :  { %v1319_v47 = vpop.f32.mrf.mxu2  ;;  %v1339_v41 = vpop.f32.mrf.mxu3 }
 0xe60   :  { %v1344_v33 = vrot.slane %v1319_v47, 6  ;;  %v1345_v8 = vrot.slane %v1339_v41, 6 }
 0xe62   :  { %v1348_v11 = vadd.f32 %v1344_v33, %v3308_v29  ;;  %v1349_v49 = vadd.f32 %v1345_v8, %v3312_v36 }
 0xe64   :  { %v2303_v43 = vmul.f32 -1.442695, %v1348_v11  ;;  %v2304_v14 = vmul.f32 -1.442695, %v1349_v49  ;;  %v3394_v11 = vpop.f32.mrf.mxu0  ;;  %v3396_v49 = vpop.f32.mrf.mxu1 }
 0xe66   :  { %2475 = vpow2.f32 %v2303_v43 }
 0xe67   :  { %2477 = vpow2.f32 %v2304_v14 }
 0xe6c   :  { %v2476_v15 = vpop.eup %2475 }
 0xe6d   :  { %v2478_v13 = vpop.eup %2477  ;;  %v1356_v16 = vadd.f32 1.0, %v2476_v15 }
 0xe6e   :  { %v1357_v17 = vadd.f32 1.0, %v2478_v13 }
 0xe6f   :  { %2479 = vrcp.f32 %v1356_v16  ;;  %v1369_v23 = vand.u32 2147483648, %v1356_v16  ;;  %v1367_v26 = vand.u32 2147483647, %v1356_v16  ;;  %vm1363_vm13 = vweird.f32 %v1356_v16 }
 0xe70   :  { %2481 = vrcp.f32 %v1357_v17  ;;  %v1384_v38 = vand.u32 2147483648, %v1357_v17  ;;  %v1382_v55 = vand.u32 2147483647, %v1357_v17  ;;  %vm1378_vm15 = vweird.f32 %v1357_v17 }
 0xe71   :  { %v1370_v2 = vor.u32 1.1754944e-38, %v1369_v23  ;;  %vm1368_vm2 = vcmp.eq.f32.partialorder %v1367_v26, 8.507059e+37 }
 0xe72   :  { %v1385_v5 = vor.u32 1.1754944e-38, %v1384_v38  ;;  %vm1383_vm4 = vcmp.eq.f32.partialorder %v1382_v55, 8.507059e+37 }
 0xe75   :  { %v2480_v39 = vpop.eup %2479 }
 0xe76   :  { %v2482_v18 = vpop.eup %2481  ;;  %v1359_v0 = vmul.f32 %v2480_v39, %v1356_v16  ;;  %vm1364_vm8 = vweird.f32 %v2480_v39 }
 0xe77   :  { %v1374_v1 = vmul.f32 %v2482_v18, %v1357_v17  ;;  %vm1379_vm9 = vweird.f32 %v2482_v18  ;;  %vm1365_vm14 = vmor %vm1363_vm13, %vm1364_vm8 }
 0xe78   :  { %v1360_v30 = vsub.f32 1.0, %v1359_v0  ;;  %vm1380_vm3 = vmor %vm1378_vm15, %vm1379_vm9 }
 0xe79   :  { %v1375_v24 = vsub.f32 1.0, %v1374_v1 }
 0xe7a   :  { %v1361_v25 = vmul.f32 %v2480_v39, %v1360_v30 }
 0xe7b   :  { %v1376_v51 = vmul.f32 %v2482_v18, %v1375_v24 }
 0xe7c   :  { %v1362_v59 = vadd.f32 %v2480_v39, %v1361_v25 }
 0xe7d   :  { %v1377_v60 = vadd.f32 %v2482_v18, %v1376_v51 }
 0xe7e   :  { %v1366_v63 = vsel %vm1365_vm14, %v2480_v39, %v1362_v59 }
 0xe7f   :  { %v1371_v62 = vsel %vm1368_vm2, %v1370_v2, %v1366_v63  ;;  %v1381_v6 = vsel %vm1380_vm3, %v2482_v18, %v1377_v60 }
 0xe80   :  { %v1386_v32 = vsel %vm1383_vm4, %v1385_v5, %v1381_v6  ;;  %v1393_v54 = vmul.f32 %v1391_v61, %v1371_v62 }
 0xe81   :  { %v1388_v7 = vmul.f32 2.0, %v1386_v32 }
 0xe83   :  { %v2305_v45 = vadd.f32 -1.0, %v1388_v7 }
 0xe85   :  { %v1394_v50 = vmul.f32 %v2305_v45, %v1371_v62 }
 0xe87   :  { %1396 = vrot.lane.b32.xlu1 %v1394_v50, %s2656_s1 }
 0xef9   :  { %v1397_v31 = vpop.permute.xlu1 %1396 }
 0xefa   :  { %v3369_v47 = vadd.f32 %v1397_v31, %v1393_v54 }
 0xefc   :  { %2483 = vtanh.f32 %v3369_v47  ;;  %v1497_v54 = vrot.slane %v3369_v47, 6 }
 0xf02   :  { %v2484_v44 = vpop.eup %2483 }
 0xf03   :  { %v3372_v41 = vmul.f32 %v2484_v44, %v1386_v32 }
 0xf05   :  { %v1403_v33 = vrot.slane %v3372_v41, 2 }
 0xf07   :  { %1404 = vrot.lane.b32.xlu1 %v1403_v33, %s2656_s1 }
 0xf79   :  { %v1405_v8 = vpop.permute.xlu1 %1404 }
 0xf7a   :  { %2306 = vmatmul.msk.f32.vlgmr.msrb.gmra.mxu0 %vm178_vm1, %v1405_v8  ;;  %2307 = vmatmul.msk.f32.vlgmr.msrb.gmra.mxu1 %vm178_vm1, %v1405_v8 }
 0xf7b   :  { %1833 = vmatpush.msrb.mxu0 %v3144_v34  ;;  %1853 = vmatpush.msrb.mxu1 %v3146_v35 }
 0xf7d   :  { %1834 = vmatpush.msrb.mxu0 %v3163_v19  ;;  %1854 = vmatpush.msrb.mxu1 %v3165_v20 }
 0xf7f   :  { %1835 = vmatpush.msrb.mxu0 %v3169_v52  ;;  %1855 = vmatpush.msrb.mxu1 %v3171_v46 }
 0xf81   :  { %1836 = vmatpush.msrb.mxu0 %v3175_v21  ;;  %1856 = vmatpush.msrb.mxu1 %v3177_v22 }
 0xf83   :  { %1837 = vmatpush.msrb.mxu0 %v3181_v53  ;;  %1857 = vmatpush.msrb.mxu1 %v3183_v4 }
 0xf85   :  { %1838 = vmatpush.msrb.mxu0 %v3187_v27  ;;  %1858 = vmatpush.msrb.mxu1 %v3189_v28 }
 0xf87   :  { %1839 = vmatpush.msrb.mxu0 %v3193_v37  ;;  %1859 = vmatpush.msrb.mxu1 %v3195_v42 }
 0xf89   :  { %1840 = vmatpush.msrb.mxu0 %v3203_v57  ;;  %1860 = vmatpush.msrb.mxu1 %v3205_v58 }
 0xff7   :  { %v1425_v43 = vpop.f32.mrf.mxu0  ;;  %v1445_v14 = vpop.f32.mrf.mxu1 }
 0xff8   :  { %v1450_v15 = vrot.slane %v1425_v43, 4  ;;  %v1451_v13 = vrot.slane %v1445_v14, 4 }
 0xffa   :  { %v1454_v16 = vadd.f32 %v1450_v15, %v3308_v29  ;;  %v1455_v17 = vadd.f32 %v1451_v13, %v3312_v36 }
 0xffc   :  { %v2308_v39 = vmul.f32 -1.442695, %v1454_v16  ;;  %v2309_v18 = vmul.f32 -1.442695, %v1455_v17 }
 0xffe   :  { %2485 = vpow2.f32 %v2308_v39 }
 0xfff   :  { %2487 = vpow2.f32 %v2309_v18 }
0x1004   :  { %v2486_v0 = vpop.eup %2485 }
0x1005   :  { %v2488_v1 = vpop.eup %2487  ;;  %v1462_v30 = vadd.f32 1.0, %v2486_v0 }
0x1006   :  { %v1463_v23 = vadd.f32 1.0, %v2488_v1 }
0x1007   :  { %2489 = vrcp.f32 %v1462_v30  ;;  %v1475_v55 = vand.u32 2147483648, %v1462_v30  ;;  %v1473_v60 = vand.u32 2147483647, %v1462_v30  ;;  %vm1469_vm8 = vweird.f32 %v1462_v30 }
0x1008   :  { %2491 = vrcp.f32 %v1463_v23  ;;  %v1490_v61 = vand.u32 2147483648, %v1463_v23  ;;  %v1488_v5 = vand.u32 2147483647, %v1463_v23  ;;  %vm1484_vm13 = vweird.f32 %v1463_v23 }
0x1009   :  { %v1476_v6 = vor.u32 1.1754944e-38, %v1475_v55  ;;  %vm1474_vm14 = vcmp.eq.f32.partialorder %v1473_v60, 8.507059e+37 }
0x100a   :  { %v1491_v45 = vor.u32 1.1754944e-38, %v1490_v61  ;;  %vm1489_vm2 = vcmp.eq.f32.partialorder %v1488_v5, 8.507059e+37 }
0x100d   :  { %v2490_v24 = vpop.eup %2489 }
0x100e   :  { %v2492_v25 = vpop.eup %2491  ;;  %v1465_v26 = vmul.f32 %v2490_v24, %v1462_v30  ;;  %vm1470_vm5 = vweird.f32 %v2490_v24 }
0x100f   :  { %v1480_v38 = vmul.f32 %v2492_v25, %v1463_v23  ;;  %vm1485_vm6 = vweird.f32 %v2492_v25  ;;  %vm1471_vm9 = vmor %vm1469_vm8, %vm1470_vm5 }
0x1010   :  { %v1466_v51 = vsub.f32 1.0, %v1465_v26  ;;  %vm1486_vm15 = vmor %vm1484_vm13, %vm1485_vm6 }
0x1011   :  { %v1481_v59 = vsub.f32 1.0, %v1480_v38 }
0x1012   :  { %v1467_v2 = vmul.f32 %v2490_v24, %v1466_v51 }
0x1013   :  { %v1482_v63 = vmul.f32 %v2492_v25, %v1481_v59 }
0x1014   :  { %v1468_v62 = vadd.f32 %v2490_v24, %v1467_v2 }
0x1015   :  { %v1483_v32 = vadd.f32 %v2492_v25, %v1482_v63 }
0x1016   :  { %v1472_v7 = vsel %vm1471_vm9, %v2490_v24, %v1468_v62 }
0x1017   :  { %v1477_v50 = vsel %vm1474_vm14, %v1476_v6, %v1472_v7  ;;  %v1487_v31 = vsel %vm1486_vm15, %v2492_v25, %v1483_v32 }
0x1018   :  { %v1492_v44 = vsel %vm1489_vm2, %v1491_v45, %v1487_v31  ;;  %v1499_v33 = vmul.f32 %v1497_v54, %v1477_v50 }
0x1019   :  { %v1494_v8 = vmul.f32 2.0, %v1492_v44 }
0x101b   :  { %v2310_v43 = vadd.f32 -1.0, %v1494_v8 }
0x101d   :  { %v1500_v14 = vmul.f32 %v2310_v43, %v1477_v50 }
0x101f   :  { %1502 = vrot.lane.b32.xlu2 %v1500_v14, %s2656_s1 }
0x1079   :  { %v1503_v15 = vpop.permute.xlu2 %1502 }
0x107a   :  { %v3402_v13 = vadd.f32 %v1503_v15, %v1499_v33  ;;  %v3447_v33 = vadd.f32 %v3396_v49, %v1132_v10 }
0x107c   :  { %2493 = vtanh.f32 %v3402_v13  ;;  %v1603_v51 = vrot.slane %v3402_v13, 6 }
0x1082   :  { %v2494_v47 = vpop.eup %2493 }
0x1083   :  { %v3405_v16 = vmul.f32 %v2494_v47, %v1492_v44  ;;  %v3442_v44 = vadd.f32 %v3394_v11, %v1131_v3 }
0x1085   :  { %v1509_v17 = vrot.slane %v3405_v16, 4 }
0x1087   :  { %1510 = vrot.lane.b32.xlu0 %v1509_v17, %s2656_s1 }
0x10f9   :  { %v1511_v39 = vpop.permute.xlu0 %1510 }
0x10fa   :  { %2311 = vmatmul.msk.f32.vlgmr.msrb.gmra.mxu2 %vm178_vm1, %v1511_v39  ;;  %2312 = vmatmul.msk.f32.vlgmr.msrb.gmra.mxu3 %vm178_vm1, %v1511_v39 }
0x10fb   :  { %1939 = vmatpush.msrb.mxu2 %v3144_v34  ;;  %1959 = vmatpush.msrb.mxu3 %v3146_v35 }
0x10fd   :  { %1940 = vmatpush.msrb.mxu2 %v3163_v19  ;;  %1960 = vmatpush.msrb.mxu3 %v3165_v20 }
0x10ff   :  { %1941 = vmatpush.msrb.mxu2 %v3169_v52  ;;  %1961 = vmatpush.msrb.mxu3 %v3171_v46 }
0x1101   :  { %1942 = vmatpush.msrb.mxu2 %v3175_v21  ;;  %1962 = vmatpush.msrb.mxu3 %v3177_v22 }
0x1103   :  { %1943 = vmatpush.msrb.mxu2 %v3181_v53  ;;  %1963 = vmatpush.msrb.mxu3 %v3183_v4 }
0x1105   :  { %1944 = vmatpush.msrb.mxu2 %v3187_v27  ;;  %1964 = vmatpush.msrb.mxu3 %v3189_v28 }
0x1107   :  { %1945 = vmatpush.msrb.mxu2 %v3193_v37  ;;  %1965 = vmatpush.msrb.mxu3 %v3195_v42 }
0x1109   :  { %1946 = vmatpush.msrb.mxu2 %v3203_v57  ;;  %1966 = vmatpush.msrb.mxu3 %v3205_v58 }
0x117d   :  { %v1531_v34 = vpop.f32.mrf.mxu2  ;;  %v1551_v35 = vpop.f32.mrf.mxu3 }
0x117e   :  { %v1556_v19 = vrot.slane %v1531_v34, 2  ;;  %v1557_v20 = vrot.slane %v1551_v35, 2 }
0x1180   :  { %v1560_v52 = vadd.f32 %v1556_v19, %v3308_v29  ;;  %v1561_v46 = vadd.f32 %v1557_v20, %v3312_v36 }
0x1182   :  { %v2313_v21 = vmul.f32 -1.442695, %v1560_v52  ;;  %v2314_v22 = vmul.f32 -1.442695, %v1561_v46 }
0x1184   :  { %2495 = vpow2.f32 %v2313_v21 }
0x1185   :  { %2497 = vpow2.f32 %v2314_v22 }
0x118a   :  { %v2496_v53 = vpop.eup %2495 }
0x118b   :  { %v2498_v4 = vpop.eup %2497  ;;  %v1568_v27 = vadd.f32 1.0, %v2496_v53 }
0x118c   :  { %v1569_v28 = vadd.f32 1.0, %v2498_v4 }
0x118d   :  { %2499 = vrcp.f32 %v1568_v27  ;;  %v1581_v0 = vand.u32 2147483648, %v1568_v27  ;;  %v1579_v36 = vand.u32 2147483647, %v1568_v27  ;;  %vm1575_vm5 = vweird.f32 %v1568_v27 }
0x118e   :  { %2501 = vrcp.f32 %v1569_v28  ;;  %v1596_v30 = vand.u32 2147483648, %v1569_v28  ;;  %v1594_v24 = vand.u32 2147483647, %v1569_v28  ;;  %vm1590_vm8 = vweird.f32 %v1569_v28 }
0x118f   :  { %v1582_v26 = vor.u32 1.1754944e-38, %v1581_v0  ;;  %vm1580_vm9 = vcmp.eq.f32.partialorder %v1579_v36, 8.507059e+37 }
0x1190   :  { %v1597_v59 = vor.u32 1.1754944e-38, %v1596_v30  ;;  %vm1595_vm14 = vcmp.eq.f32.partialorder %v1594_v24, 8.507059e+37 }
0x1193   :  { %v2500_v37 = vpop.eup %2499 }
0x1194   :  { %v2502_v42 = vpop.eup %2501  ;;  %v1571_v57 = vmul.f32 %v2500_v37, %v1568_v27  ;;  %vm1576_vm3 = vweird.f32 %v2500_v37 }
0x1195   :  { %v1586_v58 = vmul.f32 %v2502_v42, %v1569_v28  ;;  %vm1591_vm4 = vweird.f32 %v2502_v42  ;;  %vm1577_vm6 = vmor %vm1575_vm5, %vm1576_vm3 }
0x1196   :  { %v1572_v18 = vsub.f32 1.0, %v1571_v57  ;;  %vm1592_vm13 = vmor %vm1590_vm8, %vm1591_vm4 }
0x1197   :  { %v1587_v1 = vsub.f32 1.0, %v1586_v58 }
0x1198   :  { %v1573_v29 = vmul.f32 %v2500_v37, %v1572_v18 }
0x1199   :  { %v1588_v23 = vmul.f32 %v2502_v42, %v1587_v1 }
0x119a   :  { %v1574_v25 = vadd.f32 %v2500_v37, %v1573_v29 }
0x119b   :  { %v1589_v38 = vadd.f32 %v2502_v42, %v1588_v23 }
0x119c   :  { %v1578_v55 = vsel %vm1577_vm6, %v2500_v37, %v1574_v25 }
0x119d   :  { %v1583_v2 = vsel %vm1580_vm9, %v1582_v26, %v1578_v55  ;;  %v1593_v60 = vsel %vm1592_vm13, %v2502_v42, %v1589_v38 }
0x119e   :  { %v1598_v61 = vsel %vm1595_vm14, %v1597_v59, %v1593_v60  ;;  %v1605_v63 = vmul.f32 %v1603_v51, %v1583_v2 }
0x119f   :  { %v1600_v5 = vmul.f32 2.0, %v1598_v61 }
0x11a1   :  { %v2315_v62 = vadd.f32 -1.0, %v1600_v5 }
0x11a3   :  { %v1606_v6 = vmul.f32 %v2315_v62, %v1583_v2 }
0x11a5   :  { %1608 = vrot.lane.b32.xlu1 %v1606_v6, %s2656_s1 }
0x1217   :  { %v1609_v32 = vpop.permute.xlu1 %1608 }
0x1218   :  { %v1611_v54 = vadd.f32 %v1609_v32, %v1605_v63 }
0x121a   :  { %2503 = vtanh.f32 %v1611_v54  ;;  %v1703_v37 = vrot.slane %v1611_v54, 6 }
0x1220   :  { %v2504_v7 = vpop.eup %2503 }
0x1221   :  { %v3431_v45 = vmul.f32 %v2504_v7, %v1598_v61 }
0x1223   :  { %v1615_v50 = vrot.slane %v3431_v45, 6 }
0x1225   :  { %1616 = vrot.lane.b32.xlu2 %v1615_v50, %s2656_s1 }
0x127f   :  { %v1617_v31 = vpop.permute.xlu2 %1616 }
0x1280   :  { %2316 = vmatmul.msk.f32.vlgmr.msra.gmra.mxu0 %vm178_vm1, %v1617_v31  ;;  %2317 = vmatmul.msk.f32.vlgmr.msra.gmra.mxu1 %vm178_vm1, %v1617_v31 }
0x12fd   :  { %v1637_v8 = vpop.f32.mrf.mxu0  ;;  %v1657_v43 = vpop.f32.mrf.mxu1 }
0x12fe   :  { %v1660_v14 = vadd.f32 %v1637_v8, %v3442_v44  ;;  %v1661_v15 = vadd.f32 %v1657_v43, %v3447_v33 }
0x1300   :  { %v2318_v13 = vmul.f32 -1.442695, %v1660_v14  ;;  %v2319_v47 = vmul.f32 -1.442695, %v1661_v15 }
0x1302   :  { %2505 = vpow2.f32 %v2318_v13 }
0x1303   :  { %2507 = vpow2.f32 %v2319_v47 }
0x1308   :  { %v2506_v17 = vpop.eup %2505 }
0x1309   :  { %v2508_v39 = vpop.eup %2507  ;;  %v1668_v34 = vadd.f32 1.0, %v2506_v17 }
0x130a   :  { %v1669_v3 = vadd.f32 1.0, %v2508_v39 }
0x130b   :  { %2509 = vrcp.f32 %v1668_v34  ;;  %v1681_v20 = vand.u32 2147483648, %v1668_v34  ;;  %v1679_v46 = vand.u32 2147483647, %v1668_v34  ;;  %vm1675_vm3 = vweird.f32 %v1668_v34 }
0x130c   :  { %2511 = vrcp.f32 %v1669_v3  ;;  %v1696_v21 = vand.u32 2147483648, %v1669_v3  ;;  %v1694_v53 = vand.u32 2147483647, %v1669_v3  ;;  %vm1690_vm5 = vweird.f32 %v1669_v3 }
0x130d   :  { %v1682_v27 = vor.u32 1.1754944e-38, %v1681_v20  ;;  %vm1680_vm6 = vcmp.eq.f32.partialorder %v1679_v46, 8.507059e+37 }
0x130e   :  { %v1697_v57 = vor.u32 1.1754944e-38, %v1696_v21  ;;  %vm1695_vm9 = vcmp.eq.f32.partialorder %v1694_v53, 8.507059e+37 }
0x1311   :  { %v2510_v48 = vpop.eup %2509 }
0x1312   :  { %v2512_v11 = vpop.eup %2511  ;;  %v1671_v10 = vmul.f32 %v2510_v48, %v1668_v34  ;;  %vm1676_vm15 = vweird.f32 %v2510_v48 }
0x1313   :  { %v1686_v49 = vmul.f32 %v2512_v11, %v1669_v3  ;;  %vm1691_vm2 = vweird.f32 %v2512_v11  ;;  %vm1677_vm4 = vmor %vm1675_vm3, %vm1676_vm15 }
0x1314   :  { %v1672_v35 = vsub.f32 1.0, %v1671_v10  ;;  %vm1692_vm8 = vmor %vm1690_vm5, %vm1691_vm2 }
0x1315   :  { %v1687_v19 = vsub.f32 1.0, %v1686_v49 }
0x1316   :  { %v1673_v52 = vmul.f32 %v2510_v48, %v1672_v35 }
0x1317   :  { %v1688_v22 = vmul.f32 %v2512_v11, %v1687_v19 }
0x1318   :  { %v1674_v4 = vadd.f32 %v2510_v48, %v1673_v52 }
0x1319   :  { %v1689_v28 = vadd.f32 %v2512_v11, %v1688_v22 }
0x131a   :  { %v1678_v42 = vsel %vm1677_vm4, %v2510_v48, %v1674_v4 }
0x131b   :  { %v1683_v58 = vsel %vm1680_vm6, %v1682_v27, %v1678_v42  ;;  %v1693_v18 = vsel %vm1692_vm8, %v2512_v11, %v1689_v28 }
0x131c   :  { %v1698_v0 = vsel %vm1695_vm9, %v1697_v57, %v1693_v18  ;;  %v1705_v1 = vmul.f32 %v1703_v37, %v1683_v58 }
0x131d   :  { %v1700_v29 = vmul.f32 2.0, %v1698_v0 }
0x131f   :  { %v2320_v36 = vadd.f32 -1.0, %v1700_v29 }
0x1321   :  { %v1706_v30 = vmul.f32 %v2320_v36, %v1683_v58 }
0x1323   :  { %1708 = vrot.lane.b32.xlu0 %v1706_v30, %s2656_s1 }
0x1395   :  { %v1709_v23 = vpop.permute.xlu0 %1708 }
0x1396   :  { %v1711_v24 = vadd.f32 %v1709_v23, %v1705_v1 }
0x1398   :  { %2513 = vtanh.f32 %v1711_v24  ;;  %v1808_v49 = vrot.slane %v1711_v24, 6 }
0x139e   :  { %v2514_v25 = vpop.eup %2513 }
0x139f   :  { %v3452_v26 = vmul.f32 %v2514_v25, %v1698_v0 }
0x13a1   :  { %1715 = vrot.lane.b32.xlu1 %v3452_v26, %s2656_s1 }
0x1413   :  { %v3456_v38 = vpop.permute.xlu1 %1715 }
0x1414   :  { %2321 = vmatmul.msk.f32.vlgmr.msra.gmra.mxu2 %vm178_vm1, %v3456_v38  ;;  %2322 = vmatmul.msk.f32.vlgmr.msra.gmra.mxu3 %vm178_vm1, %v3456_v38 }
0x1497   :  { %v1736_v51 = vpop.f32.mrf.mxu2  ;;  %v1756_v55 = vpop.f32.mrf.mxu3 }
0x1498   :  { %v1761_v59 = vrot.slane %v1736_v51, 6  ;;  %v1762_v2 = vrot.slane %v1756_v55, 6 }
0x149a   :  { %v1765_v60 = vadd.f32 %v1761_v59, %v3442_v44  ;;  %v1766_v61 = vadd.f32 %v1762_v2, %v3447_v33 }
0x149c   :  { %v2323_v63 = vmul.f32 -1.442695, %v1765_v60  ;;  %v2324_v5 = vmul.f32 -1.442695, %v1766_v61 }
0x149e   :  { %2515 = vpow2.f32 %v2323_v63 }
0x149f   :  { %2517 = vpow2.f32 %v2324_v5 }
0x14a4   :  { %v2516_v62 = vpop.eup %2515 }
0x14a5   :  { %v2518_v6 = vpop.eup %2517  ;;  %v1773_v32 = vadd.f32 1.0, %v2516_v62 }
0x14a6   :  { %v1774_v54 = vadd.f32 1.0, %v2518_v6 }
0x14a7   :  { %2519 = vrcp.f32 %v1773_v32  ;;  %v1786_v15 = vand.u32 2147483648, %v1773_v32  ;;  %v1784_v17 = vand.u32 2147483647, %v1773_v32  ;;  %vm1780_vm15 = vweird.f32 %v1773_v32 }
0x14a8   :  { %2521 = vrcp.f32 %v1774_v54  ;;  %v1801_v39 = vand.u32 2147483648, %v1774_v54  ;;  %v1799_v3 = vand.u32 2147483647, %v1774_v54  ;;  %vm1795_vm3 = vweird.f32 %v1774_v54 }
0x14a9   :  { %v1787_v11 = vor.u32 1.1754944e-38, %v1786_v15  ;;  %vm1785_vm4 = vcmp.eq.f32.partialorder %v1784_v17, 8.507059e+37 }
0x14aa   :  { %v1802_v19 = vor.u32 1.1754944e-38, %v1801_v39  ;;  %vm1800_vm6 = vcmp.eq.f32.partialorder %v1799_v3, 8.507059e+37 }
0x14ad   :  { %v2520_v7 = vpop.eup %2519 }
0x14ae   :  { %v2522_v31 = vpop.eup %2521  ;;  %v1776_v8 = vmul.f32 %v2520_v7, %v1773_v32  ;;  %vm1781_vm13 = vweird.f32 %v2520_v7 }
0x14af   :  { %v1791_v43 = vmul.f32 %v2522_v31, %v1774_v54  ;;  %vm1796_vm14 = vweird.f32 %v2522_v31  ;;  %vm1782_vm2 = vmor %vm1780_vm15, %vm1781_vm13 }
0x14b0   :  { %v1777_v14 = vsub.f32 1.0, %v1776_v8  ;;  %vm1797_vm5 = vmor %vm1795_vm3, %vm1796_vm14 }
0x14b1   :  { %v1792_v13 = vsub.f32 1.0, %v1791_v43 }
0x14b2   :  { %v1778_v47 = vmul.f32 %v2520_v7, %v1777_v14 }
0x14b3   :  { %v1793_v34 = vmul.f32 %v2522_v31, %v1792_v13 }
0x14b4   :  { %v1779_v48 = vadd.f32 %v2520_v7, %v1778_v47 }
0x14b5   :  { %v1794_v10 = vadd.f32 %v2522_v31, %v1793_v34 }
0x14b6   :  { %v1783_v35 = vsel %vm1782_vm2, %v2520_v7, %v1779_v48 }
0x14b7   :  { %v1788_v20 = vsel %vm1785_vm4, %v1787_v11, %v1783_v35  ;;  %v1798_v52 = vsel %vm1797_vm5, %v2522_v31, %v1794_v10  ;;  %v2371_v35 = vpack.i.bf16 %v3405_v16, %v3372_v41 }
0x14b8   :  { %v1803_v46 = vsel %vm1800_vm6, %v1802_v19, %v1798_v52  ;;  %v1810_v21 = vmul.f32 %v1808_v49, %v1788_v20 }
0x14b9   :  { %v1805_v22 = vmul.f32 2.0, %v1803_v46 }
0x14bb   :  { %v2325_v53 = vadd.f32 -1.0, %v1805_v22 }
0x14bd   :  { %v1811_v4 = vmul.f32 %v2325_v53, %v1788_v20 }
0x14bf   :  { %1813 = vrot.lane.b32.xlu2 %v1811_v4, %s2656_s1 }
0x1519   :  { %v1814_v27 = vpop.permute.xlu2 %1813 }
0x151a   :  { %v1816_v28 = vadd.f32 %v1814_v27, %v1810_v21 }
0x151c   :  { %2523 = vtanh.f32 %v1816_v28  ;;  %v1914_v13 = vrot.slane %v1816_v28, 6 }
0x1522   :  { %v2524_v37 = vpop.eup %2523 }
0x1523   :  { %v3465_v42 = vmul.f32 %v2524_v37, %v1803_v46 }
0x1525   :  { %v1820_v57 = vrot.slane %v3465_v42, 2  ;;  %v2376_v22 = vpack.i.bf16 %v3465_v42, %v3431_v45 }
0x1527   :  { %1821 = vrot.lane.b32.xlu0 %v1820_v57, %s2656_s1 }
0x1599   :  { %v1822_v58 = vpop.permute.xlu0 %1821 }
0x159a   :  { %2326 = vmatmul.msk.f32.vlgmr.msrb.gmra.mxu0 %vm178_vm1, %v1822_v58  ;;  %2327 = vmatmul.msk.f32.vlgmr.msrb.gmra.mxu1 %vm178_vm1, %v1822_v58 }
0x1617   :  { %v1842_v18 = vpop.f32.mrf.mxu0  ;;  %v1862_v0 = vpop.f32.mrf.mxu1 }
0x1618   :  { %v1867_v1 = vrot.slane %v1842_v18, 4  ;;  %v1868_v29 = vrot.slane %v1862_v0, 4 }
0x161a   :  { %v1871_v36 = vadd.f32 %v1867_v1, %v3442_v44  ;;  %v1872_v30 = vadd.f32 %v1868_v29, %v3447_v33 }
0x161c   :  { %v2328_v23 = vmul.f32 -1.442695, %v1871_v36  ;;  %v2329_v24 = vmul.f32 -1.442695, %v1872_v30 }
0x161e   :  { %2525 = vpow2.f32 %v2328_v23  ;;  %v2114_v23 = vld [vmem:[%s3651_s9 + $0x78] sm:$0xff] }
0x161f   :  { %2527 = vpow2.f32 %v2329_v24  ;;  %v2113_v24 = vld [vmem:[%s3651_s9 + $0x70] sm:$0xff]  ;;  %2119 = vmatpush.msra.mxu0 %v2114_v23  ;;  %v2066_v23 = vrot.slane %v3465_v42, 6  ;;  %v2147_v42 = vld [vmem:[%s3653_s11 + $0x18] sm:$0xff] }
0x1621   :  { %2120 = vmatpush.msra.mxu0 %v2113_v24  ;;  %v2072_v24 = vrot.slane %v3452_v26, 2  ;;  %v2148_v26 = vld [vmem:[%s3653_s11 + $0x20] sm:$0xff] }
0x1624   :  { %v2526_v25 = vpop.eup %2525 }
0x1625   :  { %v2528_v51 = vpop.eup %2527  ;;  %v1879_v55 = vadd.f32 1.0, %v2526_v25 }
0x1626   :  { %v1880_v59 = vadd.f32 1.0, %v2528_v51  ;;  %v2110_v51 = vld [vmem:[%s3651_s9 + $0x58] sm:$0xff] }
0x1627   :  { %2529 = vrcp.f32 %v1879_v55  ;;  %v1892_v62 = vand.u32 2147483648, %v1879_v55  ;;  %v1890_v54 = vand.u32 2147483647, %v1879_v55  ;;  %vm1886_vm13 = vweird.f32 %v1879_v55 }
0x1628   :  { %2531 = vrcp.f32 %v1880_v59  ;;  %v1907_v7 = vand.u32 2147483648, %v1880_v59  ;;  %v1905_v8 = vand.u32 2147483647, %v1880_v59  ;;  %vm1901_vm15 = vweird.f32 %v1880_v59 }
0x1629   :  { %v1893_v14 = vor.u32 1.1754944e-38, %v1892_v62  ;;  %vm1891_vm2 = vcmp.eq.f32.partialorder %v1890_v54, 8.507059e+37  ;;  %v2108_v62 = vld [vmem:[%s3651_s9 + $0x48] sm:$0xff] }
0x162a   :  { %v1908_v17 = vor.u32 1.1754944e-38, %v1907_v7  ;;  %vm1906_vm4 = vcmp.eq.f32.partialorder %v1905_v8, 8.507059e+37 }
0x162d   :  { %v2530_v2 = vpop.eup %2529 }
0x162e   :  { %v2532_v60 = vpop.eup %2531  ;;  %v1882_v61 = vmul.f32 %v2530_v2, %v1879_v55  ;;  %vm1887_vm8 = vweird.f32 %v2530_v2 }
0x162f   :  { %v1897_v63 = vmul.f32 %v2532_v60, %v1880_v59  ;;  %vm1902_vm9 = vweird.f32 %v2532_v60  ;;  %vm1888_vm14 = vmor %vm1886_vm13, %vm1887_vm8 }
0x1630   :  { %v1883_v5 = vsub.f32 1.0, %v1882_v61  ;;  %vm1903_vm3 = vmor %vm1901_vm15, %vm1902_vm9 }
0x1631   :  { %v1898_v6 = vsub.f32 1.0, %v1897_v63 }
0x1632   :  { %v1884_v32 = vmul.f32 %v2530_v2, %v1883_v5 }
0x1633   :  { %v1899_v31 = vmul.f32 %v2532_v60, %v1898_v6 }
0x1634   :  { %v1885_v43 = vadd.f32 %v2530_v2, %v1884_v32 }
0x1635   :  { %v1900_v15 = vadd.f32 %v2532_v60, %v1899_v31 }
0x1636   :  { %v1889_v47 = vsel %vm1888_vm14, %v2530_v2, %v1885_v43 }
0x1637   :  { %v1894_v39 = vsel %vm1891_vm2, %v1893_v14, %v1889_v47  ;;  %v1904_v34 = vsel %vm1903_vm3, %v2532_v60, %v1900_v15  ;;  %v2109_v60 = vld [vmem:[%s3651_s9 + $0x50] sm:$0xff] }
0x1638   :  { %v1909_v3 = vsel %vm1906_vm4, %v1908_v17, %v1904_v34  ;;  %v1916_v48 = vmul.f32 %v1914_v13, %v1894_v39 }
0x1639   :  { %v1911_v11 = vmul.f32 2.0, %v1909_v3 }
0x163b   :  { %v2330_v10 = vadd.f32 -1.0, %v1911_v11 }
0x163d   :  { %v1917_v49 = vmul.f32 %v2330_v10, %v1894_v39 }
0x163f   :  { %1919 = vrot.lane.b32.xlu1 %v1917_v49, %s2656_s1  ;;  %v2107_v49 = vld [vmem:[%s3651_s9 + $0x40] sm:$0xff] }
0x1647   :  { %2372 = vrot.lane.b32.xlu1 %v2371_v35, %s2656_s1  ;;  %v2106_v35 = vld [vmem:[%s3651_s9 + $0x38] sm:$0xff] }
0x16b1   :  { %v1920_v19 = vpop.permute.xlu1 %1919 }
0x16b2   :  { %v3477_v20 = vadd.f32 %v1920_v19, %v1916_v48  ;;  %v2105_v19 = vld [vmem:[%s3651_s9 + $0x30] sm:$0xff] }
0x16b4   :  { %2533 = vtanh.f32 %v3477_v20  ;;  %v2020_v15 = vrot.slane %v3477_v20, 6  ;;  %v2104_v20 = vld [vmem:[%s3651_s9 + $0x28] sm:$0xff] }
0x16ba   :  { %v2534_v52 = vpop.eup %2533 }
0x16bb   :  { %v3480_v46 = vmul.f32 %v2534_v52, %v1909_v3  ;;  %v2103_v52 = vld [vmem:[%s3651_s9 + $0x20] sm:$0xff] }
0x16bd   :  { %v1926_v21 = vrot.slane %v3480_v46, 4 }
0x16bf   :  { %1927 = vrot.lane.b32.xlu2 %v1926_v21, %s2656_s1  ;;  %v2102_v21 = vld [vmem:[%s3651_s9 + $0x18] sm:$0xff] }
0x16c7   :  { %2377 = vrot.lane.b32.xlu2 %v2376_v22, %s2656_s1  ;;  %v2101_v22 = vld [vmem:[%s3651_s9 + $0x10] sm:$0xff] }
0x1719   :  { %v1928_v53 = vpop.permute.xlu2 %1927 }
0x171a   :  { %2331 = vmatmul.msk.f32.vlgmr.msrb.gmra.mxu2 %vm178_vm1, %v1928_v53  ;;  %2332 = vmatmul.msk.f32.vlgmr.msrb.gmra.mxu3 %vm178_vm1, %v1928_v53  ;;  %v2100_v53 = vld [vmem:[%s3651_s9 + $0x8] sm:$0xff] }
0x179d   :  { %v1948_v4 = vpop.f32.mrf.mxu2  ;;  %v1968_v27 = vpop.f32.mrf.mxu3 }
0x179e   :  { %v1973_v28 = vrot.slane %v1948_v4, 2  ;;  %v1974_v37 = vrot.slane %v1968_v27, 2  ;;  %v2099_v4 = vld [vmem:[%s3651_s9] sm:$0xff] }
0x17a0   :  { %v1977_v57 = vadd.f32 %v1973_v28, %v3442_v44  ;;  %v1978_v58 = vadd.f32 %v1974_v37, %v3447_v33  ;;  %v2112_v44 = vld [vmem:[%s3651_s9 + $0x68] sm:$0xff]  ;;  %v2111_v33 = vld [vmem:[%s3651_s9 + $0x60] sm:$0xff]  ;;  %v2373_v37 = vpop.permute.xlu1 %2372 }
0x17a1   :  { %2121 = vmatpush.msra.mxu0 %v2112_v44 }
0x17a2   :  { %v2333_v18 = vmul.f32 -1.442695, %v1977_v57  ;;  %v2334_v0 = vmul.f32 -1.442695, %v1978_v58  ;;  %v2378_v58 = vpop.permute.xlu2 %2377 }
0x17a3   :  { %2122 = vmatpush.msra.mxu0 %v2111_v33 }
0x17a4   :  { %2535 = vpow2.f32 %v2333_v18  ;;  %v2060_v18 = vrot.slane %v3480_v46, 2 }
0x17a5   :  { %2537 = vpow2.f32 %v2334_v0  ;;  %2123 = vmatpush.msra.mxu0 %v2110_v51 }
0x17a7   :  { %2124 = vmatpush.msra.mxu0 %v2109_v60  ;;  %v2145_v60 = vld [vmem:[%s3653_s11 + $0x8] sm:$0xff] }
0x17a9   :  { %2125 = vmatpush.msra.mxu0 %v2108_v62 }
0x17aa   :  { %v2536_v1 = vpop.eup %2535 }
0x17ab   :  { %v2538_v29 = vpop.eup %2537  ;;  %v1985_v36 = vadd.f32 1.0, %v2536_v1  ;;  %2126 = vmatpush.msra.mxu0 %v2107_v49  ;;  %v2375_v1 = vunpack.i.h.bf16 %v2373_v37 }
0x17ac   :  { %v1986_v30 = vadd.f32 1.0, %v2538_v29  ;;  %v2374_v29 = vunpack.i.l.bf16 %v2373_v37 }
0x17ad   :  { %2539 = vrcp.f32 %v1985_v36  ;;  %v1998_v5 = vand.u32 2147483648, %v1985_v36  ;;  %v1996_v32 = vand.u32 2147483647, %v1985_v36  ;;  %vm1992_vm8 = vweird.f32 %v1985_v36  ;;  %2127 = vmatpush.msra.mxu0 %v2106_v35  ;;  %v2383_v35 = vld [vmem:[%s3655_s13] ss:$0 sm:$0xff] }
0x17ae   :  { %2541 = vrcp.f32 %v1986_v30  ;;  %v2013_v54 = vand.u32 2147483648, %v1986_v30  ;;  %v2011_v31 = vand.u32 2147483647, %v1986_v30  ;;  %vm2007_vm13 = vweird.f32 %v1986_v30 }
0x17af   :  { %v1999_v43 = vor.u32 1.1754944e-38, %v1998_v5  ;;  %vm1997_vm14 = vcmp.eq.f32.partialorder %v1996_v32, 8.507059e+37  ;;  %2128 = vmatpush.msra.mxu0 %v2105_v19  ;;  %v2062_v44 = vsel %vm178_vm1, %v2374_v29, %v2060_v18  ;;  %v2081_v5 = vrot.slane %v3405_v16, 2 }
0x17b0   :  { %v2014_v47 = vor.u32 1.1754944e-38, %v2013_v54  ;;  %vm2012_vm2 = vcmp.eq.f32.partialorder %v2011_v31, 8.507059e+37  ;;  %v2077_v31 = vsel %vm178_vm1, %v3456_v38, %v1615_v50 }
0x17b1   :  { %2129 = vmatpush.msra.mxu0 %v2104_v20 }
0x17b3   :  { %v2540_v25 = vpop.eup %2539  ;;  %2130 = vmatpush.msra.mxu0 %v2103_v52 }
0x17b4   :  { %v2542_v55 = vpop.eup %2541  ;;  %v1988_v59 = vmul.f32 %v2540_v25, %v1985_v36  ;;  %vm1993_vm5 = vweird.f32 %v2540_v25  ;;  %v2379_v36 = vunpack.i.l.bf16 %v2378_v58 }
0x17b5   :  { %v2003_v2 = vmul.f32 %v2542_v55, %v1986_v30  ;;  %vm2008_vm6 = vweird.f32 %v2542_v55  ;;  %vm1994_vm9 = vmor %vm1992_vm8, %vm1993_vm5  ;;  %2131 = vmatpush.msra.mxu0 %v2102_v21 }
0x17b6   :  { %v1989_v61 = vsub.f32 1.0, %v1988_v59  ;;  %vm2009_vm15 = vmor %vm2007_vm13, %vm2008_vm6  ;;  %v2074_v51 = vsel %vm178_vm1, %v2379_v36, %v2072_v24 }
0x17b7   :  { %v2004_v63 = vsub.f32 1.0, %v2003_v2  ;;  %2132 = vmatpush.msra.mxu0 %v2101_v22  ;;  %v2146_v2 = vld [vmem:[%s3653_s11 + $0x10] sm:$0xff] }
0x17b8   :  { %v1990_v6 = vmul.f32 %v2540_v25, %v1989_v61  ;;  %v2144_v61 = vld [vmem:[%s3653_s11] sm:$0xff] }
0x17b9   :  { %v2005_v7 = vmul.f32 %v2542_v55, %v2004_v63  ;;  %2133 = vmatpush.msra.mxu0 %v2100_v53  ;;  %v2380_v63 = vunpack.i.h.bf16 %v2378_v58 }
0x17ba   :  { %v1991_v8 = vadd.f32 %v2540_v25, %v1990_v6  ;;  %v2087_v6 = vrot.slane %v3372_v41, 6 }
0x17bb   :  { %v2006_v14 = vadd.f32 %v2542_v55, %v2005_v7  ;;  %2134 = vmatpush.msra.mxu0 %v2099_v4  ;;  %v2083_v32 = vsel %vm178_vm1, %v2380_v63, %v2081_v5  ;;  %v2090_v7 = vrot.slane %v3323_v56, 2  ;;  %v2381_v56 = vld [vmem:[%s3652_s10] ss:$0 sm:$0xff] }
0x17bc   :  { %v1995_v13 = vsel %vm1994_vm9, %v2540_v25, %v1991_v8  ;;  %v2068_v25 = vsel %vm178_vm1, %v2375_v1, %v2066_v23 }
0x17bd   :  { %v2000_v17 = vsel %vm1997_vm14, %v1999_v43, %v1995_v13  ;;  %v2010_v39 = vsel %vm2009_vm15, %v2542_v55, %v2006_v14  ;;  %v2096_v43 = vsel %vm1072_vm10, %v2077_v31, %v2083_v32 }
0x17be   :  { %v2015_v34 = vsel %vm2012_vm2, %v2014_v47, %v2010_v39  ;;  %v2022_v3 = vmul.f32 %v2020_v15, %v2000_v17 }
0x17bf   :  { %v2017_v48 = vmul.f32 2.0, %v2015_v34 }
0x17c1   :  { %v2335_v11 = vadd.f32 -1.0, %v2017_v48 }
0x17c3   :  { %v2023_v10 = vmul.f32 %v2335_v11, %v2000_v17  ;;  %v2382_v11 = vld [vmem:[%s3654_s12] ss:$0 sm:$0xff]  ;;  %s2216_s12 = sshll.u32 %s3658_s16, 4  ;;  %s2659_s16 = smov [#allocation9]   ;;  %s2217_s12 = int_to_ptr.hbm [resolvable:$true] %s2216_s12 }
0x17c4   :  { %s2227_s7 = sshll.u32 %s2659_s16, 4  ;;  %s2228_s7 = int_to_ptr.vmem [resolvable:$true] %s2227_s7 }
0x17c5   :  { %2025 = vrot.lane.b32.xlu0 %v2023_v10, %s2656_s1 }
0x17cd   :  { %2084 = vrot.lane.b32.xlu0 %v3480_v46, %s2656_s1 }
0x1837   :  { %v2026_v27 = vpop.permute.xlu0 %2025 }
0x1838   :  { %v3543_v28 = vadd.f32 %v2026_v27, %v2022_v3 }
0x183a   :  { %2543 = vtanh.f32 %v3543_v28 }
0x183f   :  { %v2085_v62 = vpop.permute.xlu0 %2084 }
0x1840   :  { %v2544_v57 = vpop.eup %2543  ;;  %v2089_v54 = vsel %vm178_vm1, %v2085_v62, %v2087_v6 }
0x1841   :  { %v2030_v0 = vmul.f32 %v2544_v57, %v2015_v34  ;;  %v2097_v41 = vsel %vm1074_vm11, %v2096_v43, %v2089_v54 }
0x1843   :  { %2032 = vrot.lane.b32.xlu1 %v2030_v0, %s2656_s1  ;;  %v2054_v30 = vrot.slane %v2030_v0, 6 }
0x1845   :  { %v2056_v33 = vsel %vm178_vm1, %v3329_v12, %v2054_v30  ;;  %v2151_v12 = vld [vmem:[%s3653_s11 + $0x38] sm:$0xff] }
0x1846   :  { %v2093_v46 = vsel %vm1072_vm10, %v2056_v33, %v2062_v44  ;;  %2170 = vmatpush.msrb.mxu0 %v2151_v12  ;;  %2338 = vmatpush.msra.mxu1 %v2151_v12 }
0x1847   :  { %v2094_v55 = vsel %vm1074_vm11, %v2093_v46, %v2068_v25 }
0x1848   :  { %v2095_v59 = vsel %vm1076_vm12, %v2094_v55, %v2074_v51 }
0x1849   :  { %2135 = vmatmul.f32.vlgmr.msra.gmra.mxu0 %v2095_v59 }
0x184b   :  { %1017 = vrot.lane.b32.xlu1 %v3262_v9, %s2654_s26  ;;  %v2150_v9 = vld [vmem:[%s3653_s11 + $0x30] sm:$0xff] }
0x184c   :  { %2171 = vmatpush.msrb.mxu0 %v2150_v9  ;;  %2339 = vmatpush.msra.mxu1 %v2150_v9 }
0x1853   :  { %1023 = vrot.lane.b32.xlu1 %v3245_v40, %s2656_s1 }
0x185b   :  { %1027 = vrot.lane.b32.xlu1 %v3245_v40, %s2654_s26  ;;  %v2149_v40 = vld [vmem:[%s3653_s11 + $0x28] sm:$0xff] }
0x185c   :  { %2172 = vmatpush.msrb.mxu0 %v2149_v40  ;;  %2340 = vmatpush.msra.mxu1 %v2149_v40 }
0x185e   :  { %2173 = vmatpush.msrb.mxu0 %v2148_v26  ;;  %2341 = vmatpush.msra.mxu1 %v2148_v26 }
0x1860   :  { %2174 = vmatpush.msrb.mxu0 %v2147_v42  ;;  %2342 = vmatpush.msra.mxu1 %v2147_v42 }
0x1862   :  { %2175 = vmatpush.msrb.mxu0 %v2146_v2  ;;  %2343 = vmatpush.msra.mxu1 %v2146_v2 }
0x1863   :  { %2037 = vrot.lane.b32.xlu1 %v2030_v0, %s2654_s26 }
0x1864   :  { %2176 = vmatpush.msrb.mxu0 %v2145_v60  ;;  %2344 = vmatpush.msra.mxu1 %v2145_v60 }
0x1866   :  { %2177 = vmatpush.msrb.mxu0 %v2144_v61  ;;  %2345 = vmatpush.msra.mxu1 %v2144_v61 }
0x186b   :  { %2043 = vrot.lane.b32.xlu1 %v3543_v28, %s2656_s1 }
0x18b5   :  { %v2033_v8 = vpop.permute.xlu1 %2032 }
0x18b6   :  { %2036 = vst.msk [vmem:[#allocation8 - $0x2] sm:$0xc0] %vm1015_vm7, %v2033_v8  ;;  %v2092_v16 = vsel %vm178_vm1, %v2033_v8, %v2090_v7 }
0x18b7   :  { %v2098_v14 = vsel %vm1076_vm12, %v2097_v41, %v2092_v16 }
0x18b8   :  { %2138 = vmatmul.f32.gmra.mxu0 %v2098_v14 }
0x18bd   :  { %v1018_v15 = vpop.permute.xlu1 %1017 }
0x18be   :  { %1021 = vst.msk [vmem:[#allocation8 - $0x4] sm:$0xc0] %vm1015_vm7, %v1018_v15 }
0x18c5   :  { %v1024_v45 = vpop.permute.xlu1 %1023 }
0x18c6   :  { %1026 = vst.msk [vmem:[#allocation9 - $0x6] sm:$0xc0] %vm1015_vm7, %v1024_v45  ;;  %v2136_v50 = vpop.f32.mrf.mxu0 }
0x18c7   :  { %v2137_v38 = vadd.f32 %v2381_v56, %v2136_v50 }
0x18c9   :  { %v2142_v13 = vmax.f32 %v2137_v38, 0.0 }
0x18cb   :  { %2336 = vmatmul.msk.f32.vlgmr.msrb.gmra.mxu0 %vm178_vm1, %v2142_v13 }
0x18cd   :  { %v1028_v47 = vpop.permute.xlu1 %1027 }
0x18ce   :  { %1031 = vst.msk [vmem:[#allocation9 - $0x4] sm:$0xc0] %vm1015_vm7, %v1028_v47 }
0x18d5   :  { %v2038_v17 = vpop.permute.xlu1 %2037 }
0x18d6   :  { %2041 = vst.msk [vmem:[#allocation8] sm:$0xc0] %vm1015_vm7, %v2038_v17 }
0x18d7   :  { %2222 = dma.vmem_to_hbm [thread:$0]  %s2215_s3, 128, %s2217_s12, [#allocation5], %s2654_s26, %s2654_s26, %s2658_s25  }
0x18dd   :  { %v2044_v39 = vpop.permute.xlu1 %2043 }
0x18de   :  { %2047 = vst.msk [vmem:[#allocation9 - $0x2] sm:$0xc0] %vm1015_vm7, %v2044_v39 }
0x1935   :  { %v2139_v34 = vpop.f32.mrf.mxu0 }
0x1936   :  { %v2140_v3 = vadd.f32 %v2381_v56, %v2139_v34 }
0x1938   :  { %v2143_v48 = vmax.f32 %v2140_v3, 0.0 }
0x193a   :  { %2337 = vmatmul.msk.f32.vlgmr.msra.gmra.mxu1 %vm178_vm1, %v2143_v48  ;;  %vm2205_vm1 = vcmask 7168  }
0x1948   :  { %v2179_v10 = vpop.f32.mrf.mxu0 }
0x1949   :  { %v2180_v49 = vadd.f32 %v2382_v11, %v2179_v10 }
0x194b   :  { %v2185_v19 = vmax.f32 %v2180_v49, 0.0 }
0x194d   :  { %v2191_v20 = vmul.f32 %v2383_v35, %v2185_v19 }
0x194f   :  { %v2193_v52 = vsel %vm168_vm0, %v2191_v20, 0.0 }
0x1950   :  { %2194 = vadd.xlane.f32.xlu2 %v2193_v52 }
0x1968   :  { %2048 = vrot.lane.b32.xlu2 %v3543_v28, %s2654_s26  ;;  %v2384_v28 = vld [vmem:[#allocation2] ss:$0 sm:$0xff] }
0x19b7   :  { %v2182_v21 = vpop.f32.mrf.mxu1 }
0x19b8   :  { %v2183_v22 = vadd.f32 %v2382_v11, %v2182_v21 }
0x19ba   :  { %v2186_v53 = vmax.f32 %v2183_v22, 0.0 }
0x19bc   :  { %v2192_v4 = vmul.f32 %v2383_v35, %v2186_v53 }
0x19be   :  { %v2196_v27 = vsel %vm168_vm0, %v2192_v4, 0.0 }
0x19bf   :  { %2197 = vadd.xlane.f32.xlu0 %v2196_v27 }
0x19c3   :  { %v2195_v37 = vpop.xlane.xlu2 %2194 }
0x19c4   :  { %v2203_v57 = vadd.f32 %v2384_v28, %v2195_v37 }
0x19c6   :  { %2206 = vst.msk [vmem:[%s3657_s15] sm:$0xff] %vm2205_vm1, %v2203_v57 }
0x19cb   :  { %v2049_v58 = vpop.permute.xlu2 %2048 }
0x19cc   :  { %2052 = vst.msk [vmem:[#allocation9] sm:$0xc0] %vm1015_vm7, %v2049_v58 }
0x19cd   :  { %2235 = dma.vmem_to_hbm [thread:$0]  %s2228_s7, 128, %s2230_s28, [#allocation10], %s2654_s26, %s2654_s26, %s2658_s25  }
0x1a32   :  { %v2198_v18 = vpop.xlane.xlu0 %2197 }
0x1a33   :  { %v2204_v0 = vadd.f32 %v2384_v28, %v2198_v18 }
0x1a35   :  { %2207 = vst.msk [vmem:[%s3657_s15 + $0x8] sm:$0xff] %vm2205_vm1, %v2204_v0 }
0x1a36   :  { %2645 = dma.done.wait [#allocation5], 128  }
0x1a37   :  { %2646 = vsyncadd [#allocation5], 4294967168 }
0x1a38   :  { %2647 = dma.done.wait [#allocation10], 128  }
0x1a39   :  { %2648 = vsyncadd [#allocation10], 4294967168 }
0x1a3a   :  { %2246 = vsyncpa [#allocation4], 1 }
0x1a3b   :  { %2247 = vsyncpa [#allocation7], 1 }
0x1a3c   :  { %2248 = vsyncpa [#allocation5], 1 }
0x1a3d   :  { %2249 = vsyncpa [#allocation10], 1 }

</bundles_post_ra>
